<compile_context>
chip_gen: v5e
topology: v5e:2x2
jax: 0.10.0
libtpu: 0.0.40
codegen_flags: <defaults>
</compile_context>

<pallas_src>
import functools
import math

import numpy as np
import jax
import jax.numpy as jnp
from jax import lax
from jax.experimental import pallas as pl
from jax.experimental.pallas import tpu as pltpu


# --------------------------------------------------------------------------
# One encoder layer on a flattened (Bt*n, d) activation (shared by both paths)
# --------------------------------------------------------------------------
def _encoder_layer(x, mask_add, nhead, Bt, n, d,
                   wqkv, bqkv, wo, bo, w1, b1, w2, b2):
    f32 = jnp.float32
    bf16 = jnp.bfloat16
    hd = d // nhead

    xb = x.astype(bf16)

    # ---- fused QKV projection: one (Bt*n, d) @ (d, 3d) MXU matmul ----------
    qkv = jnp.dot(xb, wqkv, preferred_element_type=f32) + bqkv      # (Bt*n, 3d)
    qkv3 = qkv.reshape(Bt, n, 3 * d)

    # ---- head-batched attention: heads folded into the matmul batch dim ----
    # Head slices are lane-aligned when hd is a multiple of 128; stacking along
    # the leading axis is a cheap copy and gives ONE batched dot over nhead*Bt.
    def heads(base):
        parts = [qkv3[:, :, base + h * hd: base + (h + 1) * hd]
                 for h in range(nhead)]
        return jnp.concatenate(parts, axis=0).astype(bf16)          # (nhead*Bt, n, hd)

    qh = heads(0)          # 1/sqrt(hd) scale already folded into Wq / bq
    kh = heads(d)
    vh = heads(2 * d)

    s = jnp.einsum("bqe,bke->bqk", qh, kh,
                   preferred_element_type=f32)                      # (nhead*Bt, n, n)
    s = s + mask_add[None, :, :]
    mx = jnp.max(s, axis=-1, keepdims=True)
    p = jnp.exp(s - mx)
    denom = jnp.sum(p, axis=-1, keepdims=True)
    p = p * pl.reciprocal(denom, approx=True)                       # EUP divide

    ctx = jnp.einsum("bqk,bke->bqe", p.astype(bf16), vh,
                     preferred_element_type=f32)                    # (nhead*Bt, n, hd)
    # un-stack heads (head-major leading axis) -> lane concat in PyTorch order
    ctx = jnp.concatenate([ctx[h * Bt:(h + 1) * Bt] for h in range(nhead)],
                          axis=-1).reshape(Bt * n, d)

    attn = jnp.dot(ctx.astype(bf16), wo, preferred_element_type=f32) + bo
    x1 = x + attn                                                   # residual 1

    # ---- feed-forward + residual 2 ------------------------------------------
    # TODO(synk): tile over dff (inner loop + f32 accumulator) once dff > ~2K
    # so intermediates stay inside the scoped VMEM limit (v7x: 64 MiB physical).
    hmid = jnp.dot(x1.astype(bf16), w1, preferred_element_type=f32) + b1
    hmid = jnp.maximum(hmid, 0.0)
    ff = jnp.dot(hmid.astype(bf16), w2, preferred_element_type=f32) + b2
    return x1 + ff


# --------------------------------------------------------------------------
# Path A: layer-resident kernel. grid = (batch_blocks,); the whole stack of
# weights lives in VMEM and the layer loop runs inside the kernel.
# --------------------------------------------------------------------------
def _resident_encoder_kernel(nhead,
                             x_ref, mask_ref, wqkv_ref, bqkv_ref,
                             wo_ref, bo2_ref, w1_ref, b1_ref, w2_ref,
                             o_ref):
    Bt, n, d = x_ref.shape
    L = wqkv_ref.shape[0]
    mask_add = mask_ref[...]
    x0 = x_ref[...].reshape(Bt * n, d)

    def body(l, x):
        bo2 = bo2_ref[l]                                  # (2, d): [bo; b2]
        return _encoder_layer(
            x, mask_add, nhead, Bt, n, d,
            wqkv_ref[l], bqkv_ref[l], wo_ref[l], bo2[0:1, :],
            w1_ref[l], b1_ref[l], w2_ref[l], bo2[1:2, :])

    x = lax.fori_loop(0, L, body, x0, unroll=(L <= 8))
    o_ref[...] = x.reshape(Bt, n, d)


# --------------------------------------------------------------------------
# Path B (fallback for large weight stacks): grid = (batch_blocks, L); the
# output block is the resident activation accumulator across the layer axis
# and per-layer weight blocks are pipelined from HBM.
# --------------------------------------------------------------------------
def _pipelined_encoder_kernel(nhead,
                              x_ref, mask_ref, wqkv_ref, bqkv_ref,
                              wo_ref, bo2_ref, w1_ref, b1_ref, w2_ref,
                              o_ref):
    l = pl.program_id(1)
    Bt, n, d = x_ref.shape

    @pl.when(l == 0)
    def _():
        o_ref[...] = x_ref[...]

    x = o_ref[...].reshape(Bt * n, d)
    bo2 = bo2_ref[0]
    out = _encoder_layer(
        x, mask_ref[...], nhead, Bt, n, d,
        wqkv_ref[0], bqkv_ref[0], wo_ref[0], bo2[0:1, :],
        w1_ref[0], b1_ref[0], w2_ref[0], bo2[1:2, :])
    o_ref[...] = out.reshape(Bt, n, d)


# --------------------------------------------------------------------------
# Parameter prep (one-time): fuse QKV, fold the attention scale, pack biases,
# cast weights to bf16.
# --------------------------------------------------------------------------
def prepare_kernel_params(params, nhead):
    f32 = jnp.float32
    bf16 = jnp.bfloat16
    d = params["wq"].shape[1]
    hd = d // nhead
    scale = 1.0 / math.sqrt(hd)
    wqkv = jnp.concatenate([params["wq"] * scale, params["wk"], params["wv"]],
                           axis=-1)                                  # (L, d, 3d)
    bqkv = jnp.concatenate([params["bq"] * scale, params["bk"], params["bv"]],
                           axis=-1)                                  # (L, 1, 3d)
    bo2 = jnp.concatenate([params["bo"], params["b2"]], axis=1)      # (L, 2, d)
    return dict(
        wqkv=wqkv.astype(bf16), bqkv=bqkv.astype(f32),
        wo=params["wo"].astype(bf16), bo2=bo2.astype(f32),
        w1=params["w1"].astype(bf16), b1=params["b1"].astype(f32),
        w2=params["w2"].astype(bf16),
    )


def _vmem_limit_bytes(Bt, n, d, dff, nhead, L, layer_w_bytes, resident):
    """Explicit scoped-VMEM budget: activation blocks + double-buffered weight
    blocks + f32 intermediates, with 2x headroom, clamped to [32 MiB, 64 MiB]
    (64 MiB = v7x physical VMEM; v5e/v6e have 128 MiB physical)."""
    M = Bt * n
    lane = 128
    n_pad = ((n + lane - 1) // lane) * lane
    hd_pad = max((((d // nhead) + lane - 1) // lane) * lane, lane)
    io = 2 * 2 * M * d * 4                                  # x in + resident out
    mask = 2 * max(n, 8) * n_pad * 4
    weights = 2 * (L if resident else 1) * layer_w_bytes    # double-buffered
    inter = (M * 3 * d * 4                                  # fused qkv (f32)
             + 3 * nhead * Bt * n * hd_pad * 2              # head-batched q/k/v
             + 2 * nhead * Bt * n * n_pad * 4               # scores + probs
             + 3 * M * d * 4                                # ctx / attn / resid
             + 2 * M * dff * 4)                             # FFN hidden
    est = io + mask + weights + inter
    return int(min(max(2 * est, 32 << 20), 64 << 20))


# --------------------------------------------------------------------------
# Wrapper: one pallas_call for the whole encoder stack.
# --------------------------------------------------------------------------
def looped_transformer_forward(src, kparams, src_mask_bool, nhead,
                               block_batch=None, force_pipelined=False):
    B, n, d = src.shape
    L, _, dff = kparams["w1"].shape
    assert d % nhead == 0

    # Keep the whole batch in one block (Bt = B): splitting the batch halves
    # the (already small) matmul M and re-streams every layer's weights per
    # batch block, which is a net loss in a weight-DMA-bound regime.
    Bt = B if block_batch is None else block_batch
    assert B % Bt == 0

    f32 = jnp.float32

    # Large finite negative instead of -inf: a fully-masked row can never NaN.
    mask_add = jnp.where(src_mask_bool, -1e30, 0.0).astype(f32)

    # bf16 weights + f32 biases per layer.
    layer_w_bytes = (2 * (d * 3 * d + d * d + d * dff + dff * d)
                     + 4 * (3 * d + 2 * d + dff))
    resident = (not force_pipelined) and (2 * L * layer_w_bytes < (24 << 20))
    vmem_limit = _vmem_limit_bytes(Bt, n, d, dff, nhead, L,
                                   layer_w_bytes, resident)

    args = (src.astype(f32), mask_add,
            kparams["wqkv"], kparams["bqkv"],
            kparams["wo"], kparams["bo2"],
            kparams["w1"], kparams["b1"], kparams["w2"])

    if resident:
        grid = (B // Bt,)

        def wspec(shape):
            return pl.BlockSpec((L,) + shape, lambda b: (0, 0, 0))

        in_specs = [
            pl.BlockSpec((Bt, n, d), lambda b: (b, 0, 0)),   # x
            pl.BlockSpec((n, n), lambda b: (0, 0)),          # additive mask
            wspec((d, 3 * d)), wspec((1, 3 * d)),            # Wqkv, bqkv
            wspec((d, d)), wspec((2, d)),                     # Wo, [bo; b2]
            wspec((d, dff)), wspec((1, dff)),                 # W1, b1
            wspec((dff, d)),                                  # W2
        ]
        out_specs = pl.BlockSpec((Bt, n, d), lambda b: (b, 0, 0))
        kernel = functools.partial(_resident_encoder_kernel, nhead)
        dims = ("parallel",)
    else:
        grid = (B // Bt, L)

        def wspec(shape):
            return pl.BlockSpec((1,) + shape, lambda b, l: (l, 0, 0))

        in_specs = [
            pl.BlockSpec((Bt, n, d), lambda b, l: (b, 0, 0)),
            pl.BlockSpec((n, n), lambda b, l: (0, 0)),
            wspec((d, 3 * d)), wspec((1, 3 * d)),
            wspec((d, d)), wspec((2, d)),
            wspec((d, dff)), wspec((1, dff)),
            wspec((dff, d)),
        ]
        out_specs = pl.BlockSpec((Bt, n, d), lambda b, l: (b, 0, 0))
        kernel = functools.partial(_pipelined_encoder_kernel, nhead)
        dims = ("parallel", "arbitrary")

    return pl.pallas_call(
        kernel,
        out_shape=jax.ShapeDtypeStruct((B, n, d), f32),
        grid=grid,
        in_specs=in_specs,
        out_specs=out_specs,
        compiler_params=pltpu.CompilerParams(
            dimension_semantics=dims,
            vmem_limit_bytes=vmem_limit),
    )(*args)


# --------------------------------------------------------------------------
# Model glue
# --------------------------------------------------------------------------
def build_src_mask(n, s, m):
    """PyTorch bool-mask semantics: True == NOT allowed to attend."""
    mask = np.ones((n, n), dtype=bool)
    mask[s:s + m, s + m:n] = False
    mask[s:s + m, 0] = False
    mask[s + m:n, 0] = False
    mask[0:s, :] = False
    return jnp.asarray(mask)


def init_stacked_params(key, num_layers, d_model, dim_feedforward):
    ks = jax.random.split(key, 12)
    L = num_layers
    nrm = lambda k, shape: 0.02 * jax.random.normal(k, shape, jnp.float32)
    return dict(
        wq=nrm(ks[0], (L, d_model, d_model)), bq=nrm(ks[1], (L, 1, d_model)),
        wk=nrm(ks[2], (L, d_model, d_model)), bk=nrm(ks[3], (L, 1, d_model)),
        wv=nrm(ks[4], (L, d_model, d_model)), bv=nrm(ks[5], (L, 1, d_model)),
        wo=nrm(ks[6], (L, d_model, d_model)), bo=nrm(ks[7], (L, 1, d_model)),
        w1=nrm(ks[8], (L, d_model, dim_feedforward)),
        b1=nrm(ks[9], (L, 1, dim_feedforward)),
        w2=nrm(ks[10], (L, dim_feedforward, d_model)),
        b2=nrm(ks[11], (L, 1, d_model)),
    )


# --------------------------------------------------------------------------
# Pure-JAX f32 reference (numerical sanity check)
# --------------------------------------------------------------------------
def reference_forward(src, params, src_mask_bool, nhead):
    mask_add = jnp.where(src_mask_bool, -1e30, 0.0).astype(jnp.float32)
    x = src
    L = params["wq"].shape[0]
    B, n, d = x.shape
    hd = d // nhead
    for i in range(L):
        q = x @ params["wq"][i] + params["bq"][i]
        k = x @ params["wk"][i] + params["bk"][i]
        v = x @ params["wv"][i] + params["bv"][i]
        qh = q.reshape(B, n, nhead, hd).transpose(0, 2, 1, 3)
        kh = k.reshape(B, n, nhead, hd).transpose(0, 2, 1, 3)
        vh = v.reshape(B, n, nhead, hd).transpose(0, 2, 1, 3)
        s = jnp.einsum("bhqe,bhke->bhqk", qh, kh) / jnp.sqrt(float(hd))
        s = s + mask_add[None, None]
        a = jax.nn.softmax(s, axis=-1)
        ctx = jnp.einsum("bhqk,bhke->bhqe", a, vh)
        ctx = ctx.transpose(0, 2, 1, 3).reshape(B, n, d)
        x = x + (ctx @ params["wo"][i] + params["bo"][i])
        hmid = jax.nn.relu(x @ params["w1"][i] + params["b1"][i])
        x = x + (hmid @ params["w2"][i] + params["b2"][i])
    return x


# --------------------------------------------------------------------------
if __name__ == "__main__":
    # Small SubleqSim-like config: seq length n with s / m mask bands;
    # d_model chosen so head_dim = d_model / nhead = 128 (lane aligned).
    batch = 2
    n, s, m = 8, 2, 3
    nhead = 2
    d_model = 256
    dim_feedforward = 256
    num_encoder_layers = 2
    # TODO(synk): dropout layers are identity in eval mode; no stochastic dropout.

    key = jax.random.PRNGKey(0)
    k_src, k_par = jax.random.split(key)
    src = jax.random.normal(k_src, (batch, n, d_model), jnp.float32)
    params = init_stacked_params(k_par, num_encoder_layers, d_model,
                                 dim_feedforward)
    kparams = prepare_kernel_params(params, nhead)
    src_mask = build_src_mask(n, s, m)

    ref = jax.block_until_ready(reference_forward(src, params, src_mask, nhead))

    # Default path: layer loop resident in the kernel, weights live in VMEM.
    out = jax.block_until_ready(
        looped_transformer_forward(src, kparams, src_mask, nhead))
    assert out.shape == (batch, n, d_model)
    err = float(np.max(np.abs(np.asarray(out) - np.asarray(ref))))
    # bf16 MXU matmuls + approx reciprocal vs f32 reference -> slightly looser tol
    assert np.allclose(np.asarray(out), np.asarray(ref), atol=1e-2, rtol=2e-2), (
        "resident path mismatch vs reference; max abs diff = %g" % err)

    # Fallback path: per-layer weight blocks pipelined by a layer grid axis.
    out_p = jax.block_until_ready(
        looped_transformer_forward(src, kparams, src_mask, nhead,
                                   force_pipelined=True))
    err_p = float(np.max(np.abs(np.asarray(out_p) - np.asarray(ref))))
    assert np.allclose(np.asarray(out_p), np.asarray(ref), atol=1e-2, rtol=2e-2), (
        "pipelined path mismatch vs reference; max abs diff = %g" % err_p)

    print("KERNEL_OK")
</pallas_src>

<mosaic_0001>
module attributes {stable_mosaic.version = 11 : i64} {
  func.func @_resident_encoder_kernel(%arg0: i32, %arg1: memref<2x8x256xf32, #tpu.memory_space<vmem>>, %arg2: memref<8x8xf32, #tpu.memory_space<vmem>>, %arg3: memref<2x256x768xbf16, #tpu.memory_space<vmem>>, %arg4: memref<2x1x768xf32, #tpu.memory_space<vmem>>, %arg5: memref<2x256x256xbf16, #tpu.memory_space<vmem>>, %arg6: memref<2x2x256xf32, #tpu.memory_space<vmem>>, %arg7: memref<2x256x256xbf16, #tpu.memory_space<vmem>>, %arg8: memref<2x1x256xf32, #tpu.memory_space<vmem>>, %arg9: memref<2x256x256xbf16, #tpu.memory_space<vmem>>, %arg10: memref<2x8x256xf32, #tpu.memory_space<vmem>>) attributes {dimension_semantics = [#tpu.dimension_semantics<parallel>], iteration_bounds = array<i64: 1>, scalar_prefetch = 0 : i64, scratch_operands = 0 : i64, tpu.core_type = #tpu.core_type<tc>, window_params = [{transform_indices = @transform_0, window_bounds = array<i64: 2, 8, 256>}, {pipeline_mode = #tpu.pipeline_mode<synchronous>, transform_indices = @transform_1, window_bounds = array<i64: 8, 8>}, {pipeline_mode = #tpu.pipeline_mode<synchronous>, transform_indices = @transform_2, window_bounds = array<i64: 2, 256, 768>}, {pipeline_mode = #tpu.pipeline_mode<synchronous>, transform_indices = @transform_3, window_bounds = array<i64: 2, 1, 768>}, {pipeline_mode = #tpu.pipeline_mode<synchronous>, transform_indices = @transform_4, window_bounds = array<i64: 2, 256, 256>}, {pipeline_mode = #tpu.pipeline_mode<synchronous>, transform_indices = @transform_5, window_bounds = array<i64: 2, 2, 256>}, {pipeline_mode = #tpu.pipeline_mode<synchronous>, transform_indices = @transform_6, window_bounds = array<i64: 2, 256, 256>}, {pipeline_mode = #tpu.pipeline_mode<synchronous>, transform_indices = @transform_7, window_bounds = array<i64: 2, 1, 256>}, {pipeline_mode = #tpu.pipeline_mode<synchronous>, transform_indices = @transform_8, window_bounds = array<i64: 2, 256, 256>}, {transform_indices = @transform_9, window_bounds = array<i64: 2, 8, 256>}]} {
    %c0 = arith.constant 0 : index
    %c0_0 = arith.constant 0 : index
    %0 = vector.load %arg2[%c0, %c0_0] : memref<8x8xf32, #tpu.memory_space<vmem>>, vector<8x8xf32>
    %c0_1 = arith.constant 0 : index
    %c0_2 = arith.constant 0 : index
    %c0_3 = arith.constant 0 : index
    %1 = vector.load %arg1[%c0_1, %c0_2, %c0_3] : memref<2x8x256xf32, #tpu.memory_space<vmem>>, vector<2x8x256xf32>
    %2 = vector.shape_cast %1 : vector<2x8x256xf32> to vector<16x256xf32>
    %c0_i32 = arith.constant 0 : i32
    %3 = arith.index_cast %c0_i32 : i32 to index
    %c0_4 = arith.constant 0 : index
    %c0_5 = arith.constant 0 : index
    %4 = vector.load %arg6[%3, %c0_4, %c0_5] : memref<2x2x256xf32, #tpu.memory_space<vmem>>, vector<1x2x256xf32>
    %5 = vector.shape_cast %4 : vector<1x2x256xf32> to vector<2x256xf32>
    %6 = arith.index_cast %c0_i32 : i32 to index
    %c0_6 = arith.constant 0 : index
    %c0_7 = arith.constant 0 : index
    %7 = vector.load %arg3[%6, %c0_6, %c0_7] : memref<2x256x768xbf16, #tpu.memory_space<vmem>>, vector<1x256x768xbf16>
    %8 = vector.shape_cast %7 : vector<1x256x768xbf16> to vector<256x768xbf16>
    %9 = arith.index_cast %c0_i32 : i32 to index
    %c0_8 = arith.constant 0 : index
    %c0_9 = arith.constant 0 : index
    %10 = vector.load %arg4[%9, %c0_8, %c0_9] : memref<2x1x768xf32, #tpu.memory_space<vmem>>, vector<1x1x768xf32>
    %11 = vector.shape_cast %10 : vector<1x1x768xf32> to vector<1x768xf32>
    %12 = arith.index_cast %c0_i32 : i32 to index
    %c0_10 = arith.constant 0 : index
    %c0_11 = arith.constant 0 : index
    %13 = vector.load %arg5[%12, %c0_10, %c0_11] : memref<2x256x256xbf16, #tpu.memory_space<vmem>>, vector<1x256x256xbf16>
    %14 = vector.shape_cast %13 : vector<1x256x256xbf16> to vector<256x256xbf16>
    %15 = vector.extract_strided_slice %5 {offsets = [0, 0], sizes = [1, 256], strides = [1, 1]} : vector<2x256xf32> to vector<1x256xf32>
    %16 = arith.index_cast %c0_i32 : i32 to index
    %c0_12 = arith.constant 0 : index
    %c0_13 = arith.constant 0 : index
    %17 = vector.load %arg7[%16, %c0_12, %c0_13] : memref<2x256x256xbf16, #tpu.memory_space<vmem>>, vector<1x256x256xbf16>
    %18 = vector.shape_cast %17 : vector<1x256x256xbf16> to vector<256x256xbf16>
    %19 = arith.index_cast %c0_i32 : i32 to index
    %c0_14 = arith.constant 0 : index
    %c0_15 = arith.constant 0 : index
    %20 = vector.load %arg8[%19, %c0_14, %c0_15] : memref<2x1x256xf32, #tpu.memory_space<vmem>>, vector<1x1x256xf32>
    %21 = vector.shape_cast %20 : vector<1x1x256xf32> to vector<1x256xf32>
    %22 = arith.index_cast %c0_i32 : i32 to index
    %c0_16 = arith.constant 0 : index
    %c0_17 = arith.constant 0 : index
    %23 = vector.load %arg9[%22, %c0_16, %c0_17] : memref<2x256x256xbf16, #tpu.memory_space<vmem>>, vector<1x256x256xbf16>
    %24 = vector.shape_cast %23 : vector<1x256x256xbf16> to vector<256x256xbf16>
    %25 = vector.extract_strided_slice %5 {offsets = [1, 0], sizes = [1, 256], strides = [1, 1]} : vector<2x256xf32> to vector<1x256xf32>
    %26 = arith.truncf %2 : vector<16x256xf32> to vector<16x256xbf16>
    %cst = arith.constant dense<0.000000e+00> : vector<16x768xf32>
    %27 = tpu.matmul %26, %8, %cst {dimension_numbers = #tpu.dot_dimension_numbers<[1], [0], [0], [1], [0, 0, 1, 1], [], []>} : vector<16x256xbf16>, vector<256x768xbf16>, vector<16x768xf32> -> vector<16x768xf32>
    %28 = vector.broadcast %11 : vector<1x768xf32> to vector<16x768xf32>
    %29 = arith.addf %27, %28 : vector<16x768xf32>
    %30 = vector.shape_cast %29 : vector<16x768xf32> to vector<2x8x768xf32>
    %31 = vector.extract_strided_slice %30 {offsets = [0, 0, 0], sizes = [2, 8, 128], strides = [1, 1, 1]} : vector<2x8x768xf32> to vector<2x8x128xf32>
    %32 = vector.extract_strided_slice %30 {offsets = [0, 0, 128], sizes = [2, 8, 128], strides = [1, 1, 1]} : vector<2x8x768xf32> to vector<2x8x128xf32>
    %33 = tpu.concatenate %31, %32 in 0 : vector<2x8x128xf32>, vector<2x8x128xf32> -> vector<4x8x128xf32>
    %34 = arith.truncf %33 : vector<4x8x128xf32> to vector<4x8x128xbf16>
    %35 = vector.extract_strided_slice %30 {offsets = [0, 0, 256], sizes = [2, 8, 128], strides = [1, 1, 1]} : vector<2x8x768xf32> to vector<2x8x128xf32>
    %36 = vector.extract_strided_slice %30 {offsets = [0, 0, 384], sizes = [2, 8, 128], strides = [1, 1, 1]} : vector<2x8x768xf32> to vector<2x8x128xf32>
    %37 = tpu.concatenate %35, %36 in 0 : vector<2x8x128xf32>, vector<2x8x128xf32> -> vector<4x8x128xf32>
    %38 = arith.truncf %37 : vector<4x8x128xf32> to vector<4x8x128xbf16>
    %39 = vector.extract_strided_slice %30 {offsets = [0, 0, 512], sizes = [2, 8, 128], strides = [1, 1, 1]} : vector<2x8x768xf32> to vector<2x8x128xf32>
    %40 = vector.extract_strided_slice %30 {offsets = [0, 0, 640], sizes = [2, 8, 128], strides = [1, 1, 1]} : vector<2x8x768xf32> to vector<2x8x128xf32>
    %41 = tpu.concatenate %39, %40 in 0 : vector<2x8x128xf32>, vector<2x8x128xf32> -> vector<4x8x128xf32>
    %42 = arith.truncf %41 : vector<4x8x128xf32> to vector<4x8x128xbf16>
    "tpu.trace_start"() <{level = 10 : i32, message = "bqe,bke->bqk"}> : () -> ()
    %cst_18 = arith.constant dense<0.000000e+00> : vector<4x8x8xf32>
    %43 = tpu.matmul %34, %38, %cst_18 {dimension_numbers = #tpu.dot_dimension_numbers<[2], [2], [1], [1], [0, 0, 0, 1, 1, 1], [0], [0]>} : vector<4x8x128xbf16>, vector<4x8x128xbf16>, vector<4x8x8xf32> -> vector<4x8x8xf32>
    "tpu.trace_stop"() : () -> ()
    %44 = vector.shape_cast %0 : vector<8x8xf32> to vector<1x8x8xf32>
    %45 = vector.broadcast %44 : vector<1x8x8xf32> to vector<4x8x8xf32>
    %46 = arith.addf %43, %45 : vector<4x8x8xf32>
    %cst_19 = arith.constant dense<0xFF800000> : vector<4x8xf32>
    %47 = vector.multi_reduction <maximumf>, %46, %cst_19 [2] : vector<4x8x8xf32> to vector<4x8xf32>
    %48 = vector.shape_cast %47 : vector<4x8xf32> to vector<4x8x1xf32>
    %49 = vector.broadcast %48 : vector<4x8x1xf32> to vector<4x8x8xf32>
    %50 = arith.subf %46, %49 : vector<4x8x8xf32>
    %51 = math.exp %50 : vector<4x8x8xf32>
    %cst_20 = arith.constant dense<0.000000e+00> : vector<4x8xf32>
    %52 = vector.multi_reduction <add>, %51, %cst_20 [2] : vector<4x8x8xf32> to vector<4x8xf32>
    %53 = vector.shape_cast %52 : vector<4x8xf32> to vector<4x8x1xf32>
    %54 = tpu.reciprocal %53 {approx = true} : vector<4x8x1xf32> -> vector<4x8x1xf32>
    %55 = vector.broadcast %54 : vector<4x8x1xf32> to vector<4x8x8xf32>
    %56 = arith.mulf %51, %55 : vector<4x8x8xf32>
    %57 = arith.truncf %56 : vector<4x8x8xf32> to vector<4x8x8xbf16>
    "tpu.trace_start"() <{level = 10 : i32, message = "bqk,bke->bqe"}> : () -> ()
    %cst_21 = arith.constant dense<0.000000e+00> : vector<4x8x128xf32>
    %58 = tpu.matmul %57, %42, %cst_21 {dimension_numbers = #tpu.dot_dimension_numbers<[2], [1], [1], [2], [0, 0, 0, 1, 1, 2], [0], [0]>} : vector<4x8x8xbf16>, vector<4x8x128xbf16>, vector<4x8x128xf32> -> vector<4x8x128xf32>
    "tpu.trace_stop"() : () -> ()
    %59 = vector.extract_strided_slice %58 {offsets = [0, 0, 0], sizes = [2, 8, 128], strides = [1, 1, 1]} : vector<4x8x128xf32> to vector<2x8x128xf32>
    %60 = vector.extract_strided_slice %58 {offsets = [2, 0, 0], sizes = [2, 8, 128], strides = [1, 1, 1]} : vector<4x8x128xf32> to vector<2x8x128xf32>
    %61 = tpu.concatenate %59, %60 in 2 : vector<2x8x128xf32>, vector<2x8x128xf32> -> vector<2x8x256xf32>
    %62 = vector.shape_cast %61 : vector<2x8x256xf32> to vector<16x256xf32>
    %63 = arith.truncf %62 : vector<16x256xf32> to vector<16x256xbf16>
    %cst_22 = arith.constant dense<0.000000e+00> : vector<16x256xf32>
    %64 = tpu.matmul %63, %14, %cst_22 {dimension_numbers = #tpu.dot_dimension_numbers<[1], [0], [0], [1], [0, 0, 1, 1], [], []>} : vector<16x256xbf16>, vector<256x256xbf16>, vector<16x256xf32> -> vector<16x256xf32>
    %65 = vector.broadcast %15 : vector<1x256xf32> to vector<16x256xf32>
    %66 = arith.addf %64, %65 : vector<16x256xf32>
    %67 = arith.addf %2, %66 : vector<16x256xf32>
    %68 = arith.truncf %67 : vector<16x256xf32> to vector<16x256xbf16>
    %cst_23 = arith.constant dense<0.000000e+00> : vector<16x256xf32>
    %69 = tpu.matmul %68, %18, %cst_23 {dimension_numbers = #tpu.dot_dimension_numbers<[1], [0], [0], [1], [0, 0, 1, 1], [], []>} : vector<16x256xbf16>, vector<256x256xbf16>, vector<16x256xf32> -> vector<16x256xf32>
    %70 = vector.broadcast %21 : vector<1x256xf32> to vector<16x256xf32>
    %71 = arith.addf %69, %70 : vector<16x256xf32>
    %cst_24 = arith.constant 0.000000e+00 : f32
    %72 = vector.broadcast %cst_24 : f32 to vector<16x256xf32>
    %73 = arith.maximumf %71, %72 : vector<16x256xf32>
    %74 = arith.truncf %73 : vector<16x256xf32> to vector<16x256xbf16>
    %cst_25 = arith.constant dense<0.000000e+00> : vector<16x256xf32>
    %75 = tpu.matmul %74, %24, %cst_25 {dimension_numbers = #tpu.dot_dimension_numbers<[1], [0], [0], [1], [0, 0, 1, 1], [], []>} : vector<16x256xbf16>, vector<256x256xbf16>, vector<16x256xf32> -> vector<16x256xf32>
    %76 = vector.broadcast %25 : vector<1x256xf32> to vector<16x256xf32>
    %77 = arith.addf %75, %76 : vector<16x256xf32>
    %78 = arith.addf %67, %77 : vector<16x256xf32>
    %c1_i32 = arith.constant 1 : i32
    %79 = arith.index_cast %c1_i32 : i32 to index
    %c0_26 = arith.constant 0 : index
    %c0_27 = arith.constant 0 : index
    %80 = vector.load %arg6[%79, %c0_26, %c0_27] : memref<2x2x256xf32, #tpu.memory_space<vmem>>, vector<1x2x256xf32>
    %81 = vector.shape_cast %80 : vector<1x2x256xf32> to vector<2x256xf32>
    %82 = arith.index_cast %c1_i32 : i32 to index
    %c0_28 = arith.constant 0 : index
    %c0_29 = arith.constant 0 : index
    %83 = vector.load %arg3[%82, %c0_28, %c0_29] : memref<2x256x768xbf16, #tpu.memory_space<vmem>>, vector<1x256x768xbf16>
    %84 = vector.shape_cast %83 : vector<1x256x768xbf16> to vector<256x768xbf16>
    %85 = arith.index_cast %c1_i32 : i32 to index
    %c0_30 = arith.constant 0 : index
    %c0_31 = arith.constant 0 : index
    %86 = vector.load %arg4[%85, %c0_30, %c0_31] : memref<2x1x768xf32, #tpu.memory_space<vmem>>, vector<1x1x768xf32>
    %87 = vector.shape_cast %86 : vector<1x1x768xf32> to vector<1x768xf32>
    %88 = arith.index_cast %c1_i32 : i32 to index
    %c0_32 = arith.constant 0 : index
    %c0_33 = arith.constant 0 : index
    %89 = vector.load %arg5[%88, %c0_32, %c0_33] : memref<2x256x256xbf16, #tpu.memory_space<vmem>>, vector<1x256x256xbf16>
    %90 = vector.shape_cast %89 : vector<1x256x256xbf16> to vector<256x256xbf16>
    %91 = vector.extract_strided_slice %81 {offsets = [0, 0], sizes = [1, 256], strides = [1, 1]} : vector<2x256xf32> to vector<1x256xf32>
    %92 = arith.index_cast %c1_i32 : i32 to index
    %c0_34 = arith.constant 0 : index
    %c0_35 = arith.constant 0 : index
    %93 = vector.load %arg7[%92, %c0_34, %c0_35] : memref<2x256x256xbf16, #tpu.memory_space<vmem>>, vector<1x256x256xbf16>
    %94 = vector.shape_cast %93 : vector<1x256x256xbf16> to vector<256x256xbf16>
    %95 = arith.index_cast %c1_i32 : i32 to index
    %c0_36 = arith.constant 0 : index
    %c0_37 = arith.constant 0 : index
    %96 = vector.load %arg8[%95, %c0_36, %c0_37] : memref<2x1x256xf32, #tpu.memory_space<vmem>>, vector<1x1x256xf32>
    %97 = vector.shape_cast %96 : vector<1x1x256xf32> to vector<1x256xf32>
    %98 = arith.index_cast %c1_i32 : i32 to index
    %c0_38 = arith.constant 0 : index
    %c0_39 = arith.constant 0 : index
    %99 = vector.load %arg9[%98, %c0_38, %c0_39] : memref<2x256x256xbf16, #tpu.memory_space<vmem>>, vector<1x256x256xbf16>
    %100 = vector.shape_cast %99 : vector<1x256x256xbf16> to vector<256x256xbf16>
    %101 = vector.extract_strided_slice %81 {offsets = [1, 0], sizes = [1, 256], strides = [1, 1]} : vector<2x256xf32> to vector<1x256xf32>
    %102 = arith.truncf %78 : vector<16x256xf32> to vector<16x256xbf16>
    %cst_40 = arith.constant dense<0.000000e+00> : vector<16x768xf32>
    %103 = tpu.matmul %102, %84, %cst_40 {dimension_numbers = #tpu.dot_dimension_numbers<[1], [0], [0], [1], [0, 0, 1, 1], [], []>} : vector<16x256xbf16>, vector<256x768xbf16>, vector<16x768xf32> -> vector<16x768xf32>
    %104 = vector.broadcast %87 : vector<1x768xf32> to vector<16x768xf32>
    %105 = arith.addf %103, %104 : vector<16x768xf32>
    %106 = vector.shape_cast %105 : vector<16x768xf32> to vector<2x8x768xf32>
    %107 = vector.extract_strided_slice %106 {offsets = [0, 0, 0], sizes = [2, 8, 128], strides = [1, 1, 1]} : vector<2x8x768xf32> to vector<2x8x128xf32>
    %108 = vector.extract_strided_slice %106 {offsets = [0, 0, 128], sizes = [2, 8, 128], strides = [1, 1, 1]} : vector<2x8x768xf32> to vector<2x8x128xf32>
    %109 = tpu.concatenate %107, %108 in 0 : vector<2x8x128xf32>, vector<2x8x128xf32> -> vector<4x8x128xf32>
    %110 = arith.truncf %109 : vector<4x8x128xf32> to vector<4x8x128xbf16>
    %111 = vector.extract_strided_slice %106 {offsets = [0, 0, 256], sizes = [2, 8, 128], strides = [1, 1, 1]} : vector<2x8x768xf32> to vector<2x8x128xf32>
    %112 = vector.extract_strided_slice %106 {offsets = [0, 0, 384], sizes = [2, 8, 128], strides = [1, 1, 1]} : vector<2x8x768xf32> to vector<2x8x128xf32>
    %113 = tpu.concatenate %111, %112 in 0 : vector<2x8x128xf32>, vector<2x8x128xf32> -> vector<4x8x128xf32>
    %114 = arith.truncf %113 : vector<4x8x128xf32> to vector<4x8x128xbf16>
    %115 = vector.extract_strided_slice %106 {offsets = [0, 0, 512], sizes = [2, 8, 128], strides = [1, 1, 1]} : vector<2x8x768xf32> to vector<2x8x128xf32>
    %116 = vector.extract_strided_slice %106 {offsets = [0, 0, 640], sizes = [2, 8, 128], strides = [1, 1, 1]} : vector<2x8x768xf32> to vector<2x8x128xf32>
    %117 = tpu.concatenate %115, %116 in 0 : vector<2x8x128xf32>, vector<2x8x128xf32> -> vector<4x8x128xf32>
    %118 = arith.truncf %117 : vector<4x8x128xf32> to vector<4x8x128xbf16>
    "tpu.trace_start"() <{level = 10 : i32, message = "bqe,bke->bqk"}> : () -> ()
    %cst_41 = arith.constant dense<0.000000e+00> : vector<4x8x8xf32>
    %119 = tpu.matmul %110, %114, %cst_41 {dimension_numbers = #tpu.dot_dimension_numbers<[2], [2], [1], [1], [0, 0, 0, 1, 1, 1], [0], [0]>} : vector<4x8x128xbf16>, vector<4x8x128xbf16>, vector<4x8x8xf32> -> vector<4x8x8xf32>
    "tpu.trace_stop"() : () -> ()
    %120 = vector.shape_cast %0 : vector<8x8xf32> to vector<1x8x8xf32>
    %121 = vector.broadcast %120 : vector<1x8x8xf32> to vector<4x8x8xf32>
    %122 = arith.addf %119, %121 : vector<4x8x8xf32>
    %cst_42 = arith.constant dense<0xFF800000> : vector<4x8xf32>
    %123 = vector.multi_reduction <maximumf>, %122, %cst_42 [2] : vector<4x8x8xf32> to vector<4x8xf32>
    %124 = vector.shape_cast %123 : vector<4x8xf32> to vector<4x8x1xf32>
    %125 = vector.broadcast %124 : vector<4x8x1xf32> to vector<4x8x8xf32>
    %126 = arith.subf %122, %125 : vector<4x8x8xf32>
    %127 = math.exp %126 : vector<4x8x8xf32>
    %cst_43 = arith.constant dense<0.000000e+00> : vector<4x8xf32>
    %128 = vector.multi_reduction <add>, %127, %cst_43 [2] : vector<4x8x8xf32> to vector<4x8xf32>
    %129 = vector.shape_cast %128 : vector<4x8xf32> to vector<4x8x1xf32>
    %130 = tpu.reciprocal %129 {approx = true} : vector<4x8x1xf32> -> vector<4x8x1xf32>
    %131 = vector.broadcast %130 : vector<4x8x1xf32> to vector<4x8x8xf32>
    %132 = arith.mulf %127, %131 : vector<4x8x8xf32>
    %133 = arith.truncf %132 : vector<4x8x8xf32> to vector<4x8x8xbf16>
    "tpu.trace_start"() <{level = 10 : i32, message = "bqk,bke->bqe"}> : () -> ()
    %cst_44 = arith.constant dense<0.000000e+00> : vector<4x8x128xf32>
    %134 = tpu.matmul %133, %118, %cst_44 {dimension_numbers = #tpu.dot_dimension_numbers<[2], [1], [1], [2], [0, 0, 0, 1, 1, 2], [0], [0]>} : vector<4x8x8xbf16>, vector<4x8x128xbf16>, vector<4x8x128xf32> -> vector<4x8x128xf32>
    "tpu.trace_stop"() : () -> ()
    %135 = vector.extract_strided_slice %134 {offsets = [0, 0, 0], sizes = [2, 8, 128], strides = [1, 1, 1]} : vector<4x8x128xf32> to vector<2x8x128xf32>
    %136 = vector.extract_strided_slice %134 {offsets = [2, 0, 0], sizes = [2, 8, 128], strides = [1, 1, 1]} : vector<4x8x128xf32> to vector<2x8x128xf32>
    %137 = tpu.concatenate %135, %136 in 2 : vector<2x8x128xf32>, vector<2x8x128xf32> -> vector<2x8x256xf32>
    %138 = vector.shape_cast %137 : vector<2x8x256xf32> to vector<16x256xf32>
    %139 = arith.truncf %138 : vector<16x256xf32> to vector<16x256xbf16>
    %cst_45 = arith.constant dense<0.000000e+00> : vector<16x256xf32>
    %140 = tpu.matmul %139, %90, %cst_45 {dimension_numbers = #tpu.dot_dimension_numbers<[1], [0], [0], [1], [0, 0, 1, 1], [], []>} : vector<16x256xbf16>, vector<256x256xbf16>, vector<16x256xf32> -> vector<16x256xf32>
    %141 = vector.broadcast %91 : vector<1x256xf32> to vector<16x256xf32>
    %142 = arith.addf %140, %141 : vector<16x256xf32>
    %143 = arith.addf %78, %142 : vector<16x256xf32>
    %144 = arith.truncf %143 : vector<16x256xf32> to vector<16x256xbf16>
    %cst_46 = arith.constant dense<0.000000e+00> : vector<16x256xf32>
    %145 = tpu.matmul %144, %94, %cst_46 {dimension_numbers = #tpu.dot_dimension_numbers<[1], [0], [0], [1], [0, 0, 1, 1], [], []>} : vector<16x256xbf16>, vector<256x256xbf16>, vector<16x256xf32> -> vector<16x256xf32>
    %146 = vector.broadcast %97 : vector<1x256xf32> to vector<16x256xf32>
    %147 = arith.addf %145, %146 : vector<16x256xf32>
    %cst_47 = arith.constant 0.000000e+00 : f32
    %148 = vector.broadcast %cst_47 : f32 to vector<16x256xf32>
    %149 = arith.maximumf %147, %148 : vector<16x256xf32>
    %150 = arith.truncf %149 : vector<16x256xf32> to vector<16x256xbf16>
    %cst_48 = arith.constant dense<0.000000e+00> : vector<16x256xf32>
    %151 = tpu.matmul %150, %100, %cst_48 {dimension_numbers = #tpu.dot_dimension_numbers<[1], [0], [0], [1], [0, 0, 1, 1], [], []>} : vector<16x256xbf16>, vector<256x256xbf16>, vector<16x256xf32> -> vector<16x256xf32>
    %152 = vector.broadcast %101 : vector<1x256xf32> to vector<16x256xf32>
    %153 = arith.addf %151, %152 : vector<16x256xf32>
    %154 = arith.addf %143, %153 : vector<16x256xf32>
    %c2_i32 = arith.constant 2 : i32
    %155 = vector.shape_cast %154 : vector<16x256xf32> to vector<2x8x256xf32>
    %c0_49 = arith.constant 0 : index
    %c0_50 = arith.constant 0 : index
    %c0_51 = arith.constant 0 : index
    %156 = vector.load %arg10[%c0_49, %c0_50, %c0_51] : memref<2x8x256xf32, #tpu.memory_space<vmem>>, vector<2x8x256xf32>
    tpu.vector_store %arg10[%c0_49, %c0_50, %c0_51], %155 {strides = array<i32>} : memref<2x8x256xf32, #tpu.memory_space<vmem>>, vector<2x8x256xf32>,
    return
  }
  func.func @transform_0(%arg0: i32) -> (i32, i32, i32) {
    %c0_i32 = arith.constant 0 : i32
    %c0_i32_0 = arith.constant 0 : i32
    %c0_i32_1 = arith.constant 0 : i32
    return %arg0, %c0_i32, %c0_i32_0 : i32, i32, i32
  }
  func.func @transform_1(%arg0: i32) -> (i32, i32) {
    %c0_i32 = arith.constant 0 : i32
    %c0_i32_0 = arith.constant 0 : i32
    %c0_i32_1 = arith.constant 0 : i32
    return %c0_i32, %c0_i32_0 : i32, i32
  }
  func.func @transform_2(%arg0: i32) -> (i32, i32, i32) {
    %c0_i32 = arith.constant 0 : i32
    %c0_i32_0 = arith.constant 0 : i32
    %c0_i32_1 = arith.constant 0 : i32
    %c0_i32_2 = arith.constant 0 : i32
    return %c0_i32, %c0_i32_0, %c0_i32_1 : i32, i32, i32
  }
  func.func @transform_3(%arg0: i32) -> (i32, i32, i32) {
    %c0_i32 = arith.constant 0 : i32
    %c0_i32_0 = arith.constant 0 : i32
    %c0_i32_1 = arith.constant 0 : i32
    %c0_i32_2 = arith.constant 0 : i32
    return %c0_i32, %c0_i32_0, %c0_i32_1 : i32, i32, i32
  }
  func.func @transform_4(%arg0: i32) -> (i32, i32, i32) {
    %c0_i32 = arith.constant 0 : i32
    %c0_i32_0 = arith.constant 0 : i32
    %c0_i32_1 = arith.constant 0 : i32
    %c0_i32_2 = arith.constant 0 : i32
    return %c0_i32, %c0_i32_0, %c0_i32_1 : i32, i32, i32
  }
  func.func @transform_5(%arg0: i32) -> (i32, i32, i32) {
    %c0_i32 = arith.constant 0 : i32
    %c0_i32_0 = arith.constant 0 : i32
    %c0_i32_1 = arith.constant 0 : i32
    %c0_i32_2 = arith.constant 0 : i32
    return %c0_i32, %c0_i32_0, %c0_i32_1 : i32, i32, i32
  }
  func.func @transform_6(%arg0: i32) -> (i32, i32, i32) {
    %c0_i32 = arith.constant 0 : i32
    %c0_i32_0 = arith.constant 0 : i32
    %c0_i32_1 = arith.constant 0 : i32
    %c0_i32_2 = arith.constant 0 : i32
    return %c0_i32, %c0_i32_0, %c0_i32_1 : i32, i32, i32
  }
  func.func @transform_7(%arg0: i32) -> (i32, i32, i32) {
    %c0_i32 = arith.constant 0 : i32
    %c0_i32_0 = arith.constant 0 : i32
    %c0_i32_1 = arith.constant 0 : i32
    %c0_i32_2 = arith.constant 0 : i32
    return %c0_i32, %c0_i32_0, %c0_i32_1 : i32, i32, i32
  }
  func.func @transform_8(%arg0: i32) -> (i32, i32, i32) {
    %c0_i32 = arith.constant 0 : i32
    %c0_i32_0 = arith.constant 0 : i32
    %c0_i32_1 = arith.constant 0 : i32
    %c0_i32_2 = arith.constant 0 : i32
    return %c0_i32, %c0_i32_0, %c0_i32_1 : i32, i32, i32
  }
  func.func @transform_9(%arg0: i32) -> (i32, i32, i32) {
    %c0_i32 = arith.constant 0 : i32
    %c0_i32_0 = arith.constant 0 : i32
    %c0_i32_1 = arith.constant 0 : i32
    return %arg0, %c0_i32, %c0_i32_0 : i32, i32, i32
  }
}

</mosaic_0001>

<bundles_post_ra>
// kernel: tpu_custom_call.1
= control target key start
LH: loop header
LB: loop body
LE: loop exit
PB: predicated region body
PF: predicated region fallthrough
CT: control target
= control target key end

     0   :  { %14 = vsyncpa [#allocation3], 0  ;;  %s6135_s0 = inlined_call_operand.hbm [shape: f32[2,8,256], index: 0, kind: input, shape index: {}]   ;;  %s6136_s1 = inlined_call_operand.hbm [shape: f32[8,8], index: 1, kind: input, shape index: {}]   ;;  %s6137_s2 = inlined_call_operand.hbm [shape: bf16[2,256,768], index: 2, kind: input, shape index: {}]   ;;  %s6138_s3 = inlined_call_operand.hbm [shape: f32[2,1,768], index: 3, kind: input, shape index: {}]   ;;  %s6139_s4 = inlined_call_operand.hbm [shape: bf16[2,256,256], index: 4, kind: input, shape index: {}]   ;;  %s6140_s5 = inlined_call_operand.hbm [shape: f32[2,2,256], index: 5, kind: input, shape index: {}]   ;;  %s6141_s6 = inlined_call_operand.hbm [shape: bf16[2,256,256], index: 6, kind: input, shape index: {}]   ;;  %s6142_s7 = inlined_call_operand.vmem [shape: f32[2,1,256], index: 7, kind: input, shape index: {}]   ;;  %s6143_s8 = inlined_call_operand.hbm [shape: bf16[2,256,256], index: 8, kind: input, shape index: {}]   ;;  %s6144_s9 = inlined_call_operand.hbm [shape: f32[2,8,256], index: 9, kind: output, shape index: {}]  }
   0x1   :  { %15 = vsyncpa [#allocation6], 0 }
   0x2   :  { %16 = vsyncpa [#allocation9], 0 }
   0x3   :  { %17 = vsyncpa [#allocation12], 0 }
   0x4   :  { %18 = vsyncpa [#allocation15], 0  ;;  %s38_s11 = sshll.u32 %s6136_s1, 4  ;;  %s39_s11 = int_to_ptr.hbm [resolvable:$true] %s38_s11 }
   0x5   :  { %19 = vsyncpa [#allocation4], 0  ;;  %s5871_s12 = smov [#allocation5]   ;;  %s61_s16 = sshll.u32 %s6138_s3, 4  ;;  %s62_s16 = int_to_ptr.hbm [resolvable:$true] %s61_s16 }
   0x6   :  { %s40_s13 = sshll.u32 %s5871_s12, 4  ;;  %s5872_s17 = smov [#allocation8]   ;;  %s41_s13 = int_to_ptr.vmem [resolvable:$true] %s40_s13 }
   0x7   :  { %43 = dma.hbm_to_vmem [thread:$0]  %s39_s11, 128, %s41_s13, [#allocation6]  }
   0x8   :  { %s63_s18 = sshll.u32 %s5872_s17, 4  ;;  %s5873_s19 = smov 96   ;;  %s64_s18 = int_to_ptr.vmem [resolvable:$true] %s63_s18 }
   0x9   :  { %s5874_s20 = smov 6   ;;  %s87_s1 = sshll.u32 %s6140_s5, 4  ;;  %s88_s1 = int_to_ptr.hbm [resolvable:$true] %s87_s1 }
   0xa   :  { %69 = dma.hbm_to_vmem [thread:$0]  %s62_s16, 192, %s64_s18, [#allocation9], %s5873_s19, %s5873_s19, %s5874_s20  }
   0xb   :  { %s5875_s23 = smov [#allocation11]   ;;  %s24_s3 = sshll.u32 %s6135_s0, 4  ;;  %s25_s3 = int_to_ptr.hbm [resolvable:$true] %s24_s3 }
   0xc   :  { %s89_s24 = sshll.u32 %s5875_s23, 4  ;;  %s5876_s27 = smov 64   ;;  %s90_s24 = int_to_ptr.vmem [resolvable:$true] %s89_s24 }
   0xd   :  { %s5877_s28 = smov 4   ;;  %s5878_s29 = smov [#allocation2]  }
   0xe   :  { %95 = dma.hbm_to_vmem [thread:$0]  %s88_s1, 128, %s90_s24, [#allocation12], %s5876_s27, %s5876_s27, %s5877_s28  }
   0xf   :  { %s26_s30 = sshll.u32 %s5878_s29, 4  ;;  %s5879_s10 = smov 256   ;;  %s27_s30 = int_to_ptr.vmem [resolvable:$true] %s26_s30 }
  0x10   :  { %s5880_s11 = smov 16   ;;  %s48_s13 = sshll.u32 %s6137_s2, 4  ;;  %s49_s13 = int_to_ptr.hbm [resolvable:$true] %s48_s13 }
  0x11   :  { %32 = dma.hbm_to_vmem [thread:$0]  %s25_s3, 512, %s27_s30, [#allocation3], %s5879_s10, %s5879_s10, %s5880_s11  }
  0x12   :  { %s5881_s14 = smov [#allocation7]   ;;  %s74_s17 = sshll.u32 %s6139_s4, 4  ;;  %s75_s17 = int_to_ptr.hbm [resolvable:$true] %s74_s17 }
  0x13   :  { %s50_s0 = sshll.u32 %s5881_s14, 4  ;;  %s5882_s18 = smov 384   ;;  %s51_s0 = int_to_ptr.vmem [resolvable:$true] %s50_s0 }
  0x14   :  { %s5883_s19 = smov 24   ;;  %s5884_s20 = smov [#allocation10]  }
  0x15   :  { %56 = dma.hbm_to_vmem [thread:$0]  %s49_s13, 24576, %s51_s0, [#allocation6], %s5882_s18, %s5882_s18, %s5883_s19  }
  0x16   :  { %s76_s21 = sshll.u32 %s5884_s20, 4  ;;  %s5885_s22 = smov 128   ;;  %s77_s21 = int_to_ptr.vmem [resolvable:$true] %s76_s21 }
  0x17   :  { %s5886_s1 = smov 8   ;;  %s100_s24 = sshll.u32 %s6141_s6, 4  ;;  %s101_s24 = int_to_ptr.hbm [resolvable:$true] %s100_s24 }
  0x18   :  { %82 = dma.hbm_to_vmem [thread:$0]  %s75_s17, 8192, %s77_s21, [#allocation9], %s5885_s22, %s5885_s22, %s5886_s1  }
  0x19   :  { %s5887_s25 = smov [#allocation13]   ;;  %s115_s27 = sshll.u32 %s6143_s8, 4  ;;  %s116_s27 = int_to_ptr.hbm [resolvable:$true] %s115_s27 }
  0x1a   :  { %s102_s26 = sshll.u32 %s5887_s25, 4  ;;  %s5888_s28 = smov [#allocation14]   ;;  %s103_s26 = int_to_ptr.vmem [resolvable:$true] %s102_s26 }
  0x1b   :  { %108 = dma.hbm_to_vmem [thread:$0]  %s101_s24, 8192, %s103_s26, [#allocation12], %s5885_s22, %s5885_s22, %s5886_s1  }
  0x1c   :  { %s117_s29 = sshll.u32 %s5888_s28, 4  ;;  %s118_s29 = int_to_ptr.vmem [resolvable:$true] %s117_s29 }
  0x1d   :  { %123 = dma.hbm_to_vmem [thread:$0]  %s116_s27, 8192, %s118_s29, [#allocation15], %s5885_s22, %s5885_s22, %s5886_s1  }
  0x1e   :  { %5859 = dma.done.wait [#allocation3], 512  }
  0x1f   :  { %5860 = vsyncadd [#allocation3], 4294966784 }
  0x20   :  { %5861 = dma.done.wait [#allocation6], 24704  }
  0x21   :  { %5862 = vsyncadd [#allocation6], 4294942592 }
  0x22   :  { %5863 = dma.done.wait [#allocation9], 8384  }
  0x23   :  { %5864 = vsyncadd [#allocation9], 4294958912 }
  0x24   :  { %5865 = dma.done.wait [#allocation12], 8320  }
  0x25   :  { %5866 = vsyncadd [#allocation12], 4294958976 }
  0x26   :  { %5867 = dma.done.wait [#allocation15], 8192  }
  0x27   :  { %5868 = vsyncadd [#allocation15], 4294959104  ;;  %v3828_v0 = vld [vmem:[#allocation7 + $0x150] sm:$0xf]  ;;  %v5248_v1 = vld [vmem:[#allocation7 + $0x164] sm:$0xf0] }
  0x28   :  { %v5245_v2 = vld [vmem:[#allocation7 + $0x154] sm:$0xf]  ;;  %v3829_v3 = vor.u32 %v5248_v1, %v3828_v0  ;;  %v3830_v4 = vld [vmem:[#allocation7 + $0x168] sm:$0xf0]  ;;  %v4020_v9 = vld [vmem:[#allocation7 + $0x2d0] sm:$0xf] }
  0x29   :  { %v5293_v5 = vld [vmem:[#allocation7 + $0x2d4] sm:$0xf]  ;;  %v4022_v6 = vld [vmem:[#allocation7 + $0x2e8] sm:$0xf0]  ;;  %v3833_v7 = vor.u32 %v5245_v2, %v3830_v4  ;;  %v5296_v10 = vld [vmem:[#allocation7 + $0x2e4] sm:$0xf0] }
  0x2a   :  { %v4025_v8 = vor.u32 %v5293_v5, %v4022_v6  ;;  %v3804_v11 = vld [vmem:[#allocation7 + $0x120] sm:$0xf]  ;;  %852 = vmatpush.bf16.msra.mxu0 %v3829_v3  ;;  %v4021_v12 = vor.u32 %v5296_v10, %v4020_v9  ;;  %v5242_v13 = vld [vmem:[#allocation7 + $0x134] sm:$0xf0]  ;;  %v5239_v14 = vld [vmem:[#allocation7 + $0x124] sm:$0xf] }
  0x2b   :  { %v3806_v15 = vld [vmem:[#allocation7 + $0x138] sm:$0xf0]  ;;  %880 = vmatpush.bf16.msra.mxu2 %v3833_v7  ;;  %v3805_v16 = vor.u32 %v5242_v13, %v3804_v11  ;;  %v5287_v18 = vld [vmem:[#allocation7 + $0x2a4] sm:$0xf]  ;;  %v3996_v20 = vld [vmem:[#allocation7 + $0x2a0] sm:$0xf] }
  0x2c   :  { %894 = vmatpush.bf16.msra.mxu3 %v4025_v8  ;;  %v3809_v17 = vor.u32 %v5239_v14, %v3806_v15  ;;  %v3998_v19 = vld [vmem:[#allocation7 + $0x2b8] sm:$0xf0]  ;;  %866 = vmatpush.bf16.msra.mxu1 %v4021_v12  ;;  %v5290_v22 = vld [vmem:[#allocation7 + $0x2b4] sm:$0xf0]  ;;  %v3780_v23 = vld [vmem:[#allocation7 + $0xf0] sm:$0xf] }
  0x2d   :  { %v4001_v21 = vor.u32 %v5287_v18, %v3998_v19  ;;  %v5236_v24 = vld [vmem:[#allocation7 + $0x104] sm:$0xf0]  ;;  %v3997_v25 = vor.u32 %v5290_v22, %v3996_v20  ;;  %v5233_v26 = vld [vmem:[#allocation7 + $0xf4] sm:$0xf]  ;;  %v3782_v27 = vld [vmem:[#allocation7 + $0x108] sm:$0xf0] }
  0x2e   :  { %v5281_v28 = vld [vmem:[#allocation7 + $0x274] sm:$0xf]  ;;  %853 = vmatpush.bf16.msra.mxu0 %v3805_v16  ;;  %v3781_v29 = vor.u32 %v5236_v24, %v3780_v23  ;;  %v3974_v30 = vld [vmem:[#allocation7 + $0x288] sm:$0xf0]  ;;  %v3972_v31 = vld [vmem:[#allocation7 + $0x270] sm:$0xf]  ;;  %v3785_v33 = vor.u32 %v5233_v26, %v3782_v27 }
  0x2f   :  { %v5284_v32 = vld [vmem:[#allocation7 + $0x284] sm:$0xf0]  ;;  %881 = vmatpush.bf16.msra.mxu2 %v3809_v17  ;;  %v3977_v34 = vor.u32 %v5281_v28, %v3974_v30  ;;  %v3756_v35 = vld [vmem:[#allocation7 + $0xc0] sm:$0xf]  ;;  %v5230_v36 = vld [vmem:[#allocation7 + $0xd4] sm:$0xf0] }
  0x30   :  { %895 = vmatpush.bf16.msra.mxu3 %v4001_v21  ;;  %v5227_v37 = vld [vmem:[#allocation7 + $0xc4] sm:$0xf]  ;;  %867 = vmatpush.bf16.msra.mxu1 %v3997_v25  ;;  %v3973_v38 = vor.u32 %v5284_v32, %v3972_v31  ;;  %v3758_v39 = vld [vmem:[#allocation7 + $0xd8] sm:$0xf0]  ;;  %v3948_v42 = vld [vmem:[#allocation7 + $0x240] sm:$0xf]  ;;  %v3757_v44 = vor.u32 %v5230_v36, %v3756_v35 }
  0x31   :  { %v5275_v40 = vld [vmem:[#allocation7 + $0x244] sm:$0xf]  ;;  %v3950_v41 = vld [vmem:[#allocation7 + $0x258] sm:$0xf0]  ;;  %v5278_v43 = vld [vmem:[#allocation7 + $0x254] sm:$0xf0]  ;;  %v3761_v45 = vor.u32 %v5227_v37, %v3758_v39 }
  0x32   :  { %854 = vmatpush.bf16.msra.mxu0 %v3781_v29  ;;  %v3953_v46 = vor.u32 %v5275_v40, %v3950_v41  ;;  %v3732_v47 = vld [vmem:[#allocation7 + $0x90] sm:$0xf]  ;;  %v5224_v48 = vld [vmem:[#allocation7 + $0xa4] sm:$0xf0]  ;;  %v5221_v49 = vld [vmem:[#allocation7 + $0x94] sm:$0xf]  ;;  %v3949_v50 = vor.u32 %v5278_v43, %v3948_v42 }
  0x33   :  { %882 = vmatpush.bf16.msra.mxu2 %v3785_v33  ;;  %v3734_v51 = vld [vmem:[#allocation7 + $0xa8] sm:$0xf0]  ;;  %v5269_v52 = vld [vmem:[#allocation7 + $0x214] sm:$0xf]  ;;  %v3924_v54 = vld [vmem:[#allocation7 + $0x210] sm:$0xf]  ;;  %v3733_v56 = vor.u32 %v5224_v48, %v3732_v47 }
  0x34   :  { %896 = vmatpush.bf16.msra.mxu3 %v3977_v34  ;;  %868 = vmatpush.bf16.msra.mxu1 %v3973_v38  ;;  %v3926_v53 = vld [vmem:[#allocation7 + $0x228] sm:$0xf0]  ;;  %v5272_v55 = vld [vmem:[#allocation7 + $0x224] sm:$0xf0]  ;;  %v3737_v57 = vor.u32 %v5221_v49, %v3734_v51  ;;  %v3708_v59 = vld [vmem:[#allocation7 + $0x60] sm:$0xf] }
  0x35   :  { %v3929_v58 = vor.u32 %v5269_v52, %v3926_v53  ;;  %v5218_v60 = vld [vmem:[#allocation7 + $0x74] sm:$0xf0]  ;;  %v5215_v61 = vld [vmem:[#allocation7 + $0x64] sm:$0xf]  ;;  %v3925_v62 = vor.u32 %v5272_v55, %v3924_v54  ;;  %v3710_v63 = vld [vmem:[#allocation7 + $0x78] sm:$0xf0] }
  0x36   :  { %855 = vmatpush.bf16.msra.mxu0 %v3757_v44  ;;  %v5263_v0 = vld [vmem:[#allocation7 + $0x1e4] sm:$0xf]  ;;  %v3902_v1 = vld [vmem:[#allocation7 + $0x1f8] sm:$0xf0]  ;;  %v3900_v2 = vld [vmem:[#allocation7 + $0x1e0] sm:$0xf]  ;;  %v3709_v4 = vor.u32 %v5218_v60, %v3708_v59  ;;  %v3713_v5 = vor.u32 %v5215_v61, %v3710_v63 }
  0x37   :  { %883 = vmatpush.bf16.msra.mxu2 %v3761_v45  ;;  %v5266_v3 = vld [vmem:[#allocation7 + $0x1f4] sm:$0xf0]  ;;  %v3905_v6 = vor.u32 %v5263_v0, %v3902_v1  ;;  %v3684_v7 = vld [vmem:[#allocation7 + $0x30] sm:$0xf]  ;;  %v5212_v8 = vld [vmem:[#allocation7 + $0x44] sm:$0xf0] }
  0x38   :  { %897 = vmatpush.bf16.msra.mxu3 %v3953_v46  ;;  %869 = vmatpush.bf16.msra.mxu1 %v3949_v50  ;;  %v5209_v9 = vld [vmem:[#allocation7 + $0x34] sm:$0xf]  ;;  %v3901_v10 = vor.u32 %v5266_v3, %v3900_v2  ;;  %v3686_v11 = vld [vmem:[#allocation7 + $0x48] sm:$0xf0]  ;;  %v3876_v14 = vld [vmem:[#allocation7 + $0x1b0] sm:$0xf]  ;;  %v3685_v16 = vor.u32 %v5212_v8, %v3684_v7 }
  0x39   :  { %v5257_v12 = vld [vmem:[#allocation7 + $0x1b4] sm:$0xf]  ;;  %v3878_v13 = vld [vmem:[#allocation7 + $0x1c8] sm:$0xf0]  ;;  %v5260_v15 = vld [vmem:[#allocation7 + $0x1c4] sm:$0xf0]  ;;  %v3689_v20 = vor.u32 %v5209_v9, %v3686_v11 }
  0x3a   :  { %856 = vmatpush.bf16.msra.mxu0 %v3733_v56  ;;  %v3660_v17 = vld [vmem:[#allocation7] sm:$0xf]  ;;  %v5206_v18 = vld [vmem:[#allocation7 + $0x14] sm:$0xf0]  ;;  %v5203_v19 = vld [vmem:[#allocation7 + $0x4] sm:$0xf]  ;;  %v3881_v21 = vor.u32 %v5257_v12, %v3878_v13  ;;  %v3877_v25 = vor.u32 %v5260_v15, %v3876_v14 }
  0x3b   :  { %884 = vmatpush.bf16.msra.mxu2 %v3737_v57  ;;  %v3662_v22 = vld [vmem:[#allocation7 + $0x18] sm:$0xf0]  ;;  %v5251_v23 = vld [vmem:[#allocation7 + $0x184] sm:$0xf]  ;;  %v3836_v26 = vld [vmem:[#allocation7 + $0x158] sm:$0xf]  ;;  %v3661_v32 = vor.u32 %v5206_v18, %v3660_v17 }
  0x3c   :  { %898 = vmatpush.bf16.msra.mxu3 %v3929_v58  ;;  %870 = vmatpush.bf16.msra.mxu1 %v3925_v62  ;;  %v3854_v24 = vld [vmem:[#allocation7 + $0x198] sm:$0xf0]  ;;  %v5249_v27 = vld [vmem:[#allocation7 + $0x16c] sm:$0xf0]  ;;  %v3838_v29 = vld [vmem:[#allocation7 + $0x170] sm:$0xf0]  ;;  %v3665_v36 = vor.u32 %v5203_v19, %v3662_v22 }
  0x3d   :  { %v5246_v28 = vld [vmem:[#allocation7 + $0x15c] sm:$0xf]  ;;  %v4030_v31 = vld [vmem:[#allocation7 + $0x2f0] sm:$0xf0]  ;;  %v3852_v33 = vld [vmem:[#allocation7 + $0x180] sm:$0xf]  ;;  %v3857_v37 = vor.u32 %v5251_v23, %v3854_v24  ;;  %v3837_v41 = vor.u32 %v5249_v27, %v3836_v26 }
  0x3e   :  { %857 = vmatpush.bf16.msra.mxu0 %v3709_v4  ;;  %v5294_v30 = vld [vmem:[#allocation7 + $0x2dc] sm:$0xf]  ;;  %v5254_v34 = vld [vmem:[#allocation7 + $0x194] sm:$0xf0]  ;;  %v5297_v38 = vld [vmem:[#allocation7 + $0x2ec] sm:$0xf0]  ;;  %v3841_v42 = vor.u32 %v5246_v28, %v3838_v29 }
  0x3f   :  { %885 = vmatpush.bf16.msra.mxu2 %v3713_v5  ;;  %v4028_v35 = vld [vmem:[#allocation7 + $0x2d8] sm:$0xf]  ;;  %v160_v40 = vld [vmem:[#allocation2 + $0x10] sm:$0xff]  ;;  %v159_v44 = vld [vmem:[#allocation2 + $0x8] sm:$0xff]  ;;  %v4033_v46 = vor.u32 %v5294_v30, %v4030_v31  ;;  %v3853_v47 = vor.u32 %v5254_v34, %v3852_v33  ;;  %vm1136_vm0 = vcmask 1043456   ;;  %vm1084_vm1 = vcmask 64512  }
  0x40   :  { %899 = vmatpush.bf16.msra.mxu3 %v3905_v6  ;;  %871 = vmatpush.bf16.msra.mxu1 %v3901_v10  ;;  %v158_v39 = vld [vmem:[#allocation2] sm:$0xff]  ;;  %v3812_v43 = vld [vmem:[#allocation7 + $0x128] sm:$0xf]  ;;  %v161_v45 = vld [vmem:[#allocation2 + $0x18] sm:$0xff]  ;;  %v4029_v51 = vor.u32 %v5297_v38, %v4028_v35  ;;  %s3641_s0 = sshll.u32 %s6144_s9, 4  ;;  %s3642_s0 = int_to_ptr.hbm [resolvable:$true] %s3641_s0 }
  0x41   :  { %v5243_v48 = vld [vmem:[#allocation7 + $0x13c] sm:$0xf0]  ;;  %v5240_v49 = vld [vmem:[#allocation7 + $0x12c] sm:$0xf]  ;;  %v3814_v50 = vld [vmem:[#allocation7 + $0x140] sm:$0xf0]  ;;  %v5967_v54 = vpack.c.bf16 %v160_v40, %v158_v39  ;;  %v5969_v57 = vpack.c.bf16 %v161_v45, %v159_v44 }
  0x42   :  { %858 = vmatpush.bf16.msra.mxu0 %v3685_v16  ;;  %v5288_v52 = vld [vmem:[#allocation7 + $0x2ac] sm:$0xf]  ;;  %v4006_v53 = vld [vmem:[#allocation7 + $0x2c0] sm:$0xf0]  ;;  %v4004_v55 = vld [vmem:[#allocation7 + $0x2a8] sm:$0xf]  ;;  %v3813_v58 = vor.u32 %v5243_v48, %v3812_v43  ;;  %v3817_v59 = vor.u32 %v5240_v49, %v3814_v50 }
  0x43   :  { %886 = vmatpush.bf16.msra.mxu2 %v3689_v20  ;;  %v5291_v56 = vld [vmem:[#allocation7 + $0x2bc] sm:$0xf0]  ;;  %v3788_v60 = vld [vmem:[#allocation7 + $0xf8] sm:$0xf]  ;;  %v4009_v61 = vor.u32 %v5288_v52, %v4006_v53  ;;  %v5237_v62 = vld [vmem:[#allocation7 + $0x10c] sm:$0xf0] }
  0x44   :  { %900 = vmatpush.bf16.msra.mxu3 %v3881_v21  ;;  %872 = vmatpush.bf16.msra.mxu1 %v3877_v25  ;;  %v5234_v63 = vld [vmem:[#allocation7 + $0xfc] sm:$0xf]  ;;  %v3790_v0 = vld [vmem:[#allocation7 + $0x110] sm:$0xf0]  ;;  %v4005_v1 = vor.u32 %v5291_v56, %v4004_v55  ;;  %v3980_v4 = vld [vmem:[#allocation7 + $0x278] sm:$0xf]  ;;  %v3789_v6 = vor.u32 %v5237_v62, %v3788_v60 }
  0x45   :  { %v5282_v2 = vld [vmem:[#allocation7 + $0x27c] sm:$0xf]  ;;  %v3982_v3 = vld [vmem:[#allocation7 + $0x290] sm:$0xf0]  ;;  %v5285_v5 = vld [vmem:[#allocation7 + $0x28c] sm:$0xf0]  ;;  %v3793_v7 = vor.u32 %v5234_v63, %v3790_v0 }
  0x46   :  { %859 = vmatpush.bf16.msra.mxu0 %v3661_v32  ;;  %v3764_v8 = vld [vmem:[#allocation7 + $0xc8] sm:$0xf]  ;;  %v3985_v9 = vor.u32 %v5282_v2, %v3982_v3  ;;  %v5231_v10 = vld [vmem:[#allocation7 + $0xdc] sm:$0xf0]  ;;  %v5228_v11 = vld [vmem:[#allocation7 + $0xcc] sm:$0xf]  ;;  %v3981_v13 = vor.u32 %v5285_v5, %v3980_v4 }
  0x47   :  { %887 = vmatpush.bf16.msra.mxu2 %v3665_v36  ;;  %v3766_v12 = vld [vmem:[#allocation7 + $0xe0] sm:$0xf0]  ;;  %v5276_v14 = vld [vmem:[#allocation7 + $0x24c] sm:$0xf]  ;;  %v3956_v16 = vld [vmem:[#allocation7 + $0x248] sm:$0xf]  ;;  %v3765_v18 = vor.u32 %v5231_v10, %v3764_v8 }
  0x48   :  { %901 = vmatpush.bf16.msra.mxu3 %v3857_v37  ;;  %873 = vmatpush.bf16.msra.mxu1 %v3853_v47  ;;  %v3958_v15 = vld [vmem:[#allocation7 + $0x260] sm:$0xf0]  ;;  %v5279_v17 = vld [vmem:[#allocation7 + $0x25c] sm:$0xf0]  ;;  %v3769_v19 = vor.u32 %v5228_v11, %v3766_v12  ;;  %v3740_v20 = vld [vmem:[#allocation7 + $0x98] sm:$0xf] }
  0x49   :  { %860 = vmatmul.bf16.vlgmr.msra.gmra.mxu0 %v5967_v54  ;;  %v3961_v21 = vor.u32 %v5276_v14, %v3958_v15  ;;  %v5225_v22 = vld [vmem:[#allocation7 + $0xac] sm:$0xf0]  ;;  %v5222_v23 = vld [vmem:[#allocation7 + $0x9c] sm:$0xf]  ;;  %v3742_v24 = vld [vmem:[#allocation7 + $0xb0] sm:$0xf0]  ;;  %v3957_v25 = vor.u32 %v5279_v17, %v3956_v16 }
  0x4a   :  { %908 = vmatpush.bf16.msrb.mxu0 %v3837_v41  ;;  %888 = vmatmul.bf16.vlgmr.msra.gmra.mxu2 %v5967_v54  ;;  %v5270_v26 = vld [vmem:[#allocation7 + $0x21c] sm:$0xf]  ;;  %v3934_v27 = vld [vmem:[#allocation7 + $0x230] sm:$0xf0]  ;;  %v3932_v28 = vld [vmem:[#allocation7 + $0x218] sm:$0xf]  ;;  %v3741_v30 = vor.u32 %v5225_v22, %v3740_v20  ;;  %v3745_v31 = vor.u32 %v5222_v23, %v3742_v24 }
  0x4b   :  { %936 = vmatpush.bf16.msrb.mxu2 %v3841_v42  ;;  %902 = vmatmul.bf16.vlgmr.msra.gmra.mxu3 %v5969_v57  ;;  %v5273_v29 = vld [vmem:[#allocation7 + $0x22c] sm:$0xf0]  ;;  %v3716_v32 = vld [vmem:[#allocation7 + $0x68] sm:$0xf]  ;;  %v3937_v33 = vor.u32 %v5270_v26, %v3934_v27  ;;  %v5219_v34 = vld [vmem:[#allocation7 + $0x7c] sm:$0xf0] }
  0x4c   :  { %950 = vmatpush.bf16.msrb.mxu3 %v4033_v46  ;;  %922 = vmatpush.bf16.msrb.mxu1 %v4029_v51  ;;  %v5216_v35 = vld [vmem:[#allocation7 + $0x6c] sm:$0xf]  ;;  %v3718_v36 = vld [vmem:[#allocation7 + $0x80] sm:$0xf0]  ;;  %v3933_v37 = vor.u32 %v5273_v29, %v3932_v28  ;;  %v3908_v40 = vld [vmem:[#allocation7 + $0x1e8] sm:$0xf]  ;;  %v3717_v42 = vor.u32 %v5219_v34, %v3716_v32 }
  0x4d   :  { %874 = vmatmul.bf16.vlgmr.msra.gmra.mxu1 %v5969_v57  ;;  %v5264_v38 = vld [vmem:[#allocation7 + $0x1ec] sm:$0xf]  ;;  %v3910_v39 = vld [vmem:[#allocation7 + $0x200] sm:$0xf0]  ;;  %v5267_v41 = vld [vmem:[#allocation7 + $0x1fc] sm:$0xf0]  ;;  %v3721_v43 = vor.u32 %v5216_v35, %v3718_v36 }
  0x4e   :  { %909 = vmatpush.bf16.msrb.mxu0 %v3813_v58  ;;  %v3692_v44 = vld [vmem:[#allocation7 + $0x38] sm:$0xf]  ;;  %v3913_v45 = vor.u32 %v5264_v38, %v3910_v39  ;;  %v5213_v46 = vld [vmem:[#allocation7 + $0x4c] sm:$0xf0]  ;;  %v5210_v47 = vld [vmem:[#allocation7 + $0x3c] sm:$0xf]  ;;  %v3909_v49 = vor.u32 %v5267_v41, %v3908_v40 }
  0x4f   :  { %937 = vmatpush.bf16.msrb.mxu2 %v3817_v59  ;;  %v3694_v48 = vld [vmem:[#allocation7 + $0x50] sm:$0xf0]  ;;  %v5258_v50 = vld [vmem:[#allocation7 + $0x1bc] sm:$0xf]  ;;  %v3884_v52 = vld [vmem:[#allocation7 + $0x1b8] sm:$0xf]  ;;  %v3693_v55 = vor.u32 %v5213_v46, %v3692_v44 }
  0x50   :  { %951 = vmatpush.bf16.msrb.mxu3 %v4009_v61  ;;  %923 = vmatpush.bf16.msrb.mxu1 %v4005_v1  ;;  %v3886_v51 = vld [vmem:[#allocation7 + $0x1d0] sm:$0xf0]  ;;  %v5261_v53 = vld [vmem:[#allocation7 + $0x1cc] sm:$0xf0]  ;;  %v3697_v56 = vor.u32 %v5210_v47, %v3694_v48  ;;  %v3668_v58 = vld [vmem:[#allocation7 + $0x8] sm:$0xf] }
  0x51   :  { %v5207_v59 = vld [vmem:[#allocation7 + $0x1c] sm:$0xf0]  ;;  %v5204_v60 = vld [vmem:[#allocation7 + $0xc] sm:$0xf]  ;;  %v3889_v61 = vor.u32 %v5258_v50, %v3886_v51  ;;  %v3670_v62 = vld [vmem:[#allocation7 + $0x20] sm:$0xf0]  ;;  %v3885_v1 = vor.u32 %v5261_v53, %v3884_v52 }
  0x52   :  { %910 = vmatpush.bf16.msrb.mxu0 %v3789_v6  ;;  %v5252_v63 = vld [vmem:[#allocation7 + $0x18c] sm:$0xf]  ;;  %v3862_v0 = vld [vmem:[#allocation7 + $0x1a0] sm:$0xf0]  ;;  %v3860_v2 = vld [vmem:[#allocation7 + $0x188] sm:$0xf]  ;;  %v3669_v8 = vor.u32 %v5207_v59, %v3668_v58 }
  0x53   :  { %938 = vmatpush.bf16.msrb.mxu2 %v3793_v7  ;;  %v5247_v3 = vld [vmem:[#allocation7 + $0x164] sm:$0xf]  ;;  %v3846_v4 = vld [vmem:[#allocation7 + $0x178] sm:$0xf0]  ;;  %v5255_v5 = vld [vmem:[#allocation7 + $0x19c] sm:$0xf0]  ;;  %v3865_v10 = vor.u32 %v5252_v63, %v3862_v0 }
  0x54   :  { %952 = vmatpush.bf16.msrb.mxu3 %v3985_v9  ;;  %924 = vmatpush.bf16.msrb.mxu1 %v3981_v13  ;;  %v3844_v6 = vld [vmem:[#allocation7 + $0x160] sm:$0xf]  ;;  %v5250_v7 = vld [vmem:[#allocation7 + $0x174] sm:$0xf0]  ;;  %v3673_v9 = vor.u32 %v5204_v60, %v3670_v62  ;;  %v3849_v11 = vor.u32 %v5247_v3, %v3846_v4  ;;  %v3861_v14 = vor.u32 %v5255_v5, %v3860_v2  ;;  %v5295_v16 = vld [vmem:[#allocation7 + $0x2e4] sm:$0xf] }
  0x55   :  { %v4036_v12 = vld [vmem:[#allocation7 + $0x2e0] sm:$0xf]  ;;  %v5298_v13 = vld [vmem:[#allocation7 + $0x2f4] sm:$0xf0]  ;;  %v3845_v15 = vor.u32 %v5250_v7, %v3844_v6  ;;  %v4038_v17 = vld [vmem:[#allocation7 + $0x2f8] sm:$0xf0] }
  0x56   :  { %911 = vmatpush.bf16.msrb.mxu0 %v3765_v18  ;;  %v5241_v18 = vld [vmem:[#allocation7 + $0x134] sm:$0xf]  ;;  %v3820_v20 = vld [vmem:[#allocation7 + $0x130] sm:$0xf]  ;;  %v4037_v22 = vor.u32 %v5298_v13, %v4036_v12  ;;  %v4041_v23 = vor.u32 %v5295_v16, %v4038_v17  ;;  %v4014_v29 = vld [vmem:[#allocation7 + $0x2c8] sm:$0xf0] }
  0x57   :  { %939 = vmatpush.bf16.msrb.mxu2 %v3769_v19  ;;  %v3822_v19 = vld [vmem:[#allocation7 + $0x148] sm:$0xf0]  ;;  %v4012_v24 = vld [vmem:[#allocation7 + $0x2b0] sm:$0xf]  ;;  %v5289_v28 = vld [vmem:[#allocation7 + $0x2b4] sm:$0xf] }
  0x58   :  { %953 = vmatpush.bf16.msrb.mxu3 %v3961_v21  ;;  %925 = vmatpush.bf16.msrb.mxu1 %v3957_v25  ;;  %v5244_v21 = vld [vmem:[#allocation7 + $0x144] sm:$0xf0]  ;;  %v3825_v26 = vor.u32 %v5241_v18, %v3822_v19  ;;  %v3796_v32 = vld [vmem:[#allocation7 + $0x100] sm:$0xf]  ;;  %v4017_v35 = vor.u32 %v5289_v28, %v4014_v29  ;;  %v5283_v38 = vld [vmem:[#allocation7 + $0x284] sm:$0xf] }
  0x59   :  { %v5292_v25 = vld [vmem:[#allocation7 + $0x2c4] sm:$0xf0]  ;;  %v3821_v27 = vor.u32 %v5244_v21, %v3820_v20  ;;  %v3990_v39 = vld [vmem:[#allocation7 + $0x298] sm:$0xf0]  ;;  %v5229_v40 = vld [vmem:[#allocation7 + $0xd4] sm:$0xf] }
  0x5a   :  { %912 = vmatpush.bf16.msrb.mxu0 %v3741_v30  ;;  %v5235_v30 = vld [vmem:[#allocation7 + $0x104] sm:$0xf]  ;;  %v4013_v34 = vor.u32 %v5292_v25, %v4012_v24  ;;  %v3774_v41 = vld [vmem:[#allocation7 + $0xe8] sm:$0xf0]  ;;  %v3993_v44 = vor.u32 %v5283_v38, %v3990_v39  ;;  %v5277_v47 = vld [vmem:[#allocation7 + $0x254] sm:$0xf] }
  0x5b   :  { %940 = vmatpush.bf16.msrb.mxu2 %v3745_v31  ;;  %v3798_v31 = vld [vmem:[#allocation7 + $0x118] sm:$0xf0]  ;;  %v3966_v48 = vld [vmem:[#allocation7 + $0x268] sm:$0xf0]  ;;  %v3748_v53 = vld [vmem:[#allocation7 + $0xa0] sm:$0xf] }
  0x5c   :  { %954 = vmatpush.bf16.msrb.mxu3 %v3937_v33  ;;  %926 = vmatpush.bf16.msrb.mxu1 %v3933_v37  ;;  %v5238_v33 = vld [vmem:[#allocation7 + $0x114] sm:$0xf0]  ;;  %v3801_v36 = vor.u32 %v5235_v30, %v3798_v31  ;;  %v3750_v50 = vld [vmem:[#allocation7 + $0xb8] sm:$0xf0]  ;;  %v3969_v51 = vor.u32 %v5277_v47, %v3966_v48  ;;  %v5271_v60 = vld [vmem:[#allocation7 + $0x224] sm:$0xf] }
  0x5d   :  { %v3797_v37 = vor.u32 %v5238_v33, %v3796_v32  ;;  %v5286_v59 = vld [vmem:[#allocation7 + $0x294] sm:$0xf0]  ;;  %v5217_v0 = vld [vmem:[#allocation7 + $0x74] sm:$0xf]  ;;  %v3724_v2 = vld [vmem:[#allocation7 + $0x70] sm:$0xf] }
  0x5e   :  { %913 = vmatpush.bf16.msrb.mxu0 %v3717_v42  ;;  %v3772_v42 = vld [vmem:[#allocation7 + $0xd0] sm:$0xf]  ;;  %v5220_v4 = vld [vmem:[#allocation7 + $0x84] sm:$0xf0]  ;;  %v3702_v13 = vld [vmem:[#allocation7 + $0x58] sm:$0xf0] }
  0x5f   :  { %941 = vmatpush.bf16.msrb.mxu2 %v3721_v43  ;;  %v5232_v43 = vld [vmem:[#allocation7 + $0xe4] sm:$0xf0]  ;;  %v3964_v5 = vld [vmem:[#allocation7 + $0x250] sm:$0xf]  ;;  %v3725_v7 = vor.u32 %v5220_v4, %v3724_v2  ;;  %v5214_v16 = vld [vmem:[#allocation7 + $0x54] sm:$0xf0] }
  0x60   :  { %955 = vmatpush.bf16.msrb.mxu3 %v3913_v45  ;;  %927 = vmatpush.bf16.msrb.mxu1 %v3909_v49  ;;  %v3777_v45 = vor.u32 %v5229_v40, %v3774_v41  ;;  %v3773_v46 = vor.u32 %v5232_v43, %v3772_v42  ;;  %v5223_v49 = vld [vmem:[#allocation7 + $0xa4] sm:$0xf]  ;;  %v5280_v6 = vld [vmem:[#allocation7 + $0x264] sm:$0xf0]  ;;  %v3940_v17 = vld [vmem:[#allocation7 + $0x220] sm:$0xf] }
  0x61   :  { %v3753_v52 = vor.u32 %v5223_v49, %v3750_v50  ;;  %v5274_v19 = vld [vmem:[#allocation7 + $0x234] sm:$0xf0]  ;;  %v5259_v20 = vld [vmem:[#allocation7 + $0x1c4] sm:$0xf]  ;;  %v3894_v21 = vld [vmem:[#allocation7 + $0x1d8] sm:$0xf0] }
  0x62   :  { %914 = vmatpush.bf16.msrb.mxu0 %v3693_v55  ;;  %v5226_v55 = vld [vmem:[#allocation7 + $0xb4] sm:$0xf0]  ;;  %v5205_v24 = vld [vmem:[#allocation7 + $0x14] sm:$0xf]  ;;  %v3678_v25 = vld [vmem:[#allocation7 + $0x28] sm:$0xf0] }
  0x63   :  { %942 = vmatpush.bf16.msrb.mxu2 %v3697_v56  ;;  %v3988_v56 = vld [vmem:[#allocation7 + $0x280] sm:$0xf]  ;;  %v3749_v58 = vor.u32 %v5226_v55, %v3748_v53  ;;  %v5208_v28 = vld [vmem:[#allocation7 + $0x24] sm:$0xf0]  ;;  %v3916_v29 = vld [vmem:[#allocation7 + $0x1f0] sm:$0xf] }
  0x64   :  { %956 = vmatpush.bf16.msrb.mxu3 %v3889_v61  ;;  %928 = vmatpush.bf16.msrb.mxu1 %v3885_v1  ;;  %v3942_v61 = vld [vmem:[#allocation7 + $0x238] sm:$0xf0]  ;;  %v3989_v62 = vor.u32 %v5286_v59, %v3988_v56  ;;  %v3726_v1 = vld [vmem:[#allocation7 + $0x88] sm:$0xf0]  ;;  %v5268_v30 = vld [vmem:[#allocation7 + $0x204] sm:$0xf0] }
  0x65   :  { %v3945_v63 = vor.u32 %v5271_v60, %v3942_v61  ;;  %v3729_v3 = vor.u32 %v5217_v0, %v3726_v1  ;;  %v3917_v32 = vor.u32 %v5268_v30, %v3916_v29  ;;  %v5253_v33 = vld [vmem:[#allocation7 + $0x194] sm:$0xf]  ;;  %v3868_v39 = vld [vmem:[#allocation7 + $0x190] sm:$0xf]  ;;  %v5256_v40 = vld [vmem:[#allocation7 + $0x1a4] sm:$0xf0] }
  0x66   :  { %915 = vmatpush.bf16.msrb.mxu0 %v3669_v8  ;;  %v3965_v8 = vor.u32 %v5280_v6, %v3964_v5  ;;  %v3869_v41 = vor.u32 %v5256_v40, %v3868_v39  ;;  %v5983_v48 = vld [vmem:[#allocation8] sm:$0x3f] }
  0x67   :  { %943 = vmatpush.bf16.msrb.mxu2 %v3673_v9  ;;  %v5265_v9 = vld [vmem:[#allocation7 + $0x1f4] sm:$0xf]  ;;  %v362_v49 = vperm.slane %v5983_v48, 2  ;;  %v361_v60 = vperm.slane %v5983_v48, 1 }
  0x68   :  { %957 = vmatpush.bf16.msrb.mxu3 %v3865_v10  ;;  %929 = vmatpush.bf16.msrb.mxu1 %v3861_v14  ;;  %v3918_v10 = vld [vmem:[#allocation7 + $0x208] sm:$0xf0] }
  0x69   :  { %916 = vmatmul.bf16.vlgmr.msrb.gmra.mxu0 %v5967_v54  ;;  %v3921_v12 = vor.u32 %v5265_v9, %v3918_v10 }
  0x6a   :  { %964 = vmatpush.bf16.msra.mxu0 %v3845_v15  ;;  %944 = vmatmul.bf16.vlgmr.msrb.gmra.mxu2 %v5967_v54  ;;  %v3700_v15 = vld [vmem:[#allocation7 + $0x40] sm:$0xf] }
  0x6b   :  { %992 = vmatpush.bf16.msra.mxu2 %v3849_v11  ;;  %958 = vmatmul.bf16.vlgmr.msrb.gmra.mxu3 %v5969_v57  ;;  %v5211_v11 = vld [vmem:[#allocation7 + $0x44] sm:$0xf]  ;;  %v3701_v18 = vor.u32 %v5214_v16, %v3700_v15 }
  0x6c   :  { %978 = vmatpush.bf16.msra.mxu1 %v4037_v22  ;;  %1006 = vmatpush.bf16.msra.mxu3 %v4041_v23  ;;  %v3705_v14 = vor.u32 %v5211_v11, %v3702_v13  ;;  %v3941_v22 = vor.u32 %v5274_v19, %v3940_v17  ;;  %v3897_v23 = vor.u32 %v5259_v20, %v3894_v21 }
  0x6d   :  { %930 = vmatmul.bf16.vlgmr.msrb.gmra.mxu1 %v5969_v57 }
  0x6e   :  { %965 = vmatpush.bf16.msra.mxu0 %v3821_v27  ;;  %v3681_v27 = vor.u32 %v5205_v24, %v3678_v25  ;;  %v364_v24 = vperm.slane %v5983_v48, 4 }
  0x6f   :  { %993 = vmatpush.bf16.msra.mxu2 %v3825_v26  ;;  %v3676_v26 = vld [vmem:[#allocation7 + $0x10] sm:$0xf] }
  0x70   :  { %979 = vmatpush.bf16.msra.mxu1 %v4013_v34  ;;  %1007 = vmatpush.bf16.msra.mxu3 %v4017_v35  ;;  %v3677_v31 = vor.u32 %v5208_v28, %v3676_v26  ;;  %v3870_v34 = vld [vmem:[#allocation7 + $0x1a8] sm:$0xf0]  ;;  %v3892_v35 = vld [vmem:[#allocation7 + $0x1c0] sm:$0xf] }
  0x72   :  { %966 = vmatpush.bf16.msra.mxu0 %v3797_v37  ;;  %v5262_v37 = vld [vmem:[#allocation7 + $0x1d4] sm:$0xf0] }
  0x73   :  { %994 = vmatpush.bf16.msra.mxu2 %v3801_v36  ;;  %v3873_v36 = vor.u32 %v5253_v33, %v3870_v34  ;;  %v3893_v38 = vor.u32 %v5262_v37, %v3892_v35 }
  0x74   :  { %1008 = vmatpush.bf16.msra.mxu3 %v3993_v44  ;;  %980 = vmatpush.bf16.msra.mxu1 %v3989_v62 }
  0x76   :  { %967 = vmatpush.bf16.msra.mxu0 %v3773_v46 }
  0x77   :  { %995 = vmatpush.bf16.msra.mxu2 %v3777_v45 }
  0x78   :  { %1009 = vmatpush.bf16.msra.mxu3 %v3969_v51  ;;  %981 = vmatpush.bf16.msra.mxu1 %v3965_v8  ;;  %v360_v51 = vperm.slane %v5983_v48, 0 }
  0x7a   :  { %968 = vmatpush.bf16.msra.mxu0 %v3749_v58 }
  0x7b   :  { %996 = vmatpush.bf16.msra.mxu2 %v3753_v52 }
  0x7c   :  { %1010 = vmatpush.bf16.msra.mxu3 %v3945_v63  ;;  %982 = vmatpush.bf16.msra.mxu1 %v3941_v22 }
  0x7e   :  { %969 = vmatpush.bf16.msra.mxu0 %v3725_v7 }
  0x7f   :  { %997 = vmatpush.bf16.msra.mxu2 %v3729_v3 }
  0x80   :  { %1011 = vmatpush.bf16.msra.mxu3 %v3921_v12  ;;  %983 = vmatpush.bf16.msra.mxu1 %v3917_v32 }
  0x82   :  { %970 = vmatpush.bf16.msra.mxu0 %v3701_v18 }
  0x83   :  { %998 = vmatpush.bf16.msra.mxu2 %v3705_v14 }
  0x84   :  { %1012 = vmatpush.bf16.msra.mxu3 %v3897_v23  ;;  %984 = vmatpush.bf16.msra.mxu1 %v3893_v38  ;;  %v365_v23 = vperm.slane %v5983_v48, 5 }
  0x86   :  { %971 = vmatpush.bf16.msra.mxu0 %v3677_v31 }
  0x87   :  { %999 = vmatpush.bf16.msra.mxu2 %v3681_v27 }
  0x88   :  { %1013 = vmatpush.bf16.msra.mxu3 %v3873_v36  ;;  %985 = vmatpush.bf16.msra.mxu1 %v3869_v41 }
  0x89   :  { %972 = vmatmul.bf16.vlgmr.msra.gmra.mxu0 %v5967_v54 }
  0x8a   :  { %1000 = vmatmul.bf16.vlgmr.msra.gmra.mxu2 %v5967_v54 }
  0x8b   :  { %1014 = vmatmul.bf16.vlgmr.msra.gmra.mxu3 %v5969_v57  ;;  %986 = vmatmul.bf16.vlgmr.msra.gmra.mxu1 %v5969_v57  ;;  %v363_v57 = vperm.slane %v5983_v48, 3 }
  0xc6   :  { %v861_v42 = vpop.f32.mrf.mxu0 }
  0xc7   :  { %v862_v58 = vadd.f32 %v861_v42, %v360_v51 }
  0xca   :  { %v875_v43 = vpop.f32.mrf.mxu1 }
  0xcb   :  { %v876_v0 = vadd.f32 %v875_v43, %v862_v58 }
  0xcd   :  { %v889_v44 = vpop.f32.mrf.mxu2  ;;  %v1020_v8 = vpack.c.bf16 %v876_v0, %v876_v0 }
  0xce   :  { %v903_v45 = vpop.f32.mrf.mxu3  ;;  %v863_v46 = vpop.f32.mrf.mxu0  ;;  %v890_v4 = vadd.f32 %v889_v44, %v361_v60 }
  0xcf   :  { %v864_v9 = vadd.f32 %v863_v46, %v360_v51 }
  0xd0   :  { %v904_v11 = vadd.f32 %v903_v45, %v890_v4 }
  0xd2   :  { %v877_v47 = vpop.f32.mrf.mxu1  ;;  %v1022_v17 = vpack.c.bf16 %v904_v11, %v904_v11 }
  0xd3   :  { %v878_v14 = vadd.f32 %v877_v47, %v864_v9 }
  0xd5   :  { %v891_v54 = vpop.f32.mrf.mxu2  ;;  %v1021_v20 = vpack.c.bf16 %v878_v14, %v878_v14 }
  0xd6   :  { %v905_v50 = vpop.f32.mrf.mxu3  ;;  %v892_v18 = vadd.f32 %v891_v54, %v361_v60 }
  0xd8   :  { %v906_v21 = vadd.f32 %v905_v50, %v892_v18 }
  0xda   :  { %v1023_v22 = vpack.c.bf16 %v906_v21, %v906_v21 }
  0xe6   :  { %v917_v52 = vpop.f32.mrf.mxu0 }
  0xe7   :  { %v918_v53 = vadd.f32 %v917_v52, %v362_v49 }
  0xea   :  { %v931_v55 = vpop.f32.mrf.mxu1 }
  0xeb   :  { %v932_v56 = vadd.f32 %v931_v55, %v918_v53 }
  0xed   :  { %v1024_v59 = vpack.c.bf16 %v932_v56, %v932_v56  ;;  %v945_v61 = vpop.f32.mrf.mxu2 }
  0xee   :  { %v946_v62 = vadd.f32 %v945_v61, %v363_v57  ;;  %v959_v63 = vpop.f32.mrf.mxu3  ;;  %v919_v1 = vpop.f32.mrf.mxu0 }
  0xef   :  { %1039 = vmatpush.bf16.xpose.msrb.mxu0 %v1024_v59  ;;  %v920_v3 = vadd.f32 %v919_v1, %v362_v49  ;;  %v157_v49 = vld [vmem:[#allocation5] sm:$0xff] }
  0xf0   :  { %v960_v2 = vadd.f32 %v959_v63, %v946_v62 }
  0xf2   :  { %v933_v5 = vpop.f32.mrf.mxu1  ;;  %v1026_v6 = vpack.c.bf16 %v960_v2, %v960_v2 }
  0xf3   :  { %v934_v7 = vadd.f32 %v933_v5, %v920_v3 }
  0xf4   :  { %1065 = vmatpush.bf16.xpose.msrb.mxu2 %v1026_v6 }
  0xf5   :  { %v1025_v10 = vpack.c.bf16 %v934_v7, %v934_v7  ;;  %v947_v12 = vpop.f32.mrf.mxu2 }
  0xf6   :  { %1040 = vmatmul.bf16.vlgmr.msrb.gmra.mxu0 %v1020_v8  ;;  %v948_v13 = vadd.f32 %v947_v12, %v363_v57  ;;  %v961_v15 = vpop.f32.mrf.mxu3 }
  0xf7   :  { %1052 = vmatpush.bf16.xpose.msrb.mxu1 %v1025_v10 }
  0xf8   :  { %v962_v16 = vadd.f32 %v961_v15, %v948_v13 }
  0xfa   :  { %v1027_v19 = vpack.c.bf16 %v962_v16, %v962_v16 }
  0xfb   :  { %1066 = vmatmul.bf16.vlgmr.msrb.gmra.mxu2 %v1022_v17 }
  0xfc   :  { %1078 = vmatpush.bf16.xpose.msrb.mxu3 %v1027_v19 }
  0xfe   :  { %1053 = vmatmul.bf16.vlgmr.msrb.gmra.mxu1 %v1021_v20 }
 0x103   :  { %1079 = vmatmul.bf16.vlgmr.msrb.gmra.mxu3 %v1023_v22 }
 0x106   :  { %v973_v25 = vpop.f32.mrf.mxu0 }
 0x107   :  { %v974_v28 = vadd.f32 %v973_v25, %v364_v24  ;;  %v5313_v25 = vld [vmem:[#allocation10 + $0x74] sm:$0xf] }
 0x108   :  { %v987_v32 = vpop.f32.mrf.mxu1 }
 0x109   :  { %v988_v33 = vadd.f32 %v987_v32, %v974_v28  ;;  %v4096_v28 = vld [vmem:[#allocation10 + $0x60] sm:$0xf]  ;;  %v4098_v32 = vld [vmem:[#allocation10 + $0x68] sm:$0xf0] }
 0x10b   :  { %v1028_v35 = vpack.c.bf16 %v988_v33, %v988_v33 }
 0x10d   :  { %v1001_v26 = vpop.f32.mrf.mxu2  ;;  %v1138_v40 = vsel %vm1136_vm0, %v1028_v35, 0  ;;  %v4088_v35 = vld [vmem:[#allocation10 + $0x50] sm:$0xf] }
 0x10e   :  { %v1002_v27 = vadd.f32 %v1001_v26, %v365_v23  ;;  %v1015_v29 = vpop.f32.mrf.mxu3  ;;  %v975_v37 = vpop.f32.mrf.mxu0  ;;  %1147 = vmatpush.bf16.msra.mxu0 %v1138_v40 }
 0x10f   :  { %v976_v39 = vadd.f32 %v975_v37, %v364_v24  ;;  %v5314_v24 = vld [vmem:[#allocation10 + $0x74] sm:$0xf0]  ;;  %v5309_v37 = vld [vmem:[#allocation10 + $0x54] sm:$0xf] }
 0x110   :  { %v1016_v30 = vadd.f32 %v1015_v29, %v1002_v27  ;;  %v989_v44 = vpop.f32.mrf.mxu1  ;;  %v4106_v27 = vld [vmem:[#allocation10 + $0x78] sm:$0xf0]  ;;  %v5312_v29 = vld [vmem:[#allocation10 + $0x64] sm:$0xf0] }
 0x111   :  { %v990_v45 = vadd.f32 %v989_v44, %v976_v39  ;;  %v4097_v33 = vor.u32 %v5312_v29, %v4096_v28  ;;  %v4168_v39 = vld [vmem:[#allocation10 + $0xf0] sm:$0xf]  ;;  %v4170_v44 = vld [vmem:[#allocation10 + $0xf8] sm:$0xf0]  ;;  %v5326_v29 = vld [vmem:[#allocation10 + $0xd4] sm:$0xf0] }
 0x112   :  { %v1030_v31 = vpack.c.bf16 %v1016_v30, %v1016_v30  ;;  %v4109_v30 = vor.u32 %v5313_v25, %v4106_v27  ;;  %v5301_v25 = vld [vmem:[#allocation10 + $0x14] sm:$0xf]  ;;  %v4152_v27 = vld [vmem:[#allocation10 + $0xd0] sm:$0xf] }
 0x113   :  { %v1029_v47 = vpack.c.bf16 %v990_v45, %v990_v45 }
 0x114   :  { %v1176_v34 = vsel %vm1136_vm0, %v1030_v31, 0  ;;  %v5311_v31 = vld [vmem:[#allocation10 + $0x64] sm:$0xf] }
 0x115   :  { %v1003_v36 = vpop.f32.mrf.mxu2  ;;  %1185 = vmatpush.bf16.msra.mxu2 %v1176_v34  ;;  %v1157_v48 = vsel %vm1136_vm0, %v1029_v47, 0  ;;  %v4101_v34 = vor.u32 %v5311_v31, %v4098_v32  ;;  %v4154_v31 = vld [vmem:[#allocation10 + $0xd8] sm:$0xf0]  ;;  %v4153_v32 = vor.u32 %v5326_v29, %v4152_v27  ;;  %v5362_v29 = vld [vmem:[#allocation13 + $0xf4] sm:$0xf0] }
 0x116   :  { %v1004_v38 = vadd.f32 %v1003_v36, %v365_v23  ;;  %v1017_v41 = vpop.f32.mrf.mxu3  ;;  %1166 = vmatpush.bf16.msra.mxu1 %v1157_v48  ;;  %v4104_v23 = vld [vmem:[#allocation10 + $0x70] sm:$0xf]  ;;  %v5310_v36 = vld [vmem:[#allocation10 + $0x54] sm:$0xf0]  ;;  %v4080_v48 = vld [vmem:[#allocation10 + $0x40] sm:$0xf] }
 0x117   :  { %v4105_v26 = vor.u32 %v5314_v24, %v4104_v23  ;;  %v5302_v23 = vld [vmem:[#allocation10 + $0x14] sm:$0xf0] }
 0x118   :  { %v1018_v42 = vadd.f32 %v1017_v41, %v1004_v38  ;;  %v4090_v38 = vld [vmem:[#allocation10 + $0x58] sm:$0xf0]  ;;  %v4089_v41 = vor.u32 %v5310_v36, %v4088_v35  ;;  %v5300_v35 = vld [vmem:[#allocation10 + $0x4] sm:$0xf0]  ;;  %v5299_v36 = vld [vmem:[#allocation10 + $0x4] sm:$0xf] }
 0x119   :  { %1379 = vmatpush.bf16.msrb.mxu0 %v4105_v26  ;;  %1407 = vmatpush.bf16.msrb.mxu2 %v4109_v30  ;;  %v4093_v47 = vor.u32 %v5309_v37, %v4090_v38  ;;  %v4058_v26 = vld [vmem:[#allocation10 + $0x18] sm:$0xf0]  ;;  %v5325_v30 = vld [vmem:[#allocation10 + $0xd4] sm:$0xf]  ;;  %v4050_v38 = vld [vmem:[#allocation10 + $0x8] sm:$0xf0] }
 0x11a   :  { %v1031_v43 = vpack.c.bf16 %v1018_v42, %v1018_v42  ;;  %v5330_v42 = vld [vmem:[#allocation10 + $0xf4] sm:$0xf0]  ;;  %v4061_v28 = vor.u32 %v5301_v25, %v4058_v26  ;;  %v4226_v26 = vld [vmem:[#allocation13 + $0x68] sm:$0xf0] }
 0x11c   :  { %v1195_v46 = vsel %vm1136_vm0, %v1031_v43, 0  ;;  %v5329_v43 = vld [vmem:[#allocation10 + $0xf4] sm:$0xf] }
 0x11d   :  { %1204 = vmatpush.bf16.msra.mxu3 %v1195_v46  ;;  %1380 = vmatpush.bf16.msrb.mxu0 %v4097_v33  ;;  %v4157_v33 = vor.u32 %v5325_v30, %v4154_v31  ;;  %v5361_v30 = vld [vmem:[#allocation13 + $0xf4] sm:$0xf] }
 0x11e   :  { %1408 = vmatpush.bf16.msrb.mxu2 %v4101_v34  ;;  %v4048_v34 = vld [vmem:[#allocation10] sm:$0xf] }
 0x11f   :  { %v4049_v37 = vor.u32 %v5300_v35, %v4048_v34  ;;  %v4216_v34 = vld [vmem:[#allocation13 + $0x50] sm:$0xf]  ;;  %v5342_v35 = vld [vmem:[#allocation13 + $0x54] sm:$0xf0] }
 0x121   :  { %1381 = vmatpush.bf16.msrb.mxu0 %v4089_v41  ;;  %v5324_v41 = vld [vmem:[#allocation10 + $0xc4] sm:$0xf0] }
 0x122   :  { %1409 = vmatpush.bf16.msrb.mxu2 %v4093_v47  ;;  %v5322_v47 = vld [vmem:[#allocation10 + $0xb4] sm:$0xf0] }
 0x173   :  { %v1041_v54 = vpop.f32.mrf.mxu0 }
 0x174   :  { %v1042_v50 = vadd.f32 %v1041_v54, %v157_v49  ;;  %v4169_v54 = vor.u32 %v5330_v42, %v4168_v39  ;;  %v4053_v39 = vor.u32 %v5299_v36, %v4050_v38  ;;  %v5323_v42 = vld [vmem:[#allocation10 + $0xc4] sm:$0xf]  ;;  %v5341_v36 = vld [vmem:[#allocation13 + $0x54] sm:$0xf] }
 0x175   :  { %v4218_v38 = vld [vmem:[#allocation13 + $0x58] sm:$0xf0] }
 0x176   :  { %v1085_v51 = vsel %vm1084_vm1, %v1042_v50, -inf  ;;  %1393 = vmatpush.bf16.msrb.mxu1 %v4169_v54  ;;  %v4138_v54 = vld [vmem:[#allocation10 + $0xb8] sm:$0xf0] }
 0x177   :  { %1086 = vmax.xlane.f32.xlu1 %v1085_v51  ;;  %v5307_v51 = vld [vmem:[#allocation10 + $0x44] sm:$0xf] }
 0x17b   :  { %v1043_v52 = vpop.f32.mrf.mxu0  ;;  %v1054_v53 = vpop.f32.mrf.mxu1 }
 0x17c   :  { %v1055_v55 = vadd.f32 %v1054_v53, %v157_v49  ;;  %v4082_v52 = vld [vmem:[#allocation10 + $0x48] sm:$0xf0] }
 0x17e   :  { %v1088_v56 = vsel %vm1084_vm1, %v1055_v55, -inf  ;;  %v1067_v57 = vpop.f32.mrf.mxu2 }
 0x17f   :  { %1089 = vmax.xlane.f32.xlu1 %v1088_v56  ;;  %v1068_v58 = vadd.f32 %v1067_v57, %v157_v49  ;;  %v4085_v57 = vor.u32 %v5307_v51, %v4082_v52  ;;  %v4128_v51 = vld [vmem:[#allocation10 + $0xa0] sm:$0xf]  ;;  %v5320_v52 = vld [vmem:[#allocation10 + $0xa4] sm:$0xf0] }
 0x181   :  { %v1091_v59 = vsel %vm1084_vm1, %v1068_v58, -inf  ;;  %1410 = vmatpush.bf16.msrb.mxu2 %v4085_v57 }
 0x182   :  { %1092 = vmax.xlane.f32.xlu0 %v1091_v59  ;;  %v5306_v59 = vld [vmem:[#allocation10 + $0x34] sm:$0xf0] }
 0x183   :  { %v1056_v60 = vpop.f32.mrf.mxu1 }
 0x184   :  { %v5305_v60 = vld [vmem:[#allocation10 + $0x34] sm:$0xf] }
 0x186   :  { %v1069_v61 = vpop.f32.mrf.mxu2  ;;  %v1080_v62 = vpop.f32.mrf.mxu3 }
 0x187   :  { %v1081_v63 = vadd.f32 %v1080_v62, %v157_v49  ;;  %v5308_v49 = vld [vmem:[#allocation10 + $0x44] sm:$0xf0]  ;;  %v4074_v61 = vld [vmem:[#allocation10 + $0x38] sm:$0xf0] }
 0x189   :  { %v1094_v0 = vsel %vm1084_vm1, %v1081_v63, -inf }
 0x18a   :  { %1095 = vmax.xlane.f32.xlu0 %v1094_v0 }
 0x18e   :  { %v1082_v1 = vpop.f32.mrf.mxu3 }
 0x18f   :  { %v4077_v1 = vor.u32 %v5305_v60, %v4074_v61  ;;  %v5317_v60 = vld [vmem:[#allocation10 + $0x94] sm:$0xf] }
 0x191   :  { %1411 = vmatpush.bf16.msrb.mxu2 %v4077_v1  ;;  %v5316_v1 = vld [vmem:[#allocation10 + $0x84] sm:$0xf0] }
 0x1ea   :  { %v1087_v2 = vpop.xlane.xlu1 %1086 }
 0x1eb   :  { %v1097_v3 = vsub.f32 %v1042_v50, %v1087_v2  ;;  %v4173_v50 = vor.u32 %v5329_v43, %v4170_v44  ;;  %v4146_v44 = vld [vmem:[#allocation10 + $0xc8] sm:$0xf0] }
 0x1ed   :  { %v1101_v4 = vmul.f32 1.442695, %v1097_v3  ;;  %1421 = vmatpush.bf16.msrb.mxu3 %v4173_v50 }
 0x1ef   :  { %5606 = vpow2.f32 %v1101_v4 }
 0x1f2   :  { %v1090_v5 = vpop.xlane.xlu1 %1089 }
 0x1f3   :  { %v1098_v6 = vsub.f32 %v1055_v55, %v1090_v5  ;;  %v4081_v55 = vor.u32 %v5308_v49, %v4080_v48  ;;  %v5321_v48 = vld [vmem:[#allocation10 + $0xb4] sm:$0xf] }
 0x1f4   :  { %v4141_v50 = vor.u32 %v5321_v48, %v4138_v54  ;;  %v5339_v48 = vld [vmem:[#allocation13 + $0x44] sm:$0xf]  ;;  %v4210_v54 = vld [vmem:[#allocation13 + $0x48] sm:$0xf0] }
 0x1f5   :  { %v5607_v7 = vpop.eup %5606  ;;  %v1103_v8 = vmul.f32 1.442695, %v1098_v6  ;;  %v1093_v9 = vpop.xlane.xlu0 %1092  ;;  %1382 = vmatpush.bf16.msrb.mxu0 %v4081_v55  ;;  %v4129_v55 = vor.u32 %v5320_v52, %v4128_v51  ;;  %v4280_v51 = vld [vmem:[#allocation13 + $0xd0] sm:$0xf]  ;;  %v5358_v52 = vld [vmem:[#allocation13 + $0xd4] sm:$0xf0] }
 0x1f6   :  { %v1109_v10 = vsel %vm1084_vm1, %v5607_v7, 0.0  ;;  %v1099_v11 = vsub.f32 %v1068_v58, %v1093_v9  ;;  %v4072_v58 = vld [vmem:[#allocation10 + $0x30] sm:$0xf] }
 0x1f7   :  { %5608 = vpow2.f32 %v1103_v8  ;;  %1110 = vadd.xlane.f32.xlu0 %v1109_v10  ;;  %v4064_v10 = vld [vmem:[#allocation10 + $0x20] sm:$0xf] }
 0x1f8   :  { %v1105_v12 = vmul.f32 1.442695, %v1099_v11  ;;  %v5304_v11 = vld [vmem:[#allocation10 + $0x24] sm:$0xf0] }
 0x1fa   :  { %5610 = vpow2.f32 %v1105_v12  ;;  %v5303_v12 = vld [vmem:[#allocation10 + $0x24] sm:$0xf] }
 0x1fd   :  { %v6000_v13 = vpop.eup %5608  ;;  %v1096_v14 = vpop.xlane.xlu0 %1095 }
 0x1fe   :  { %v1112_v15 = vsel %vm1084_vm1, %v6000_v13, 0.0  ;;  %v1100_v16 = vsub.f32 %v1081_v63, %v1096_v14  ;;  %v4073_v63 = vor.u32 %v5306_v59, %v4072_v58  ;;  %v4066_v14 = vld [vmem:[#allocation10 + $0x28] sm:$0xf0]  ;;  %v4120_v58 = vld [vmem:[#allocation10 + $0x90] sm:$0xf] }
 0x1ff   :  { %1113 = vadd.xlane.f32.xlu1 %v1112_v15  ;;  %v4069_v15 = vor.u32 %v5303_v12, %v4066_v14  ;;  %v5318_v59 = vld [vmem:[#allocation10 + $0x94] sm:$0xf0] }
 0x200   :  { %v6004_v17 = vpop.eup %5610  ;;  %v1107_v18 = vmul.f32 1.442695, %v1100_v16  ;;  %1383 = vmatpush.bf16.msrb.mxu0 %v4073_v63  ;;  %v4160_v16 = vld [vmem:[#allocation10 + $0xe0] sm:$0xf]  ;;  %v4121_v61 = vor.u32 %v5318_v59, %v4120_v58  ;;  %v4200_v58 = vld [vmem:[#allocation13 + $0x30] sm:$0xf] }
 0x201   :  { %v1115_v19 = vsel %vm1084_vm1, %v6004_v17, 0.0  ;;  %1412 = vmatpush.bf16.msrb.mxu2 %v4069_v15  ;;  %v5338_v59 = vld [vmem:[#allocation13 + $0x34] sm:$0xf0] }
 0x202   :  { %5612 = vpow2.f32 %v1107_v18  ;;  %1116 = vadd.xlane.f32.xlu2 %v1115_v19  ;;  %v5327_v18 = vld [vmem:[#allocation10 + $0xe4] sm:$0xf] }
 0x205   :  { %1413 = vmatpush.bf16.msrb.mxu2 %v4061_v28  ;;  %v4296_v28 = vld [vmem:[#allocation13 + $0xf0] sm:$0xf] }
 0x206   :  { %v4297_v31 = vor.u32 %v5362_v29, %v4296_v28  ;;  %v4258_v28 = vld [vmem:[#allocation13 + $0xa8] sm:$0xf0] }
 0x208   :  { %v6008_v20 = vpop.eup %5612 }
 0x209   :  { %v1118_v21 = vsel %vm1084_vm1, %v6008_v20, 0.0  ;;  %1414 = vmatpush.bf16.msrb.mxu2 %v4053_v39  ;;  %v4288_v39 = vld [vmem:[#allocation13 + $0xe0] sm:$0xf] }
 0x20a   :  { %1119 = vadd.xlane.f32.xlu2 %v1118_v21  ;;  %v4162_v21 = vld [vmem:[#allocation10 + $0xe8] sm:$0xf0] }
 0x20b   :  { %v4165_v24 = vor.u32 %v5327_v18, %v4162_v21  ;;  %v5345_v18 = vld [vmem:[#allocation13 + $0x74] sm:$0xf]  ;;  %v4234_v21 = vld [vmem:[#allocation13 + $0x78] sm:$0xf0] }
 0x20d   :  { %1422 = vmatpush.bf16.msrb.mxu3 %v4165_v24  ;;  %v5344_v24 = vld [vmem:[#allocation13 + $0x64] sm:$0xf0] }
 0x211   :  { %1423 = vmatpush.bf16.msrb.mxu3 %v4157_v33 }
 0x26a   :  { %v1111_v22 = vpop.xlane.xlu0 %1110 }
 0x26b   :  { %5614 = vrcp.f32 %v1111_v22  ;;  %v4056_v22 = vld [vmem:[#allocation10 + $0x10] sm:$0xf] }
 0x271   :  { %v5615_v40 = vpop.eup %5614 }
 0x272   :  { %v1125_v45 = vmul.f32 %v5615_v40, %v5607_v7  ;;  %v1114_v46 = vpop.xlane.xlu1 %1113  ;;  %v4144_v40 = vld [vmem:[#allocation10 + $0xc0] sm:$0xf] }
 0x273   :  { %5616 = vrcp.f32 %v1114_v46  ;;  %v4145_v43 = vor.u32 %v5324_v41, %v4144_v40  ;;  %v4136_v46 = vld [vmem:[#allocation10 + $0xb0] sm:$0xf]  ;;  %v4221_v41 = vor.u32 %v5341_v36, %v4218_v38  ;;  %v4248_v36 = vld [vmem:[#allocation13 + $0x90] sm:$0xf]  ;;  %v5349_v38 = vld [vmem:[#allocation13 + $0x94] sm:$0xf] }
 0x274   :  { %v1129_v53 = vpack.c.bf16 %v1125_v45, %v1125_v45  ;;  %v4149_v45 = vor.u32 %v5323_v42, %v4146_v44  ;;  %v4137_v49 = vor.u32 %v5322_v47, %v4136_v46  ;;  %v5360_v40 = vld [vmem:[#allocation13 + $0xe4] sm:$0xf0]  ;;  %v4290_v44 = vld [vmem:[#allocation13 + $0xe8] sm:$0xf0]  ;;  %v4208_v46 = vld [vmem:[#allocation13 + $0x40] sm:$0xf] }
 0x275   :  { %v1117_v56 = vpop.xlane.xlu2 %1116  ;;  %v4289_v42 = vor.u32 %v5360_v40, %v4288_v39  ;;  %v5340_v47 = vld [vmem:[#allocation13 + $0x44] sm:$0xf0]  ;;  %v4250_v40 = vld [vmem:[#allocation13 + $0x98] sm:$0xf0] }
 0x276   :  { %4042 = vmatmul.msk.bf16.vlgmr.msra.gmra.mxu0 %vm1084_vm1, %v1129_v53  ;;  %5618 = vrcp.f32 %v1117_v56  ;;  %1424 = vmatpush.bf16.msrb.mxu3 %v4149_v45  ;;  %v5319_v53 = vld [vmem:[#allocation10 + $0xa4] sm:$0xf]  ;;  %v4130_v56 = vld [vmem:[#allocation10 + $0xa8] sm:$0xf0] }
 0x277   :  { %v4133_v57 = vor.u32 %v5319_v53, %v4130_v56  ;;  %v5357_v53 = vld [vmem:[#allocation13 + $0xd4] sm:$0xf]  ;;  %v4282_v56 = vld [vmem:[#allocation13 + $0xd8] sm:$0xf0] }
 0x279   :  { %v5617_v62 = vpop.eup %5616 }
 0x27a   :  { %v1126_v0 = vmul.f32 %v5617_v62, %v6000_v13  ;;  %v4065_v13 = vor.u32 %v5304_v11, %v4064_v10  ;;  %1425 = vmatpush.bf16.msrb.mxu3 %v4141_v50  ;;  %v4122_v62 = vld [vmem:[#allocation10 + $0x98] sm:$0xf0]  ;;  %v4213_v50 = vor.u32 %v5339_v48, %v4210_v54  ;;  %v4360_v48 = vld [vmem:[#allocation14 + $0x70] sm:$0xf] }
 0x27b   :  { %v4125_v63 = vor.u32 %v5317_v60, %v4122_v62  ;;  %v5337_v60 = vld [vmem:[#allocation13 + $0x34] sm:$0xf]  ;;  %v4202_v62 = vld [vmem:[#allocation13 + $0x38] sm:$0xf0] }
 0x27c   :  { %v1130_v2 = vpack.c.bf16 %v1126_v0, %v1126_v0  ;;  %v5619_v3 = vpop.eup %5618  ;;  %1384 = vmatpush.bf16.msrb.mxu0 %v4065_v13  ;;  %v4112_v0 = vld [vmem:[#allocation10 + $0x80] sm:$0xf]  ;;  %v5377_v54 = vld [vmem:[#allocation14 + $0x74] sm:$0xf] }
 0x27d   :  { %v1127_v4 = vmul.f32 %v5619_v3, %v6004_v17  ;;  %v1120_v5 = vpop.xlane.xlu2 %1119  ;;  %v5328_v17 = vld [vmem:[#allocation10 + $0xe4] sm:$0xf0]  ;;  %v4113_v3 = vor.u32 %v5316_v1, %v4112_v0  ;;  %v5356_v1 = vld [vmem:[#allocation13 + $0xc4] sm:$0xf0] }
 0x27e   :  { %4043 = vmatmul.msk.bf16.vlgmr.msra.gmra.mxu1 %vm1084_vm1, %v1130_v2  ;;  %5620 = vrcp.f32 %v1120_v5  ;;  %v4161_v19 = vor.u32 %v5328_v17, %v4160_v16  ;;  %1426 = vmatpush.bf16.msrb.mxu3 %v4133_v57  ;;  %v5315_v2 = vld [vmem:[#allocation10 + $0x84] sm:$0xf]  ;;  %v4232_v16 = vld [vmem:[#allocation13 + $0x70] sm:$0xf]  ;;  %v5346_v17 = vld [vmem:[#allocation13 + $0x74] sm:$0xf0]  ;;  %v4285_v57 = vor.u32 %v5357_v53, %v4282_v56 }
 0x27f   :  { %v1131_v6 = vpack.c.bf16 %v1127_v4, %v1127_v4  ;;  %v4114_v4 = vld [vmem:[#allocation10 + $0x88] sm:$0xf0]  ;;  %v4272_v0 = vld [vmem:[#allocation13 + $0xc0] sm:$0xf]  ;;  %v5376_v53 = vld [vmem:[#allocation14 + $0x64] sm:$0xf0] }
 0x280   :  { %1394 = vmatpush.bf16.msrb.mxu1 %v4161_v19  ;;  %v4117_v5 = vor.u32 %v5315_v2, %v4114_v4  ;;  %v4233_v19 = vor.u32 %v5346_v17, %v4232_v16  ;;  %v5355_v2 = vld [vmem:[#allocation13 + $0xc4] sm:$0xf]  ;;  %v4274_v4 = vld [vmem:[#allocation13 + $0xc8] sm:$0xf0]  ;;  %v4266_v16 = vld [vmem:[#allocation13 + $0xb8] sm:$0xf0] }
 0x281   :  { %4044 = vmatmul.msk.bf16.vlgmr.msra.gmra.mxu2 %vm1084_vm1, %v1131_v6  ;;  %v5375_v56 = vld [vmem:[#allocation14 + $0x64] sm:$0xf] }
 0x282   :  { %1427 = vmatpush.bf16.msrb.mxu3 %v4125_v63  ;;  %v4205_v63 = vor.u32 %v5337_v60, %v4202_v62  ;;  %v5394_v60 = vld [vmem:[#allocation14 + $0xf4] sm:$0xf0]  ;;  %v4426_v62 = vld [vmem:[#allocation14 + $0xf8] sm:$0xf0] }
 0x284   :  { %v5621_v7 = vpop.eup %5620  ;;  %1395 = vmatpush.bf16.msrb.mxu1 %v4153_v32  ;;  %v4298_v32 = vld [vmem:[#allocation13 + $0xf8] sm:$0xf0] }
 0x285   :  { %v1128_v8 = vmul.f32 %v5621_v7, %v6008_v20  ;;  %v4057_v20 = vor.u32 %v5302_v23, %v4056_v22  ;;  %v4237_v22 = vor.u32 %v5345_v18, %v4234_v21  ;;  %v4224_v23 = vld [vmem:[#allocation13 + $0x60] sm:$0xf]  ;;  %v4301_v33 = vor.u32 %v5361_v30, %v4298_v32  ;;  %v4184_v18 = vld [vmem:[#allocation13 + $0x10] sm:$0xf]  ;;  %v5333_v21 = vld [vmem:[#allocation13 + $0x14] sm:$0xf] }
 0x286   :  { %1428 = vmatpush.bf16.msrb.mxu3 %v4117_v5  ;;  %v4225_v25 = vor.u32 %v5344_v24, %v4224_v23  ;;  %v4277_v5 = vor.u32 %v5355_v2, %v4274_v4  ;;  %v4186_v23 = vld [vmem:[#allocation13 + $0x18] sm:$0xf0]  ;;  %v4176_v30 = vld [vmem:[#allocation13] sm:$0xf]  ;;  %v5331_v32 = vld [vmem:[#allocation13 + $0x4] sm:$0xf] }
 0x287   :  { %v1132_v9 = vpack.c.bf16 %v1128_v8, %v1128_v8  ;;  %1385 = vmatpush.bf16.msrb.mxu0 %v4057_v20  ;;  %1634 = vmatpush.bf16.msra.mxu2 %v4237_v22  ;;  %v5343_v20 = vld [vmem:[#allocation13 + $0x64] sm:$0xf]  ;;  %v4189_v24 = vor.u32 %v5333_v21, %v4186_v23  ;;  %v4344_v2 = vld [vmem:[#allocation14 + $0x50] sm:$0xf]  ;;  %v6019_v4 = vld [vmem:[#allocation11] sm:$0xf] }
 0x288   :  { %1396 = vmatpush.bf16.msrb.mxu1 %v4145_v43  ;;  %v4229_v27 = vor.u32 %v5343_v20, %v4226_v26  ;;  %v5359_v43 = vld [vmem:[#allocation13 + $0xe4] sm:$0xf]  ;;  %v4256_v20 = vld [vmem:[#allocation13 + $0xa0] sm:$0xf] }
 0x289   :  { %4045 = vmatmul.msk.bf16.vlgmr.msra.gmra.mxu3 %vm1084_vm1, %v1132_v9  ;;  %v4293_v45 = vor.u32 %v5359_v43, %v4290_v44  ;;  %v5351_v26 = vld [vmem:[#allocation13 + $0xa4] sm:$0xf]  ;;  %v5348_v43 = vld [vmem:[#allocation13 + $0x84] sm:$0xf0] }
 0x28a   :  { %1648 = vmatpush.bf16.msra.mxu3 %v4301_v33  ;;  %v4261_v29 = vor.u32 %v5351_v26, %v4258_v28  ;;  %v5347_v44 = vld [vmem:[#allocation13 + $0x84] sm:$0xf] }
 0x28b   :  { %1386 = vmatpush.bf16.msrb.mxu0 %v4049_v37  ;;  %1635 = vmatpush.bf16.msra.mxu2 %v4229_v27  ;;  %v4217_v37 = vor.u32 %v5342_v35, %v4216_v34  ;;  %v4178_v34 = vld [vmem:[#allocation13 + $0x8] sm:$0xf0] }
 0x28c   :  { %1397 = vmatpush.bf16.msrb.mxu1 %v4137_v49  ;;  %v4209_v49 = vor.u32 %v5340_v47, %v4208_v46  ;;  %v4181_v35 = vor.u32 %v5331_v32, %v4178_v34  ;;  %v4242_v46 = vld [vmem:[#allocation13 + $0x88] sm:$0xf0] }
 0x28d   :  { %v4245_v47 = vor.u32 %v5347_v44, %v4242_v46  ;;  %v5640_v34 = vld [vmem:[#allocation2 + $0x8] sm:$0xff]  ;;  %v5372_v46 = vld [vmem:[#allocation14 + $0x44] sm:$0xf0] }
 0x28e   :  { %1649 = vmatpush.bf16.msra.mxu3 %v4293_v45 }
 0x28f   :  { %1606 = vmatpush.bf16.msra.mxu0 %v4233_v19  ;;  %1636 = vmatpush.bf16.msra.mxu2 %v4221_v41  ;;  %v5334_v19 = vld [vmem:[#allocation13 + $0x14] sm:$0xf0]  ;;  %v4253_v41 = vor.u32 %v5349_v38, %v4250_v40  ;;  %v5392_v40 = vld [vmem:[#allocation14 + $0xe4] sm:$0xf0] }
 0x290   :  { %1398 = vmatpush.bf16.msrb.mxu1 %v4129_v55  ;;  %v4281_v55 = vor.u32 %v5358_v52, %v4280_v51  ;;  %v4185_v22 = vor.u32 %v5334_v19, %v4184_v18  ;;  %v4362_v51 = vld [vmem:[#allocation14 + $0x78] sm:$0xf0]  ;;  %v4352_v52 = vld [vmem:[#allocation14 + $0x60] sm:$0xf] }
 0x292   :  { %1650 = vmatpush.bf16.msra.mxu3 %v4285_v57  ;;  %v4354_v57 = vld [vmem:[#allocation14 + $0x68] sm:$0xf0] }
 0x293   :  { %1607 = vmatpush.bf16.msra.mxu0 %v4225_v25  ;;  %1637 = vmatpush.bf16.msra.mxu2 %v4213_v50  ;;  %v5352_v25 = vld [vmem:[#allocation13 + $0xa4] sm:$0xf0] }
 0x294   :  { %1399 = vmatpush.bf16.msrb.mxu1 %v4121_v61  ;;  %v4201_v61 = vor.u32 %v5338_v59, %v4200_v58  ;;  %v4257_v27 = vor.u32 %v5352_v25, %v4256_v20  ;;  %v4424_v58 = vld [vmem:[#allocation14 + $0xf0] sm:$0xf]  ;;  %v4353_v59 = vor.u32 %v5376_v53, %v4352_v52  ;;  %v5638_v25 = vld [vmem:[#allocation2] sm:$0xff]  ;;  %v5389_v53 = vld [vmem:[#allocation14 + $0xd4] sm:$0xf] }
 0x296   :  { %1651 = vmatpush.bf16.msra.mxu3 %v4277_v5 }
 0x297   :  { %1608 = vmatpush.bf16.msra.mxu0 %v4217_v37  ;;  %1638 = vmatpush.bf16.msra.mxu2 %v4205_v63  ;;  %v5350_v37 = vld [vmem:[#allocation13 + $0x94] sm:$0xf0]  ;;  %v4357_v63 = vor.u32 %v5375_v56, %v4354_v57  ;;  %v4328_v57 = vld [vmem:[#allocation14 + $0x30] sm:$0xf] }
 0x298   :  { %1400 = vmatpush.bf16.msrb.mxu1 %v4113_v3  ;;  %v4273_v3 = vor.u32 %v5356_v1, %v4272_v0  ;;  %v4249_v39 = vor.u32 %v5350_v37, %v4248_v36  ;;  %v4425_v0 = vor.u32 %v5394_v60, %v4424_v58  ;;  %v5641_v36 = vld [vmem:[#allocation2 + $0x18] sm:$0xff]  ;;  %v5370_v58 = vld [vmem:[#allocation14 + $0x34] sm:$0xf0] }
 0x299   :  { %v4329_v60 = vor.u32 %v5370_v58, %v4328_v57  ;;  %v4577_v57 = vld [vmem:[#allocation7 + $0x420] sm:$0xf]  ;;  %v5434_v58 = vld [vmem:[#allocation7 + $0x434] sm:$0xf0] }
 0x29b   :  { %1609 = vmatpush.bf16.msra.mxu0 %v4209_v49  ;;  %v5378_v49 = vld [vmem:[#allocation14 + $0x74] sm:$0xf0] }
 0x29c   :  { %1620 = vmatpush.bf16.msra.mxu1 %v4297_v31  ;;  %v5332_v31 = vld [vmem:[#allocation13 + $0x4] sm:$0xf0]  ;;  %v4361_v50 = vor.u32 %v5378_v49, %v4360_v48  ;;  %v4338_v49 = vld [vmem:[#allocation14 + $0x48] sm:$0xf0] }
 0x29d   :  { %v4177_v33 = vor.u32 %v5332_v31, %v4176_v30 }
 0x29f   :  { %1610 = vmatpush.bf16.msra.mxu0 %v4201_v61  ;;  %v5393_v61 = vld [vmem:[#allocation14 + $0xf4] sm:$0xf] }
 0x2a0   :  { %1621 = vmatpush.bf16.msra.mxu1 %v4289_v42  ;;  %v4240_v42 = vld [vmem:[#allocation13 + $0x80] sm:$0xf]  ;;  %v4429_v1 = vor.u32 %v5393_v61, %v4426_v62  ;;  %v4330_v61 = vld [vmem:[#allocation14 + $0x38] sm:$0xf0] }
 0x2a1   :  { %v4241_v45 = vor.u32 %v5348_v43, %v4240_v42  ;;  %v4418_v43 = vld [vmem:[#allocation14 + $0xe8] sm:$0xf0] }
 0x2a4   :  { %1622 = vmatpush.bf16.msra.mxu1 %v4281_v55  ;;  %v4365_v55 = vor.u32 %v5377_v54, %v4362_v51  ;;  %v4408_v54 = vld [vmem:[#allocation14 + $0xd0] sm:$0xf] }
 0x2a8   :  { %1623 = vmatpush.bf16.msra.mxu1 %v4273_v3  ;;  %v5374_v3 = vld [vmem:[#allocation14 + $0x54] sm:$0xf0] }
 0x2f3   :  { %v1149_v6 = vpop.f32.mrf.mxu0 }
 0x2fb   :  { %v1151_v7 = vpop.f32.mrf.mxu0  ;;  %v1168_v8 = vpop.f32.mrf.mxu1 }
 0x2fc   :  { %v1210_v9 = vpack.c.bf16 %v1168_v8, %v1149_v6  ;;  %v4192_v6 = vld [vmem:[#allocation13 + $0x20] sm:$0xf]  ;;  %v5336_v7 = vld [vmem:[#allocation13 + $0x24] sm:$0xf0]  ;;  %v5335_v8 = vld [vmem:[#allocation13 + $0x24] sm:$0xf] }
 0x2fe   :  { %1387 = vmatmul.bf16.vlgmr.msrb.gmra.mxu0 %v1210_v9  ;;  %1415 = vmatmul.bf16.vlgmr.msrb.gmra.mxu2 %v1210_v9  ;;  %v4193_v9 = vor.u32 %v5336_v7, %v4192_v6  ;;  %v5373_v6 = vld [vmem:[#allocation14 + $0x54] sm:$0xf]  ;;  %v4346_v7 = vld [vmem:[#allocation14 + $0x58] sm:$0xf0] }
 0x300   :  { %1611 = vmatpush.bf16.msra.mxu0 %v4193_v9  ;;  %v1213_v9 = vperm.slane %v6019_v4, 0 }
 0x303   :  { %v1170_v10 = vpop.f32.mrf.mxu1 }
 0x304   :  { %v1187_v11 = vpop.f32.mrf.mxu2  ;;  %v4194_v10 = vld [vmem:[#allocation13 + $0x28] sm:$0xf0]  ;;  %1612 = vmatpush.bf16.msra.mxu0 %v4185_v22 }
 0x308   :  { %1613 = vmatpush.bf16.msra.mxu0 %v4177_v33 }
 0x30c   :  { %v1189_v12 = vpop.f32.mrf.mxu2  ;;  %v1206_v13 = vpop.f32.mrf.mxu3  ;;  %1834 = vmatpush.bf16.msrb.mxu0 %v4361_v50  ;;  %v5390_v50 = vld [vmem:[#allocation14 + $0xd4] sm:$0xf0] }
 0x30d   :  { %v1211_v14 = vpack.c.bf16 %v1206_v13, %v1187_v11  ;;  %v4197_v11 = vor.u32 %v5335_v8, %v4194_v10  ;;  %v4264_v12 = vld [vmem:[#allocation13 + $0xb0] sm:$0xf]  ;;  %v5354_v13 = vld [vmem:[#allocation13 + $0xb4] sm:$0xf0]  ;;  %v4345_v8 = vor.u32 %v5374_v3, %v4344_v2  ;;  %v4349_v10 = vor.u32 %v5373_v6, %v4346_v7  ;;  %v5387_v2 = vld [vmem:[#allocation14 + $0xc4] sm:$0xf] }
 0x30e   :  { %v4409_v52 = vor.u32 %v5390_v50, %v4408_v54  ;;  %v4402_v3 = vld [vmem:[#allocation14 + $0xc8] sm:$0xf0]  ;;  %v4320_v6 = vld [vmem:[#allocation14 + $0x20] sm:$0xf]  ;;  %v5368_v7 = vld [vmem:[#allocation14 + $0x24] sm:$0xf0] }
 0x30f   :  { %1401 = vmatmul.bf16.vlgmr.msrb.gmra.mxu1 %v1211_v14  ;;  %1429 = vmatmul.bf16.vlgmr.msrb.gmra.mxu3 %v1211_v14  ;;  %v5353_v14 = vld [vmem:[#allocation13 + $0xb4] sm:$0xf]  ;;  %v4370_v54 = vld [vmem:[#allocation14 + $0x88] sm:$0xf0] }
 0x310   :  { %1639 = vmatpush.bf16.msra.mxu2 %v4197_v11  ;;  %v4269_v17 = vor.u32 %v5353_v14, %v4266_v16  ;;  %1835 = vmatpush.bf16.msrb.mxu0 %v4353_v59  ;;  %v1214_v14 = vperm.slane %v6019_v4, 2  ;;  %v5369_v59 = vld [vmem:[#allocation14 + $0x34] sm:$0xf] }
 0x311   :  { %v4333_v62 = vor.u32 %v5369_v59, %v4330_v61  ;;  %v4579_v61 = vld [vmem:[#allocation7 + $0x438] sm:$0xf0] }
 0x312   :  { %1652 = vmatpush.bf16.msra.mxu3 %v4269_v17  ;;  %v1218_v18 = vperm.slane %v1214_v14, 0  ;;  %v5385_v14 = vld [vmem:[#allocation14 + $0xb4] sm:$0xf] }
 0x314   :  { %v1208_v15 = vpop.f32.mrf.mxu3  ;;  %1640 = vmatpush.bf16.msra.mxu2 %v4189_v24  ;;  %1836 = vmatpush.bf16.msrb.mxu0 %v4345_v8  ;;  %v5367_v8 = vld [vmem:[#allocation14 + $0x24] sm:$0xf] }
 0x315   :  { %v4265_v15 = vor.u32 %v5354_v13, %v4264_v12  ;;  %v1217_v13 = vperm.slane %v1213_v9, 0  ;;  %v4321_v9 = vor.u32 %v5368_v7, %v4320_v6  ;;  %v4553_v7 = vld [vmem:[#allocation7 + $0x3f0] sm:$0xf] }
 0x316   :  { %1653 = vmatpush.bf16.msra.mxu3 %v4261_v29 }
 0x317   :  { %1624 = vmatpush.bf16.msra.mxu1 %v4265_v15 }
 0x318   :  { %1641 = vmatpush.bf16.msra.mxu2 %v4181_v35 }
 0x31a   :  { %1654 = vmatpush.bf16.msra.mxu3 %v4253_v41  ;;  %v5391_v41 = vld [vmem:[#allocation14 + $0xe4] sm:$0xf] }
 0x31b   :  { %1625 = vmatpush.bf16.msra.mxu1 %v4257_v27  ;;  %v5639_v27 = vld [vmem:[#allocation2 + $0x10] sm:$0xff]  ;;  %v4421_v44 = vor.u32 %v5391_v41, %v4418_v43 }
 0x31c   :  { %1862 = vmatpush.bf16.msrb.mxu2 %v4365_v55  ;;  %v4410_v55 = vld [vmem:[#allocation14 + $0xd8] sm:$0xf0]  ;;  %v5382_v41 = vld [vmem:[#allocation14 + $0x94] sm:$0xf0] }
 0x31d   :  { %v4413_v56 = vor.u32 %v5389_v53, %v4410_v55  ;;  %v5437_v53 = vld [vmem:[#allocation7 + $0x454] sm:$0xf] }
 0x31e   :  { %1655 = vmatpush.bf16.msra.mxu3 %v4245_v47  ;;  %v5371_v47 = vld [vmem:[#allocation14 + $0x44] sm:$0xf] }
 0x31f   :  { %1626 = vmatpush.bf16.msra.mxu1 %v4249_v39  ;;  %v4416_v39 = vld [vmem:[#allocation14 + $0xe0] sm:$0xf]  ;;  %v4341_v51 = vor.u32 %v5371_v47, %v4338_v49  ;;  %v5380_v47 = vld [vmem:[#allocation14 + $0x84] sm:$0xf0] }
 0x320   :  { %1863 = vmatpush.bf16.msrb.mxu2 %v4357_v63  ;;  %v4417_v42 = vor.u32 %v5392_v40, %v4416_v39  ;;  %v4400_v63 = vld [vmem:[#allocation14 + $0xc0] sm:$0xf]  ;;  %v4376_v40 = vld [vmem:[#allocation14 + $0x90] sm:$0xf] }
 0x321   :  { %v4377_v43 = vor.u32 %v5382_v41, %v4376_v40  ;;  %v5470_v40 = vld [vmem:[#allocation7 + $0x554] sm:$0xf0]  ;;  %v5467_v41 = vld [vmem:[#allocation7 + $0x544] sm:$0xf] }
 0x322   :  { %1876 = vmatpush.bf16.msrb.mxu3 %v4429_v1 }
 0x323   :  { %1627 = vmatpush.bf16.msra.mxu1 %v4241_v45  ;;  %v4336_v45 = vld [vmem:[#allocation14 + $0x40] sm:$0xf] }
 0x324   :  { %1864 = vmatpush.bf16.msrb.mxu2 %v4349_v10  ;;  %v4337_v48 = vor.u32 %v5372_v46, %v4336_v45  ;;  %v4322_v10 = vld [vmem:[#allocation14 + $0x28] sm:$0xf0]  ;;  %v4368_v46 = vld [vmem:[#allocation14 + $0x80] sm:$0xf] }
 0x325   :  { %v4369_v49 = vor.u32 %v5380_v47, %v4368_v46  ;;  %v5413_v46 = vld [vmem:[#allocation7 + $0x394] sm:$0xf]  ;;  %v4507_v47 = vld [vmem:[#allocation7 + $0x3a8] sm:$0xf0] }
 0x326   :  { %1877 = vmatpush.bf16.msrb.mxu3 %v4421_v44  ;;  %1837 = vmatpush.bf16.msrb.mxu0 %v4337_v48  ;;  %v4378_v44 = vld [vmem:[#allocation14 + $0x98] sm:$0xf0]  ;;  %v5379_v48 = vld [vmem:[#allocation14 + $0x84] sm:$0xf] }
 0x327   :  { %1848 = vmatpush.bf16.msrb.mxu1 %v4425_v0  ;;  %v5388_v0 = vld [vmem:[#allocation14 + $0xc4] sm:$0xf0]  ;;  %v4373_v50 = vor.u32 %v5379_v48, %v4370_v54  ;;  %v4697_v54 = vld [vmem:[#allocation7 + $0x510] sm:$0xf] }
 0x328   :  { %1865 = vmatpush.bf16.msrb.mxu2 %v4341_v51  ;;  %v4401_v1 = vor.u32 %v5388_v0, %v4400_v63  ;;  %v4601_v51 = vld [vmem:[#allocation7 + $0x450] sm:$0xf]  ;;  %v4578_v63 = vor.u32 %v5434_v58, %v4577_v57  ;;  %v5488_v0 = vld [vmem:[#allocation7 + $0x5e4] sm:$0xf0]  ;;  %v4510_v57 = vor.u32 %v5413_v46, %v4507_v47  ;;  %v4481_v58 = vld [vmem:[#allocation7 + $0x360] sm:$0xf] }
 0x329   :  { %v5449_v46 = vld [vmem:[#allocation7 + $0x4b4] sm:$0xf]  ;;  %v4651_v47 = vld [vmem:[#allocation7 + $0x4c8] sm:$0xf0] }
 0x32a   :  { %1878 = vmatpush.bf16.msrb.mxu3 %v4413_v56  ;;  %1838 = vmatpush.bf16.msrb.mxu0 %v4329_v60  ;;  %v4603_v56 = vld [vmem:[#allocation7 + $0x468] sm:$0xf0]  ;;  %v5431_v60 = vld [vmem:[#allocation7 + $0x424] sm:$0xf] }
 0x32b   :  { %1849 = vmatpush.bf16.msrb.mxu1 %v4417_v42  ;;  %v5381_v42 = vld [vmem:[#allocation14 + $0x94] sm:$0xf]  ;;  %v4606_v59 = vor.u32 %v5437_v53, %v4603_v56  ;;  %v4699_v56 = vld [vmem:[#allocation7 + $0x528] sm:$0xf0] }
 0x32c   :  { %1866 = vmatpush.bf16.msrb.mxu2 %v4333_v62  ;;  %v4381_v45 = vor.u32 %v5381_v42, %v4378_v44  ;;  %v4793_v62 = vld [vmem:[#allocation7 + $0x5d0] sm:$0xf]  ;;  %v4723_v42 = vld [vmem:[#allocation7 + $0x558] sm:$0xf0]  ;;  %v5464_v53 = vld [vmem:[#allocation7 + $0x524] sm:$0xf0] }
 0x32d   :  { %v4505_v44 = vld [vmem:[#allocation7 + $0x390] sm:$0xf] }
 0x32e   :  { %1839 = vmatpush.bf16.msrb.mxu0 %v4321_v9  ;;  %v5425_v9 = vld [vmem:[#allocation7 + $0x3f4] sm:$0xf] }
 0x32f   :  { %1850 = vmatpush.bf16.msrb.mxu1 %v4409_v52  ;;  %v5440_v52 = vld [vmem:[#allocation7 + $0x464] sm:$0xf0] }
 0x330   :  { %v4602_v55 = vor.u32 %v5440_v52, %v4601_v51 }
 0x333   :  { %1851 = vmatpush.bf16.msrb.mxu1 %v4401_v1  ;;  %v5485_v1 = vld [vmem:[#allocation7 + $0x5d4] sm:$0xf] }
 0x37b   :  { %v1388_v5 = vpop.f32.mrf.mxu0 }
 0x37c   :  { %v1389_v16 = vadd.f32 %v1388_v5, %v1217_v13  ;;  %v4405_v5 = vor.u32 %v5387_v2, %v4402_v3  ;;  %v4795_v2 = vld [vmem:[#allocation7 + $0x5e8] sm:$0xf0]  ;;  %v4582_v3 = vor.u32 %v5431_v60, %v4579_v61 }
 0x37d   :  { %v4798_v6 = vor.u32 %v5485_v1, %v4795_v2  ;;  %v4698_v2 = vor.u32 %v5464_v53, %v4697_v54  ;;  %v4625_v54 = vld [vmem:[#allocation7 + $0x480] sm:$0xf]  ;;  %v4801_v53 = vld [vmem:[#allocation7 + $0x5d8] sm:$0xf] }
 0x37e   :  { %1879 = vmatpush.bf16.msrb.mxu3 %v4405_v5  ;;  %v4794_v5 = vor.u32 %v5488_v0, %v4793_v62  ;;  %v5407_v62 = vld [vmem:[#allocation7 + $0x364] sm:$0xf] }
 0x381   :  { %v1416_v11 = vpop.f32.mrf.mxu2 }
 0x382   :  { %v1417_v20 = vadd.f32 %v1416_v11, %v1218_v18  ;;  %v4325_v11 = vor.u32 %v5367_v8, %v4322_v10  ;;  %v5428_v8 = vld [vmem:[#allocation7 + $0x404] sm:$0xf0] }
 0x383   :  { %v1390_v15 = vpop.f32.mrf.mxu0 }
 0x384   :  { %v1391_v19 = vadd.f32 %v1390_v15, %v1217_v13  ;;  %v5386_v13 = vld [vmem:[#allocation14 + $0xb4] sm:$0xf0]  ;;  %1867 = vmatpush.bf16.msrb.mxu2 %v4325_v11 }
 0x385   :  { %v4555_v11 = vld [vmem:[#allocation7 + $0x408] sm:$0xf0] }
 0x389   :  { %v1418_v24 = vpop.f32.mrf.mxu2 }
 0x38a   :  { %v1419_v29 = vadd.f32 %v1418_v24, %v1218_v18  ;;  %v4312_v18 = vld [vmem:[#allocation14 + $0x10] sm:$0xf] }
 0x38c   :  { %v1402_v12 = vpop.f32.mrf.mxu1 }
 0x38d   :  { %v1403_v21 = vadd.f32 %v1402_v12, %v1389_v16  ;;  %v4392_v12 = vld [vmem:[#allocation14 + $0xb0] sm:$0xf]  ;;  %v4394_v16 = vld [vmem:[#allocation14 + $0xb8] sm:$0xf0] }
 0x38e   :  { %v4393_v15 = vor.u32 %v5386_v13, %v4392_v12  ;;  %v4769_v12 = vld [vmem:[#allocation7 + $0x5a0] sm:$0xf]  ;;  %v5482_v13 = vld [vmem:[#allocation7 + $0x5b4] sm:$0xf0] }
 0x38f   :  { %v6023_v26 = vadd.f32 %v5638_v25, %v1403_v21  ;;  %v5365_v21 = vld [vmem:[#allocation14 + $0x14] sm:$0xf]  ;;  %v5384_v25 = vld [vmem:[#allocation14 + $0xa4] sm:$0xf0] }
 0x390   :  { %1852 = vmatpush.bf16.msrb.mxu1 %v4393_v15  ;;  %v5479_v15 = vld [vmem:[#allocation7 + $0x5a4] sm:$0xf] }
 0x392   :  { %v1430_v17 = vpop.f32.mrf.mxu3 }
 0x393   :  { %v1431_v30 = vadd.f32 %v1430_v17, %v1417_v20  ;;  %v4397_v17 = vor.u32 %v5385_v14, %v4394_v16  ;;  %v4384_v20 = vld [vmem:[#allocation14 + $0xa0] sm:$0xf]  ;;  %v4770_v14 = vor.u32 %v5482_v13, %v4769_v12  ;;  %v4771_v16 = vld [vmem:[#allocation7 + $0x5b8] sm:$0xf0]  ;;  %v4459_v12 = vld [vmem:[#allocation7 + $0x348] sm:$0xf0] }
 0x394   :  { %v1404_v22 = vpop.f32.mrf.mxu1  ;;  %v4673_v13 = vld [vmem:[#allocation7 + $0x4e0] sm:$0xf] }
 0x395   :  { %v1405_v23 = vadd.f32 %v1404_v22, %v1391_v19  ;;  %v6029_v35 = vadd.f32 %v5640_v34, %v1431_v30  ;;  %v5366_v19 = vld [vmem:[#allocation14 + $0x14] sm:$0xf0]  ;;  %1880 = vmatpush.bf16.msrb.mxu3 %v4397_v17  ;;  %v4386_v30 = vld [vmem:[#allocation14 + $0xa8] sm:$0xf0]  ;;  %v5363_v34 = vld [vmem:[#allocation14 + $0x4] sm:$0xf] }
 0x396   :  { %v4313_v22 = vor.u32 %v5366_v19, %v4312_v18  ;;  %v6038_v17 = vld [vmem:[%s6142_s7] sm:$0x3]  ;;  %v4554_v18 = vor.u32 %v5428_v8, %v4553_v7  ;;  %v4774_v19 = vor.u32 %v5479_v15, %v4771_v16  ;;  %v4457_v7 = vld [vmem:[#allocation7 + $0x330] sm:$0xf]  ;;  %v5404_v8 = vld [vmem:[#allocation7 + $0x344] sm:$0xf0] }
 0x397   :  { %v6025_v28 = vadd.f32 %v5639_v27, %v1405_v23  ;;  %v4314_v23 = vld [vmem:[#allocation14 + $0x18] sm:$0xf0]  ;;  %v5383_v27 = vld [vmem:[#allocation14 + $0xa4] sm:$0xf]  ;;  %v1443_v0 = vperm.slane %v6038_v17, 1 }
 0x398   :  { %v4317_v24 = vor.u32 %v5365_v21, %v4314_v23  ;;  %1840 = vmatpush.bf16.msrb.mxu0 %v4313_v22  ;;  %v4529_v21 = vld [vmem:[#allocation7 + $0x3c0] sm:$0xf]  ;;  %v5422_v22 = vld [vmem:[#allocation7 + $0x3d4] sm:$0xf0]  ;;  %v4558_v23 = vor.u32 %v5425_v9, %v4555_v11  ;;  %v5401_v9 = vld [vmem:[#allocation7 + $0x334] sm:$0xf] }
 0x399   :  { %v1439_v31 = vpack.c.bf16 %v6025_v28, %v6023_v26  ;;  %v5455_v16 = vld [vmem:[#allocation7 + $0x4e4] sm:$0xf] }
 0x39a   :  { %v1432_v32 = vpop.f32.mrf.mxu3  ;;  %1868 = vmatpush.bf16.msrb.mxu2 %v4317_v24  ;;  %v4745_v24 = vld [vmem:[#allocation7 + $0x570] sm:$0xf] }
 0x39b   :  { %v1433_v33 = vadd.f32 %v1432_v32, %v1419_v29  ;;  %1614 = vmatmul.bf16.vlgmr.msra.gmra.mxu0 %v1439_v31  ;;  %1642 = vmatmul.bf16.vlgmr.msra.gmra.mxu2 %v1439_v31  ;;  %v4385_v29 = vor.u32 %v5384_v25, %v4384_v20  ;;  %v4389_v31 = vor.u32 %v5383_v27, %v4386_v30  ;;  %v4304_v32 = vld [vmem:[#allocation14] sm:$0xf]  ;;  %v5476_v20 = vld [vmem:[#allocation7 + $0x584] sm:$0xf0]  ;;  %v5419_v27 = vld [vmem:[#allocation7 + $0x3c4] sm:$0xf] }
 0x39c   :  { %v5473_v25 = vld [vmem:[#allocation7 + $0x574] sm:$0xf]  ;;  %v4747_v30 = vld [vmem:[#allocation7 + $0x588] sm:$0xf0] }
 0x39d   :  { %v6031_v37 = vadd.f32 %v5641_v36, %v1433_v33  ;;  %v5364_v33 = vld [vmem:[#allocation14 + $0x4] sm:$0xf0]  ;;  %1853 = vmatpush.bf16.msrb.mxu1 %v4385_v29  ;;  %1881 = vmatpush.bf16.msrb.mxu3 %v4389_v31  ;;  %v1442_v31 = vperm.slane %v6038_v17, 0 }
 0x39e   :  { %v4305_v36 = vor.u32 %v5364_v33, %v4304_v32  ;;  %v4531_v29 = vld [vmem:[#allocation7 + $0x3d8] sm:$0xf0]  ;;  %v4746_v32 = vor.u32 %v5476_v20, %v4745_v24  ;;  %v4750_v33 = vor.u32 %v5473_v25, %v4747_v30  ;;  %v4433_v20 = vld [vmem:[#allocation7 + $0x300] sm:$0xf] }
 0x39f   :  { %v1440_v38 = vpack.c.bf16 %v6031_v37, %v6029_v35  ;;  %v4675_v17 = vld [vmem:[#allocation7 + $0x4f8] sm:$0xf0] }
 0x3a0   :  { %1841 = vmatpush.bf16.msrb.mxu0 %v4305_v36  ;;  %v4678_v30 = vor.u32 %v5455_v16, %v4675_v17  ;;  %v4777_v16 = vld [vmem:[#allocation7 + $0x5a8] sm:$0xf]  ;;  %v5483_v17 = vld [vmem:[#allocation7 + $0x5bc] sm:$0xf0] }
 0x3a1   :  { %1628 = vmatmul.bf16.vlgmr.msra.gmra.mxu1 %v1440_v38  ;;  %1656 = vmatmul.bf16.vlgmr.msra.gmra.mxu3 %v1440_v38  ;;  %v4306_v38 = vld [vmem:[#allocation14 + $0x8] sm:$0xf0] }
 0x3a2   :  { %v4309_v39 = vor.u32 %v5363_v34, %v4306_v38  ;;  %1854 = vmatpush.bf16.msrb.mxu1 %v4377_v43  ;;  %1882 = vmatpush.bf16.msrb.mxu3 %v4381_v45  ;;  %v4721_v34 = vld [vmem:[#allocation7 + $0x540] sm:$0xf]  ;;  %v4534_v43 = vor.u32 %v5419_v27, %v4531_v29  ;;  %v5416_v45 = vld [vmem:[#allocation7 + $0x3a4] sm:$0xf0] }
 0x3a3   :  { %v4722_v48 = vor.u32 %v5470_v40, %v4721_v34  ;;  %v4506_v52 = vor.u32 %v5416_v45, %v4505_v44  ;;  %v4609_v40 = vld [vmem:[#allocation7 + $0x458] sm:$0xf]  ;;  %v4611_v44 = vld [vmem:[#allocation7 + $0x470] sm:$0xf0] }
 0x3a4   :  { %1869 = vmatpush.bf16.msrb.mxu2 %v4309_v39  ;;  %2591 = vmatpush.bf16.msra.mxu0 %v4602_v55  ;;  %v4530_v39 = vor.u32 %v5422_v22, %v4529_v21  ;;  %v5461_v55 = vld [vmem:[#allocation7 + $0x514] sm:$0xf]  ;;  %v4458_v22 = vor.u32 %v5404_v8, %v4457_v7 }
 0x3a6   :  { %1855 = vmatpush.bf16.msrb.mxu1 %v4369_v49  ;;  %1883 = vmatpush.bf16.msrb.mxu3 %v4373_v50  ;;  %v4726_v49 = vor.u32 %v5467_v41, %v4723_v42  ;;  %v5441_v41 = vld [vmem:[#allocation7 + $0x46c] sm:$0xf0]  ;;  %v5438_v42 = vld [vmem:[#allocation7 + $0x45c] sm:$0xf] }
 0x3a8   :  { %2619 = vmatpush.bf16.msra.mxu2 %v4606_v59  ;;  %2592 = vmatpush.bf16.msra.mxu0 %v4578_v63  ;;  %v5410_v59 = vld [vmem:[#allocation7 + $0x374] sm:$0xf0]  ;;  %v4483_v63 = vld [vmem:[#allocation7 + $0x378] sm:$0xf0] }
 0x3a9   :  { %v4486_v11 = vor.u32 %v5407_v62, %v4483_v63  ;;  %v4587_v62 = vld [vmem:[#allocation7 + $0x440] sm:$0xf0] }
 0x3aa   :  { %2605 = vmatpush.bf16.msra.mxu1 %v4794_v5  ;;  %2633 = vmatpush.bf16.msra.mxu3 %v4798_v6  ;;  %v4482_v6 = vor.u32 %v5410_v59, %v4481_v58  ;;  %v4654_v58 = vor.u32 %v5449_v46, %v4651_v47  ;;  %v4585_v59 = vld [vmem:[#allocation7 + $0x428] sm:$0xf]  ;;  %v5468_v46 = vld [vmem:[#allocation7 + $0x54c] sm:$0xf] }
 0x3ac   :  { %2620 = vmatpush.bf16.msra.mxu2 %v4582_v3  ;;  %2593 = vmatpush.bf16.msra.mxu0 %v4554_v18  ;;  %v4702_v3 = vor.u32 %v5461_v55, %v4699_v56  ;;  %v5489_v55 = vld [vmem:[#allocation7 + $0x5ec] sm:$0xf0] }
 0x3ae   :  { %2606 = vmatpush.bf16.msra.mxu1 %v4770_v14  ;;  %2634 = vmatpush.bf16.msra.mxu3 %v4774_v19  ;;  %v5458_v14 = vld [vmem:[#allocation7 + $0x4f4] sm:$0xf0] }
 0x3af   :  { %v4674_v24 = vor.u32 %v5458_v14, %v4673_v13  ;;  %v4563_v14 = vld [vmem:[#allocation7 + $0x410] sm:$0xf0] }
 0x3b0   :  { %2621 = vmatpush.bf16.msra.mxu2 %v4558_v23  ;;  %2594 = vmatpush.bf16.msra.mxu0 %v4530_v39  ;;  %v4462_v23 = vor.u32 %v5401_v9, %v4459_v12  ;;  %v4435_v39 = vld [vmem:[#allocation7 + $0x318] sm:$0xf0] }
 0x3b1   :  { %v5426_v12 = vld [vmem:[#allocation7 + $0x3fc] sm:$0xf] }
 0x3b2   :  { %2607 = vmatpush.bf16.msra.mxu1 %v4746_v32  ;;  %2635 = vmatpush.bf16.msra.mxu3 %v4750_v33  ;;  %v4649_v32 = vld [vmem:[#allocation7 + $0x4b0] sm:$0xf]  ;;  %v5452_v33 = vld [vmem:[#allocation7 + $0x4c4] sm:$0xf0] }
 0x3b3   :  { %v4650_v45 = vor.u32 %v5452_v33, %v4649_v32  ;;  %v5474_v32 = vld [vmem:[#allocation7 + $0x57c] sm:$0xf] }
 0x3b4   :  { %2622 = vmatpush.bf16.msra.mxu2 %v4534_v43  ;;  %2595 = vmatpush.bf16.msra.mxu0 %v4506_v52  ;;  %v4610_v52 = vor.u32 %v5441_v41, %v4609_v40  ;;  %v5414_v40 = vld [vmem:[#allocation7 + $0x39c] sm:$0xf] }
 0x3b6   :  { %2608 = vmatpush.bf16.msra.mxu1 %v4722_v48  ;;  %2636 = vmatpush.bf16.msra.mxu3 %v4726_v49 }
 0x3b8   :  { %2623 = vmatpush.bf16.msra.mxu2 %v4510_v57  ;;  %2596 = vmatpush.bf16.msra.mxu0 %v4482_v6  ;;  %v4614_v57 = vor.u32 %v5438_v42, %v4611_v44  ;;  %v4515_v42 = vld [vmem:[#allocation7 + $0x3b0] sm:$0xf0]  ;;  %v4729_v44 = vld [vmem:[#allocation7 + $0x548] sm:$0xf] }
 0x3ba   :  { %2609 = vmatpush.bf16.msra.mxu1 %v4698_v2  ;;  %2637 = vmatpush.bf16.msra.mxu3 %v4702_v3  ;;  %v4802_v2 = vor.u32 %v5489_v55, %v4801_v53  ;;  %v5486_v3 = vld [vmem:[#allocation7 + $0x5dc] sm:$0xf]  ;;  %v4491_v53 = vld [vmem:[#allocation7 + $0x380] sm:$0xf0] }
 0x3bc   :  { %2624 = vmatpush.bf16.msra.mxu2 %v4486_v11  ;;  %2597 = vmatpush.bf16.msra.mxu0 %v4458_v22  ;;  %v5429_v11 = vld [vmem:[#allocation7 + $0x40c] sm:$0xf0]  ;;  %v4537_v22 = vld [vmem:[#allocation7 + $0x3c8] sm:$0xf] }
 0x3be   :  { %2610 = vmatpush.bf16.msra.mxu1 %v4674_v24  ;;  %2638 = vmatpush.bf16.msra.mxu3 %v4678_v30  ;;  %v4753_v30 = vld [vmem:[#allocation7 + $0x578] sm:$0xf] }
 0x3c0   :  { %2625 = vmatpush.bf16.msra.mxu2 %v4462_v23  ;;  %v5423_v23 = vld [vmem:[#allocation7 + $0x3dc] sm:$0xf0] }
 0x3c2   :  { %2611 = vmatpush.bf16.msra.mxu1 %v4650_v45  ;;  %2639 = vmatpush.bf16.msra.mxu3 %v4654_v58  ;;  %v5471_v45 = vld [vmem:[#allocation7 + $0x55c] sm:$0xf0]  ;;  %v5462_v58 = vld [vmem:[#allocation7 + $0x51c] sm:$0xf] }
 0x3c3   :  { %v4730_v47 = vor.u32 %v5471_v45, %v4729_v44 }
 0x418   :  { %v1615_v10 = vpop.f32.mrf.mxu0 }
 0x419   :  { %v1616_v50 = vadd.f32 %v1615_v10, %v1442_v31 }
 0x41e   :  { %v1629_v36 = vpop.f32.mrf.mxu1  ;;  %v1643_v38 = vpop.f32.mrf.mxu2 }
 0x41f   :  { %v1630_v60 = vadd.f32 %v1629_v36, %v1616_v50  ;;  %v1644_v19 = vadd.f32 %v1643_v38, %v1443_v0  ;;  %v5395_v36 = vld [vmem:[#allocation7 + $0x304] sm:$0xf]  ;;  %v5446_v50 = vld [vmem:[#allocation7 + $0x494] sm:$0xf0] }
 0x420   :  { %v1617_v51 = vpop.f32.mrf.mxu0  ;;  %v4626_v63 = vor.u32 %v5446_v50, %v4625_v54  ;;  %v4489_v54 = vld [vmem:[#allocation7 + $0x368] sm:$0xf]  ;;  %v5411_v50 = vld [vmem:[#allocation7 + $0x37c] sm:$0xf0] }
 0x421   :  { %v1618_v1 = vadd.f32 %v1617_v51, %v1442_v31  ;;  %v1662_v18 = vmax.f32 %v1630_v60, 0.0  ;;  %v5398_v31 = vld [vmem:[#allocation7 + $0x314] sm:$0xf0]  ;;  %v4438_v51 = vor.u32 %v5395_v36, %v4435_v39  ;;  %v5435_v60 = vld [vmem:[#allocation7 + $0x43c] sm:$0xf0] }
 0x422   :  { %v4434_v43 = vor.u32 %v5398_v31, %v4433_v20  ;;  %v4586_v6 = vor.u32 %v5435_v60, %v4585_v59  ;;  %2612 = vmatpush.bf16.msra.mxu1 %v4626_v63  ;;  %v4538_v20 = vor.u32 %v5423_v23, %v4537_v22  ;;  %v5477_v31 = vld [vmem:[#allocation7 + $0x58c] sm:$0xf0]  ;;  %v4513_v39 = vld [vmem:[#allocation7 + $0x398] sm:$0xf]  ;;  %v4707_v60 = vld [vmem:[#allocation7 + $0x530] sm:$0xf0] }
 0x423   :  { %2626 = vmatpush.bf16.msra.mxu2 %v4438_v51  ;;  %v4754_v33 = vor.u32 %v5477_v31, %v4753_v30  ;;  %v5408_v51 = vld [vmem:[#allocation7 + $0x36c] sm:$0xf]  ;;  %v5405_v63 = vld [vmem:[#allocation7 + $0x34c] sm:$0xf0] }
 0x424   :  { %v1657_v61 = vpop.f32.mrf.mxu3  ;;  %2598 = vmatpush.bf16.msra.mxu0 %v4434_v43  ;;  %v4518_v43 = vor.u32 %v5414_v40, %v4515_v42  ;;  %v4494_v55 = vor.u32 %v5408_v51, %v4491_v53 }
 0x425   :  { %v1658_v25 = vadd.f32 %v1657_v61, %v1644_v19  ;;  %v5432_v61 = vld [vmem:[#allocation7 + $0x42c] sm:$0xf]  ;;  %v4778_v19 = vor.u32 %v5483_v17, %v4777_v16  ;;  %v4657_v17 = vld [vmem:[#allocation7 + $0x4b8] sm:$0xf] }
 0x426   :  { %v1631_v5 = vpop.f32.mrf.mxu1  ;;  %v1645_v15 = vpop.f32.mrf.mxu2  ;;  %v4590_v7 = vor.u32 %v5432_v61, %v4587_v62  ;;  %v4710_v61 = vor.u32 %v5462_v58, %v4707_v60  ;;  %v4465_v62 = vld [vmem:[#allocation7 + $0x338] sm:$0xf]  ;;  %v5436_v60 = vld [vmem:[#allocation7 + $0x444] sm:$0xf0] }
 0x427   :  { %v1632_v10 = vadd.f32 %v1631_v5, %v1618_v1  ;;  %v1646_v29 = vadd.f32 %v1645_v15, %v1443_v0  ;;  %v1663_v48 = vmax.f32 %v1658_v25, 0.0  ;;  %v5443_v0 = vld [vmem:[#allocation7 + $0x484] sm:$0xf]  ;;  %v4627_v1 = vld [vmem:[#allocation7 + $0x498] sm:$0xf0]  ;;  %v4566_v15 = vor.u32 %v5426_v12, %v4563_v14 }
 0x428   :  { %v4803_v5 = vld [vmem:[#allocation7 + $0x5f0] sm:$0xf0]  ;;  %v4630_v8 = vor.u32 %v5443_v0, %v4627_v1  ;;  %v5420_v25 = vld [vmem:[#allocation7 + $0x3cc] sm:$0xf]  ;;  %v5402_v0 = vld [vmem:[#allocation7 + $0x33c] sm:$0xf]  ;;  %v4466_v1 = vor.u32 %v5405_v63, %v4465_v62 }
 0x429   :  { %v1664_v21 = vmax.f32 %v1632_v10, 0.0  ;;  %v4806_v9 = vor.u32 %v5486_v3, %v4803_v5  ;;  %v4561_v10 = vld [vmem:[#allocation7 + $0x3f8] sm:$0xf]  ;;  %v4681_v5 = vld [vmem:[#allocation7 + $0x4e8] sm:$0xf] }
 0x42a   :  { %2640 = vmatpush.bf16.msra.mxu3 %v4630_v8  ;;  %v4562_v13 = vor.u32 %v5429_v11, %v4561_v10  ;;  %v4441_v11 = vld [vmem:[#allocation7 + $0x308] sm:$0xf]  ;;  %v5399_v12 = vld [vmem:[#allocation7 + $0x31c] sm:$0xf0]  ;;  %v4595_v62 = vld [vmem:[#allocation7 + $0x448] sm:$0xf0] }
 0x42b   :  { %v1666_v27 = vpack.c.bf16 %v1664_v21, %v1662_v18  ;;  %v5480_v18 = vld [vmem:[#allocation7 + $0x5ac] sm:$0xf]  ;;  %v4779_v21 = vld [vmem:[#allocation7 + $0x5c0] sm:$0xf0]  ;;  %v4442_v14 = vor.u32 %v5399_v12, %v4441_v11  ;;  %v4571_v11 = vld [vmem:[#allocation7 + $0x418] sm:$0xf0] }
 0x42c   :  { %v1659_v34 = vpop.f32.mrf.mxu3  ;;  %v4782_v24 = vor.u32 %v5480_v18, %v4779_v21  ;;  %v5453_v18 = vld [vmem:[#allocation7 + $0x4cc] sm:$0xf0]  ;;  %v4659_v21 = vld [vmem:[#allocation7 + $0x4d0] sm:$0xf0] }
 0x42d   :  { %v1660_v38 = vadd.f32 %v1659_v34, %v1646_v29  ;;  %1842 = vmatmul.bf16.vlgmr.msrb.gmra.mxu0 %v1666_v27  ;;  %1870 = vmatmul.bf16.vlgmr.msrb.gmra.mxu2 %v1666_v27  ;;  %v4539_v27 = vld [vmem:[#allocation7 + $0x3e0] sm:$0xf0]  ;;  %v4755_v34 = vld [vmem:[#allocation7 + $0x590] sm:$0xf0]  ;;  %v4658_v22 = vor.u32 %v5453_v18, %v4657_v17  ;;  %v4787_v18 = vld [vmem:[#allocation7 + $0x5c8] sm:$0xf0] }
 0x42e   :  { %2647 = vmatpush.bf16.msrb.mxu0 %v4610_v52  ;;  %2675 = vmatpush.bf16.msrb.mxu2 %v4614_v57  ;;  %v4542_v29 = vor.u32 %v5420_v25, %v4539_v27  ;;  %v4758_v36 = vor.u32 %v5474_v32, %v4755_v34  ;;  %v4490_v52 = vor.u32 %v5411_v50, %v4489_v54  ;;  %v5465_v57 = vld [vmem:[#allocation7 + $0x52c] sm:$0xf0]  ;;  %v5444_v27 = vld [vmem:[#allocation7 + $0x48c] sm:$0xf]  ;;  %v1668_v32 = vperm.slane %v6019_v4, 1 }
 0x42f   :  { %v1665_v49 = vmax.f32 %v1660_v38, 0.0  ;;  %v5417_v38 = vld [vmem:[#allocation7 + $0x3ac] sm:$0xf0]  ;;  %v4619_v54 = vld [vmem:[#allocation7 + $0x478] sm:$0xf0] }
 0x430   :  { %v4514_v41 = vor.u32 %v5417_v38, %v4513_v39  ;;  %v1669_v39 = vperm.slane %v6019_v4, 3  ;;  %v5481_v17 = vld [vmem:[#allocation7 + $0x5b4] sm:$0xf] }
 0x431   :  { %v1667_v56 = vpack.c.bf16 %v1665_v49, %v1663_v48  ;;  %v4731_v48 = vld [vmem:[#allocation7 + $0x560] sm:$0xf0] }
 0x432   :  { %2648 = vmatpush.bf16.msrb.mxu0 %v4586_v6  ;;  %2676 = vmatpush.bf16.msrb.mxu2 %v4590_v7  ;;  %v4734_v49 = vor.u32 %v5468_v46, %v4731_v48  ;;  %v5459_v6 = vld [vmem:[#allocation7 + $0x4fc] sm:$0xf0]  ;;  %v5456_v7 = vld [vmem:[#allocation7 + $0x4ec] sm:$0xf]  ;;  %v5442_v48 = vld [vmem:[#allocation7 + $0x474] sm:$0xf0] }
 0x433   :  { %1856 = vmatmul.bf16.vlgmr.msrb.gmra.mxu1 %v1667_v56  ;;  %1884 = vmatmul.bf16.vlgmr.msrb.gmra.mxu3 %v1667_v56  ;;  %v4705_v56 = vld [vmem:[#allocation7 + $0x518] sm:$0xf]  ;;  %v4682_v8 = vor.u32 %v5459_v6, %v4681_v5  ;;  %v4617_v46 = vld [vmem:[#allocation7 + $0x460] sm:$0xf] }
 0x434   :  { %2661 = vmatpush.bf16.msrb.mxu1 %v4802_v2  ;;  %2689 = vmatpush.bf16.msrb.mxu3 %v4806_v9  ;;  %v4706_v59 = vor.u32 %v5465_v57, %v4705_v56  ;;  %v4467_v2 = vld [vmem:[#allocation7 + $0x350] sm:$0xf0]  ;;  %v4683_v9 = vld [vmem:[#allocation7 + $0x500] sm:$0xf0]  ;;  %v4618_v4 = vor.u32 %v5442_v48, %v4617_v46  ;;  %v4593_v56 = vld [vmem:[#allocation7 + $0x430] sm:$0xf] }
 0x435   :  { %v4470_v3 = vor.u32 %v5402_v0, %v4467_v2  ;;  %v4686_v10 = vor.u32 %v5456_v7, %v4683_v9  ;;  %v4809_v0 = vld [vmem:[#allocation7 + $0x5e0] sm:$0xf]  ;;  %v4811_v2 = vld [vmem:[#allocation7 + $0x5f8] sm:$0xf0]  ;;  %v5430_v9 = vld [vmem:[#allocation7 + $0x414] sm:$0xf0] }
 0x436   :  { %2649 = vmatpush.bf16.msrb.mxu0 %v4562_v13  ;;  %2677 = vmatpush.bf16.msrb.mxu2 %v4566_v15  ;;  %v5396_v13 = vld [vmem:[#allocation7 + $0x30c] sm:$0xf]  ;;  %v4443_v15 = vld [vmem:[#allocation7 + $0x320] sm:$0xf0]  ;;  %v4569_v6 = vld [vmem:[#allocation7 + $0x400] sm:$0xf] }
 0x437   :  { %v4446_v16 = vor.u32 %v5396_v13, %v4443_v15  ;;  %v5412_v48 = vld [vmem:[#allocation7 + $0x384] sm:$0xf0] }
 0x438   :  { %2662 = vmatpush.bf16.msrb.mxu1 %v4778_v19  ;;  %2690 = vmatpush.bf16.msrb.mxu3 %v4782_v24  ;;  %v5450_v19 = vld [vmem:[#allocation7 + $0x4bc] sm:$0xf]  ;;  %v4633_v24 = vld [vmem:[#allocation7 + $0x488] sm:$0xf] }
 0x439   :  { %v4662_v23 = vor.u32 %v5450_v19, %v4659_v21  ;;  %v4545_v21 = vld [vmem:[#allocation7 + $0x3d0] sm:$0xf] }
 0x43a   :  { %2650 = vmatpush.bf16.msrb.mxu0 %v4538_v20  ;;  %2678 = vmatpush.bf16.msrb.mxu2 %v4542_v29  ;;  %v5447_v20 = vld [vmem:[#allocation7 + $0x49c] sm:$0xf0]  ;;  %v4635_v29 = vld [vmem:[#allocation7 + $0x4a0] sm:$0xf0] }
 0x43b   :  { %v4634_v25 = vor.u32 %v5447_v20, %v4633_v24  ;;  %v4638_v30 = vor.u32 %v5444_v27, %v4635_v29  ;;  %v4790_v20 = vor.u32 %v5481_v17, %v4787_v18  ;;  %v5478_v27 = vld [vmem:[#allocation7 + $0x594] sm:$0xf0]  ;;  %v5475_v29 = vld [vmem:[#allocation7 + $0x584] sm:$0xf]  ;;  %v4665_v17 = vld [vmem:[#allocation7 + $0x4c0] sm:$0xf] }
 0x43c   :  { %2663 = vmatpush.bf16.msrb.mxu1 %v4754_v33  ;;  %2691 = vmatpush.bf16.msrb.mxu3 %v4758_v36  ;;  %v1672_v36 = vperm.slane %v1668_v32, 1  ;;  %v5454_v18 = vld [vmem:[#allocation7 + $0x4d4] sm:$0xf0] }
 0x43e   :  { %2651 = vmatpush.bf16.msrb.mxu0 %v4514_v41  ;;  %2679 = vmatpush.bf16.msrb.mxu2 %v4518_v43  ;;  %v1673_v43 = vperm.slane %v1669_v39, 1  ;;  %v4523_v39 = vld [vmem:[#allocation7 + $0x3b8] sm:$0xf0] }
 0x440   :  { %2664 = vmatpush.bf16.msrb.mxu1 %v4730_v47  ;;  %2692 = vmatpush.bf16.msrb.mxu3 %v4734_v49  ;;  %v5439_v49 = vld [vmem:[#allocation7 + $0x464] sm:$0xf] }
 0x442   :  { %2652 = vmatpush.bf16.msrb.mxu0 %v4490_v52  ;;  %2680 = vmatpush.bf16.msrb.mxu2 %v4494_v55  ;;  %v4622_v55 = vor.u32 %v5439_v49, %v4619_v54  ;;  %v5409_v49 = vld [vmem:[#allocation7 + $0x374] sm:$0xf]  ;;  %v4499_v54 = vld [vmem:[#allocation7 + $0x388] sm:$0xf0] }
 0x444   :  { %2665 = vmatpush.bf16.msrb.mxu1 %v4706_v59  ;;  %2693 = vmatpush.bf16.msrb.mxu3 %v4710_v61  ;;  %v5433_v61 = vld [vmem:[#allocation7 + $0x434] sm:$0xf] }
 0x445   :  { %v4598_v5 = vor.u32 %v5433_v61, %v4595_v62  ;;  %v4473_v61 = vld [vmem:[#allocation7 + $0x340] sm:$0xf]  ;;  %v5406_v62 = vld [vmem:[#allocation7 + $0x354] sm:$0xf0] }
 0x446   :  { %2653 = vmatpush.bf16.msrb.mxu0 %v4466_v1  ;;  %2681 = vmatpush.bf16.msrb.mxu2 %v4470_v3  ;;  %v5487_v1 = vld [vmem:[#allocation7 + $0x5e4] sm:$0xf]  ;;  %v4594_v3 = vor.u32 %v5436_v60, %v4593_v56  ;;  %v4502_v60 = vor.u32 %v5409_v49, %v4499_v54 }
 0x447   :  { %v4814_v13 = vor.u32 %v5487_v1, %v4811_v2  ;;  %v5463_v56 = vld [vmem:[#allocation7 + $0x524] sm:$0xf]  ;;  %v4689_v1 = vld [vmem:[#allocation7 + $0x4f0] sm:$0xf]  ;;  %v5460_v2 = vld [vmem:[#allocation7 + $0x504] sm:$0xf0] }
 0x448   :  { %2666 = vmatpush.bf16.msrb.mxu1 %v4682_v8  ;;  %2694 = vmatpush.bf16.msrb.mxu3 %v4686_v10  ;;  %v5427_v10 = vld [vmem:[#allocation7 + $0x404] sm:$0xf] }
 0x449   :  { %v4574_v19 = vor.u32 %v5427_v10, %v4571_v11  ;;  %v4449_v10 = vld [vmem:[#allocation7 + $0x310] sm:$0xf]  ;;  %v5400_v11 = vld [vmem:[#allocation7 + $0x324] sm:$0xf0] }
 0x44a   :  { %2654 = vmatpush.bf16.msrb.mxu0 %v4442_v14  ;;  %2682 = vmatpush.bf16.msrb.mxu2 %v4446_v16  ;;  %v4785_v14 = vld [vmem:[#allocation7 + $0x5b0] sm:$0xf]  ;;  %v5484_v16 = vld [vmem:[#allocation7 + $0x5c4] sm:$0xf0] }
 0x44b   :  { %v4786_v24 = vor.u32 %v5484_v16, %v4785_v14  ;;  %v4690_v14 = vor.u32 %v5460_v2, %v4689_v1 }
 0x44c   :  { %2667 = vmatpush.bf16.msrb.mxu1 %v4658_v22  ;;  %2695 = vmatpush.bf16.msrb.mxu3 %v4662_v23  ;;  %v5421_v22 = vld [vmem:[#allocation7 + $0x3d4] sm:$0xf]  ;;  %v4547_v23 = vld [vmem:[#allocation7 + $0x3e8] sm:$0xf0] }
 0x44d   :  { %v4550_v32 = vor.u32 %v5421_v22, %v4547_v23  ;;  %v4666_v22 = vor.u32 %v5454_v18, %v4665_v17 }
 0x450   :  { %2668 = vmatpush.bf16.msrb.mxu1 %v4634_v25  ;;  %2696 = vmatpush.bf16.msrb.mxu3 %v4638_v30  ;;  %v4761_v25 = vld [vmem:[#allocation7 + $0x580] sm:$0xf]  ;;  %v4763_v30 = vld [vmem:[#allocation7 + $0x598] sm:$0xf0] }
 0x4aa   :  { %v1843_v31 = vpop.f32.mrf.mxu0 }
 0x4ab   :  { %v1844_v40 = vadd.f32 %v1843_v31, %v1672_v36 }
 0x4b0   :  { %v1857_v33 = vpop.f32.mrf.mxu1  ;;  %v1871_v34 = vpop.f32.mrf.mxu2 }
 0x4b1   :  { %v1858_v42 = vadd.f32 %v1857_v33, %v1844_v40  ;;  %v1872_v52 = vadd.f32 %v1871_v34, %v1673_v43  ;;  %v4521_v33 = vld [vmem:[#allocation7 + $0x3a0] sm:$0xf]  ;;  %v5418_v34 = vld [vmem:[#allocation7 + $0x3b4] sm:$0xf0]  ;;  %v4766_v40 = vor.u32 %v5475_v29, %v4763_v30 }
 0x4b2   :  { %v1845_v38 = vpop.f32.mrf.mxu0 }
 0x4b3   :  { %v1846_v44 = vadd.f32 %v1845_v38, %v1672_v36  ;;  %v6045_v51 = vadd.f32 %v1858_v42, %v6023_v26  ;;  %v5415_v36 = vld [vmem:[#allocation7 + $0x3a4] sm:$0xf]  ;;  %v4762_v38 = vor.u32 %v5478_v27, %v4761_v25  ;;  %v5472_v42 = vld [vmem:[#allocation7 + $0x564] sm:$0xf0]  ;;  %v5445_v25 = vld [vmem:[#allocation7 + $0x494] sm:$0xf] }
 0x4b4   :  { %v4526_v46 = vor.u32 %v5415_v36, %v4523_v39  ;;  %v4643_v27 = vld [vmem:[#allocation7 + $0x4a8] sm:$0xf0] }
 0x4b5   :  { %v4646_v30 = vor.u32 %v5445_v25, %v4643_v27 }
 0x4b6   :  { %v1885_v41 = vpop.f32.mrf.mxu3 }
 0x4b7   :  { %v1886_v57 = vadd.f32 %v1885_v41, %v1872_v52  ;;  %v4737_v41 = vld [vmem:[#allocation7 + $0x550] sm:$0xf] }
 0x4b8   :  { %v1859_v45 = vpop.f32.mrf.mxu1  ;;  %v1873_v50 = vpop.f32.mrf.mxu2 }
 0x4b9   :  { %v1860_v47 = vadd.f32 %v1859_v45, %v1846_v44  ;;  %v1874_v59 = vadd.f32 %v1873_v50, %v1673_v43  ;;  %v6057_v7 = vadd.f32 %v1886_v57, %v6029_v35  ;;  %v4570_v35 = vor.u32 %v5430_v9, %v4569_v6  ;;  %v5469_v43 = vld [vmem:[#allocation7 + $0x554] sm:$0xf]  ;;  %v4739_v44 = vld [vmem:[#allocation7 + $0x568] sm:$0xf0]  ;;  %v4715_v57 = vld [vmem:[#allocation7 + $0x538] sm:$0xf0] }
 0x4ba   :  { %v4522_v45 = vor.u32 %v5418_v34, %v4521_v33  ;;  %v4738_v50 = vor.u32 %v5472_v42, %v4737_v41  ;;  %v4742_v52 = vor.u32 %v5469_v43, %v4739_v44  ;;  %v4474_v6 = vor.u32 %v5406_v62, %v4473_v61 }
 0x4bb   :  { %v6048_v53 = vadd.f32 %v1860_v47, %v6025_v28  ;;  %v5490_v28 = vld [vmem:[#allocation7 + $0x5f4] sm:$0xf0]  ;;  %v4497_v47 = vld [vmem:[#allocation7 + $0x370] sm:$0xf] }
 0x4bc   :  { %v4810_v12 = vor.u32 %v5490_v28, %v4809_v0  ;;  %v4475_v0 = vld [vmem:[#allocation7 + $0x358] sm:$0xf0]  ;;  %v4718_v28 = vor.u32 %v5463_v56, %v4715_v57 }
 0x4bd   :  { %v6052_v58 = vpack.c.bf16 %v6048_v53, %v6045_v51 }
 0x4be   :  { %v1887_v63 = vpop.f32.mrf.mxu3 }
 0x4bf   :  { %v1888_v26 = vadd.f32 %v1887_v63, %v1874_v59  ;;  %2599 = vmatmul.bf16.vlgmr.msra.gmra.mxu0 %v6052_v58  ;;  %2627 = vmatmul.bf16.vlgmr.msra.gmra.mxu2 %v6052_v58  ;;  %v4498_v59 = vor.u32 %v5412_v48, %v4497_v47  ;;  %v5403_v63 = vld [vmem:[#allocation7 + $0x344] sm:$0xf] }
 0x4c0   :  { %2703 = vmatpush.bf16.msra.mxu0 %v4618_v4  ;;  %2731 = vmatpush.bf16.msra.mxu2 %v4622_v55  ;;  %v4713_v4 = vld [vmem:[#allocation7 + $0x520] sm:$0xf]  ;;  %v5466_v55 = vld [vmem:[#allocation7 + $0x534] sm:$0xf0]  ;;  %v4478_v9 = vor.u32 %v5403_v63, %v4475_v0 }
 0x4c1   :  { %v6060_v8 = vadd.f32 %v1888_v26, %v6031_v37  ;;  %v5424_v37 = vld [vmem:[#allocation7 + $0x3e4] sm:$0xf0]  ;;  %v4714_v26 = vor.u32 %v5466_v55, %v4713_v4 }
 0x4c2   :  { %v4546_v31 = vor.u32 %v5424_v37, %v4545_v21  ;;  %v4450_v21 = vor.u32 %v5400_v11, %v4449_v10 }
 0x4c3   :  { %v6064_v15 = vpack.c.bf16 %v6060_v8, %v6057_v7 }
 0x4c4   :  { %2704 = vmatpush.bf16.msra.mxu0 %v4594_v3  ;;  %2732 = vmatpush.bf16.msra.mxu2 %v4598_v5  ;;  %v5457_v3 = vld [vmem:[#allocation7 + $0x4f4] sm:$0xf]  ;;  %v4691_v5 = vld [vmem:[#allocation7 + $0x508] sm:$0xf0] }
 0x4c5   :  { %2613 = vmatmul.bf16.vlgmr.msra.gmra.mxu1 %v6064_v15  ;;  %2641 = vmatmul.bf16.vlgmr.msra.gmra.mxu3 %v6064_v15  ;;  %v4694_v16 = vor.u32 %v5457_v3, %v4691_v5 }
 0x4c6   :  { %2717 = vmatpush.bf16.msra.mxu1 %v4810_v12  ;;  %2745 = vmatpush.bf16.msra.mxu3 %v4814_v13  ;;  %v5397_v12 = vld [vmem:[#allocation7 + $0x314] sm:$0xf]  ;;  %v4451_v13 = vld [vmem:[#allocation7 + $0x328] sm:$0xf0] }
 0x4c7   :  { %v4454_v37 = vor.u32 %v5397_v12, %v4451_v13 }
 0x4c8   :  { %2705 = vmatpush.bf16.msra.mxu0 %v4570_v35  ;;  %2733 = vmatpush.bf16.msra.mxu2 %v4574_v19  ;;  %v5451_v35 = vld [vmem:[#allocation7 + $0x4c4] sm:$0xf]  ;;  %v4667_v19 = vld [vmem:[#allocation7 + $0x4d8] sm:$0xf0] }
 0x4c9   :  { %v4670_v23 = vor.u32 %v5451_v35, %v4667_v19 }
 0x4ca   :  { %2718 = vmatpush.bf16.msra.mxu1 %v4786_v24  ;;  %2746 = vmatpush.bf16.msra.mxu3 %v4790_v20  ;;  %v4641_v24 = vld [vmem:[#allocation7 + $0x490] sm:$0xf]  ;;  %v5448_v20 = vld [vmem:[#allocation7 + $0x4a4] sm:$0xf0] }
 0x4cb   :  { %v4642_v29 = vor.u32 %v5448_v20, %v4641_v24 }
 0x4cc   :  { %2706 = vmatpush.bf16.msra.mxu0 %v4546_v31  ;;  %2734 = vmatpush.bf16.msra.mxu2 %v4550_v32 }
 0x4ce   :  { %2719 = vmatpush.bf16.msra.mxu1 %v4762_v38  ;;  %2747 = vmatpush.bf16.msra.mxu3 %v4766_v40  ;;  %v6076_v40 = vld [vmem:[#allocation8 + $0x6] sm:$0x3f] }
 0x4cf   :  { %2655 = vmatmul.bf16.vlgmr.msrb.gmra.mxu0 %v6052_v58  ;;  %2683 = vmatmul.bf16.vlgmr.msrb.gmra.mxu2 %v6052_v58  ;;  %v2101_v42 = vperm.slane %v6076_v40, 2  ;;  %v2099_v44 = vperm.slane %v6076_v40, 0  ;;  %v2100_v4 = vperm.slane %v6076_v40, 1  ;;  %v2103_v1 = vperm.slane %v6076_v40, 4 }
 0x4d0   :  { %2707 = vmatpush.bf16.msra.mxu0 %v4522_v45  ;;  %2735 = vmatpush.bf16.msra.mxu2 %v4526_v46  ;;  %v2104_v18 = vperm.slane %v6076_v40, 5 }
 0x4d2   :  { %2720 = vmatpush.bf16.msra.mxu1 %v4738_v50  ;;  %2748 = vmatpush.bf16.msra.mxu3 %v4742_v52 }
 0x4d4   :  { %2708 = vmatpush.bf16.msra.mxu0 %v4498_v59  ;;  %2736 = vmatpush.bf16.msra.mxu2 %v4502_v60 }
 0x4d5   :  { %2669 = vmatmul.bf16.vlgmr.msrb.gmra.mxu1 %v6064_v15  ;;  %2697 = vmatmul.bf16.vlgmr.msrb.gmra.mxu3 %v6064_v15 }
 0x4d6   :  { %2721 = vmatpush.bf16.msra.mxu1 %v4714_v26  ;;  %2749 = vmatpush.bf16.msra.mxu3 %v4718_v28 }
 0x4d8   :  { %2709 = vmatpush.bf16.msra.mxu0 %v4474_v6  ;;  %2737 = vmatpush.bf16.msra.mxu2 %v4478_v9 }
 0x4da   :  { %2722 = vmatpush.bf16.msra.mxu1 %v4690_v14  ;;  %2750 = vmatpush.bf16.msra.mxu3 %v4694_v16 }
 0x4dc   :  { %2710 = vmatpush.bf16.msra.mxu0 %v4450_v21  ;;  %2738 = vmatpush.bf16.msra.mxu2 %v4454_v37 }
 0x4de   :  { %2723 = vmatpush.bf16.msra.mxu1 %v4666_v22  ;;  %2751 = vmatpush.bf16.msra.mxu3 %v4670_v23 }
 0x4df   :  { %2711 = vmatmul.bf16.vlgmr.msra.gmra.mxu0 %v6052_v58  ;;  %2739 = vmatmul.bf16.vlgmr.msra.gmra.mxu2 %v6052_v58 }
 0x4e2   :  { %2724 = vmatpush.bf16.msra.mxu1 %v4642_v29  ;;  %2752 = vmatpush.bf16.msra.mxu3 %v4646_v30 }
 0x4e5   :  { %2725 = vmatmul.bf16.vlgmr.msra.gmra.mxu1 %v6064_v15  ;;  %2753 = vmatmul.bf16.vlgmr.msra.gmra.mxu3 %v6064_v15  ;;  %v2102_v15 = vperm.slane %v6076_v40, 3 }
 0x53c   :  { %v2600_v31 = vpop.f32.mrf.mxu0 }
 0x53d   :  { %v2601_v54 = vadd.f32 %v2600_v31, %v2099_v44 }
 0x542   :  { %v2614_v32 = vpop.f32.mrf.mxu1  ;;  %v2628_v33 = vpop.f32.mrf.mxu2 }
 0x543   :  { %v2615_v52 = vadd.f32 %v2614_v32, %v2601_v54  ;;  %v2629_v0 = vadd.f32 %v2628_v33, %v2100_v4 }
 0x544   :  { %v2602_v34 = vpop.f32.mrf.mxu0 }
 0x545   :  { %v2759_v63 = vpack.c.bf16 %v2615_v52, %v2615_v52  ;;  %v2603_v2 = vadd.f32 %v2602_v34, %v2099_v44  ;;  %v5642_v44 = vld [vmem:[#allocation5] sm:$0xff] }
 0x548   :  { %v2642_v36 = vpop.f32.mrf.mxu3 }
 0x549   :  { %v2643_v3 = vadd.f32 %v2642_v36, %v2629_v0 }
 0x54a   :  { %v2616_v39 = vpop.f32.mrf.mxu1  ;;  %v2630_v38 = vpop.f32.mrf.mxu2 }
 0x54b   :  { %v2617_v6 = vadd.f32 %v2616_v39, %v2603_v2  ;;  %v2761_v12 = vpack.c.bf16 %v2643_v3, %v2643_v3  ;;  %v2631_v19 = vadd.f32 %v2630_v38, %v2100_v4 }
 0x54c   :  { %v2656_v41 = vpop.f32.mrf.mxu0 }
 0x54d   :  { %v2657_v58 = vadd.f32 %v2656_v41, %v2101_v42  ;;  %v2760_v35 = vpack.c.bf16 %v2617_v6, %v2617_v6 }
 0x550   :  { %v2644_v43 = vpop.f32.mrf.mxu3 }
 0x551   :  { %v2645_v37 = vadd.f32 %v2644_v43, %v2631_v19  ;;  %v4877_v19 = vld [vmem:[#allocation10 + $0x170] sm:$0xf] }
 0x552   :  { %v2670_v45 = vpop.f32.mrf.mxu1  ;;  %v2684_v46 = vpop.f32.mrf.mxu2 }
 0x553   :  { %v2671_v47 = vadd.f32 %v2670_v45, %v2657_v58  ;;  %v2685_v50 = vadd.f32 %v2684_v46, %v2102_v15  ;;  %v2762_v29 = vpack.c.bf16 %v2645_v37, %v2645_v37  ;;  %v5505_v37 = vld [vmem:[#allocation10 + $0x174] sm:$0xf] }
 0x554   :  { %v2658_v48 = vpop.f32.mrf.mxu0 }
 0x555   :  { %v2763_v49 = vpack.c.bf16 %v2671_v47, %v2671_v47  ;;  %v2659_v56 = vadd.f32 %v2658_v48, %v2101_v42 }
 0x557   :  { %2778 = vmatpush.bf16.xpose.msrb.mxu0 %v2763_v49 }
 0x558   :  { %v2698_v55 = vpop.f32.mrf.mxu3 }
 0x559   :  { %v2699_v57 = vadd.f32 %v2698_v55, %v2685_v50 }
 0x55a   :  { %v2672_v59 = vpop.f32.mrf.mxu1  ;;  %v2686_v60 = vpop.f32.mrf.mxu2 }
 0x55b   :  { %v2765_v61 = vpack.c.bf16 %v2699_v57, %v2699_v57  ;;  %v2673_v62 = vadd.f32 %v2672_v59, %v2659_v56  ;;  %v2687_v5 = vadd.f32 %v2686_v60, %v2102_v15 }
 0x55c   :  { %v2712_v26 = vpop.f32.mrf.mxu0 }
 0x55d   :  { %v2764_v28 = vpack.c.bf16 %v2673_v62, %v2673_v62  ;;  %2804 = vmatpush.bf16.xpose.msrb.mxu2 %v2765_v61  ;;  %v2713_v10 = vadd.f32 %v2712_v26, %v2103_v1 }
 0x55e   :  { %2779 = vmatmul.bf16.vlgmr.msrb.gmra.mxu0 %v2759_v63 }
 0x55f   :  { %2791 = vmatpush.bf16.xpose.msrb.mxu1 %v2764_v28 }
 0x560   :  { %v2700_v9 = vpop.f32.mrf.mxu3 }
 0x561   :  { %v2701_v11 = vadd.f32 %v2700_v9, %v2687_v5 }
 0x562   :  { %v2726_v13 = vpop.f32.mrf.mxu1  ;;  %v2740_v14 = vpop.f32.mrf.mxu2 }
 0x563   :  { %v2766_v16 = vpack.c.bf16 %v2701_v11, %v2701_v11  ;;  %v2727_v17 = vadd.f32 %v2726_v13, %v2713_v10  ;;  %v2741_v24 = vadd.f32 %v2740_v14, %v2104_v18 }
 0x564   :  { %2805 = vmatmul.bf16.vlgmr.msrb.gmra.mxu2 %v2761_v12  ;;  %v2714_v22 = vpop.f32.mrf.mxu0 }
 0x565   :  { %v2767_v21 = vpack.c.bf16 %v2727_v17, %v2727_v17  ;;  %2817 = vmatpush.bf16.xpose.msrb.mxu3 %v2766_v16  ;;  %v2715_v25 = vadd.f32 %v2714_v22, %v2103_v1 }
 0x566   :  { %2792 = vmatmul.bf16.vlgmr.msrb.gmra.mxu1 %v2760_v35 }
 0x567   :  { %v2875_v23 = vsel %vm1136_vm0, %v2767_v21, 0  ;;  %v5506_v21 = vld [vmem:[#allocation10 + $0x174] sm:$0xf0] }
 0x568   :  { %v2754_v20 = vpop.f32.mrf.mxu3  ;;  %2884 = vmatpush.bf16.msra.mxu0 %v2875_v23  ;;  %v4878_v22 = vor.u32 %v5506_v21, %v4877_v19  ;;  %v4879_v23 = vld [vmem:[#allocation10 + $0x178] sm:$0xf0] }
 0x569   :  { %v2755_v27 = vadd.f32 %v2754_v20, %v2741_v24  ;;  %v4869_v24 = vld [vmem:[#allocation10 + $0x160] sm:$0xf]  ;;  %v5504_v20 = vld [vmem:[#allocation10 + $0x164] sm:$0xf0]  ;;  %v4847_v21 = vld [vmem:[#allocation10 + $0x138] sm:$0xf0] }
 0x56a   :  { %v2728_v30 = vpop.f32.mrf.mxu1  ;;  %v2742_v33 = vpop.f32.mrf.mxu2 }
 0x56b   :  { %v2769_v31 = vpack.c.bf16 %v2755_v27, %v2755_v27  ;;  %v2729_v32 = vadd.f32 %v2728_v30, %v2715_v25  ;;  %v2743_v38 = vadd.f32 %v2742_v33, %v2104_v18  ;;  %v4882_v25 = vor.u32 %v5505_v37, %v4879_v23  ;;  %v5503_v27 = vld [vmem:[#allocation10 + $0x164] sm:$0xf]  ;;  %v4941_v30 = vld [vmem:[#allocation10 + $0x1f0] sm:$0xf]  ;;  %v5521_v33 = vld [vmem:[#allocation10 + $0x1f4] sm:$0xf] }
 0x56c   :  { %2818 = vmatmul.bf16.vlgmr.msrb.gmra.mxu3 %v2762_v29  ;;  %v4871_v29 = vld [vmem:[#allocation10 + $0x168] sm:$0xf0]  ;;  %3116 = vmatpush.bf16.msrb.mxu0 %v4878_v22  ;;  %v4917_v22 = vld [vmem:[#allocation10 + $0x1c0] sm:$0xf]  ;;  %v5516_v23 = vld [vmem:[#allocation10 + $0x1c4] sm:$0xf0] }
 0x56d   :  { %v2913_v34 = vsel %vm1136_vm0, %v2769_v31, 0  ;;  %v2768_v36 = vpack.c.bf16 %v2729_v32, %v2729_v32  ;;  %v4870_v31 = vor.u32 %v5504_v20, %v4869_v24  ;;  %v5522_v32 = vld [vmem:[#allocation10 + $0x1f4] sm:$0xf0]  ;;  %v5515_v24 = vld [vmem:[#allocation10 + $0x1c4] sm:$0xf]  ;;  %v4918_v20 = vor.u32 %v5516_v23, %v4917_v22 }
 0x56e   :  { %2922 = vmatpush.bf16.msra.mxu2 %v2913_v34  ;;  %v4943_v34 = vld [vmem:[#allocation10 + $0x1f8] sm:$0xf0]  ;;  %v5554_v23 = vld [vmem:[#allocation13 + $0x1f4] sm:$0xf0] }
 0x56f   :  { %v2894_v39 = vsel %vm1136_vm0, %v2768_v36, 0  ;;  %v4874_v36 = vor.u32 %v5503_v27, %v4871_v29  ;;  %v4837_v27 = vld [vmem:[#allocation10 + $0x120] sm:$0xf]  ;;  %v5496_v29 = vld [vmem:[#allocation10 + $0x124] sm:$0xf0] }
 0x570   :  { %v2756_v40 = vpop.f32.mrf.mxu3  ;;  %2903 = vmatpush.bf16.msra.mxu1 %v2894_v39  ;;  %v4942_v39 = vor.u32 %v5522_v32, %v4941_v30  ;;  %3117 = vmatpush.bf16.msrb.mxu0 %v4870_v31  ;;  %v4838_v31 = vor.u32 %v5496_v29, %v4837_v27  ;;  %v5495_v32 = vld [vmem:[#allocation10 + $0x124] sm:$0xf] }
 0x571   :  { %v2757_v41 = vadd.f32 %v2756_v40, %v2743_v38  ;;  %v4946_v38 = vor.u32 %v5521_v33, %v4943_v34  ;;  %v4839_v33 = vld [vmem:[#allocation10 + $0x128] sm:$0xf0]  ;;  %v4909_v34 = vld [vmem:[#allocation10 + $0x1b0] sm:$0xf] }
 0x572   :  { %3144 = vmatpush.bf16.msrb.mxu2 %v4882_v25  ;;  %v4919_v25 = vld [vmem:[#allocation10 + $0x1c8] sm:$0xf0] }
 0x573   :  { %v2770_v42 = vpack.c.bf16 %v2757_v41, %v2757_v41  ;;  %v4922_v30 = vor.u32 %v5515_v24, %v4919_v25  ;;  %v5553_v24 = vld [vmem:[#allocation13 + $0x1f4] sm:$0xf] }
 0x574   :  { %3130 = vmatpush.bf16.msrb.mxu1 %v4942_v39  ;;  %v5514_v39 = vld [vmem:[#allocation10 + $0x1b4] sm:$0xf0] }
 0x575   :  { %v2932_v43 = vsel %vm1136_vm0, %v2770_v42, 0 }
 0x576   :  { %2941 = vmatpush.bf16.msra.mxu3 %v2932_v43  ;;  %3145 = vmatpush.bf16.msrb.mxu2 %v4874_v36  ;;  %v4842_v36 = vor.u32 %v5495_v32, %v4839_v33  ;;  %v5533_v32 = vld [vmem:[#allocation13 + $0x154] sm:$0xf]  ;;  %v4991_v33 = vld [vmem:[#allocation13 + $0x158] sm:$0xf0] }
 0x57a   :  { %3158 = vmatpush.bf16.msrb.mxu3 %v4946_v38  ;;  %v5513_v38 = vld [vmem:[#allocation10 + $0x1b4] sm:$0xf] }
 0x5db   :  { %v2780_v58 = vpop.f32.mrf.mxu0 }
 0x5dc   :  { %v2781_v45 = vadd.f32 %v5642_v44, %v2780_v58 }
 0x5de   :  { %v2823_v46 = vsel %vm1084_vm1, %v2781_v45, -inf }
 0x5df   :  { %2824 = vmax.xlane.f32.xlu1 %v2823_v46 }
 0x5e3   :  { %v2782_v47 = vpop.f32.mrf.mxu0  ;;  %v2793_v15 = vpop.f32.mrf.mxu1 }
 0x5e4   :  { %v2794_v52 = vadd.f32 %v5642_v44, %v2793_v15 }
 0x5e6   :  { %v2826_v59 = vsel %vm1084_vm1, %v2794_v52, -inf }
 0x5e7   :  { %v2806_v48 = vpop.f32.mrf.mxu2 }
 0x5e8   :  { %v2807_v49 = vadd.f32 %v5642_v44, %v2806_v48 }
 0x5ea   :  { %v2829_v54 = vsel %vm1084_vm1, %v2807_v49, -inf }
 0x5eb   :  { %2830 = vmax.xlane.f32.xlu2 %v2829_v54  ;;  %v2795_v50 = vpop.f32.mrf.mxu1 }
 0x5ef   :  { %v2808_v4 = vpop.f32.mrf.mxu2  ;;  %v2819_v55 = vpop.f32.mrf.mxu3 }
 0x5f0   :  { %v2820_v56 = vadd.f32 %v5642_v44, %v2819_v55  ;;  %v4861_v4 = vld [vmem:[#allocation10 + $0x150] sm:$0xf]  ;;  %v5502_v55 = vld [vmem:[#allocation10 + $0x154] sm:$0xf0] }
 0x5f2   :  { %v2832_v57 = vsel %vm1084_vm1, %v2820_v56, -inf }
 0x5f3   :  { %2833 = vmax.xlane.f32.xlu0 %v2832_v57  ;;  %2827 = vmax.xlane.f32.xlu2 %v2826_v59  ;;  %v4862_v57 = vor.u32 %v5502_v55, %v4861_v4  ;;  %v4863_v59 = vld [vmem:[#allocation10 + $0x158] sm:$0xf0]  ;;  %v4821_v4 = vld [vmem:[#allocation10 + $0x100] sm:$0xf]  ;;  %v5492_v55 = vld [vmem:[#allocation10 + $0x104] sm:$0xf0] }
 0x5f5   :  { %3118 = vmatpush.bf16.msrb.mxu0 %v4862_v57  ;;  %v4822_v57 = vor.u32 %v5492_v55, %v4821_v4  ;;  %v5531_v4 = vld [vmem:[#allocation13 + $0x144] sm:$0xf] }
 0x5f7   :  { %v2821_v60 = vpop.f32.mrf.mxu3 }
 0x652   :  { %v2825_v61 = vpop.xlane.xlu1 %2824 }
 0x653   :  { %v2835_v62 = vsub.f32 %v2781_v45, %v2825_v61  ;;  %v4933_v61 = vld [vmem:[#allocation10 + $0x1e0] sm:$0xf] }
 0x655   :  { %v2839_v63 = vmul.f32 1.442695, %v2835_v62  ;;  %v5520_v62 = vld [vmem:[#allocation10 + $0x1e4] sm:$0xf0] }
 0x657   :  { %5622 = vpow2.f32 %v2839_v63  ;;  %v5519_v63 = vld [vmem:[#allocation10 + $0x1e4] sm:$0xf] }
 0x65d   :  { %v5623_v0 = vpop.eup %5622 }
 0x65e   :  { %v2831_v26 = vpop.xlane.xlu2 %2830  ;;  %v2847_v28 = vsel %vm1084_vm1, %v5623_v0, 0.0 }
 0x65f   :  { %v2837_v1 = vsub.f32 %v2807_v49, %v2831_v26  ;;  %2848 = vadd.xlane.f32.xlu2 %v2847_v28  ;;  %v4935_v26 = vld [vmem:[#allocation10 + $0x1e8] sm:$0xf0]  ;;  %v4853_v28 = vld [vmem:[#allocation10 + $0x140] sm:$0xf] }
 0x661   :  { %v2843_v2 = vmul.f32 1.442695, %v2837_v1  ;;  %v5500_v1 = vld [vmem:[#allocation10 + $0x144] sm:$0xf0] }
 0x663   :  { %5624 = vpow2.f32 %v2843_v2  ;;  %v4938_v2 = vor.u32 %v5519_v63, %v4935_v26  ;;  %v5509_v63 = vld [vmem:[#allocation10 + $0x194] sm:$0xf]  ;;  %v4895_v26 = vld [vmem:[#allocation10 + $0x198] sm:$0xf0] }
 0x665   :  { %3159 = vmatpush.bf16.msrb.mxu3 %v4938_v2  ;;  %v5508_v2 = vld [vmem:[#allocation10 + $0x184] sm:$0xf0] }
 0x666   :  { %v2834_v3 = vpop.xlane.xlu0 %2833  ;;  %v2828_v5 = vpop.xlane.xlu2 %2827 }
 0x667   :  { %v2838_v6 = vsub.f32 %v2820_v56, %v2834_v3  ;;  %v2836_v9 = vsub.f32 %v2794_v52, %v2828_v5  ;;  %v5501_v56 = vld [vmem:[#allocation10 + $0x154] sm:$0xf]  ;;  %v4854_v3 = vor.u32 %v5500_v1, %v4853_v28  ;;  %v5499_v5 = vld [vmem:[#allocation10 + $0x144] sm:$0xf]  ;;  %v4898_v28 = vor.u32 %v5509_v63, %v4895_v26  ;;  %v4885_v1 = vld [vmem:[#allocation10 + $0x180] sm:$0xf] }
 0x668   :  { %v4866_v60 = vor.u32 %v5501_v56, %v4863_v59  ;;  %v5491_v56 = vld [vmem:[#allocation10 + $0x104] sm:$0xf]  ;;  %v4823_v59 = vld [vmem:[#allocation10 + $0x108] sm:$0xf0]  ;;  %v4973_v26 = vld [vmem:[#allocation13 + $0x130] sm:$0xf] }
 0x669   :  { %v5625_v10 = vpop.eup %5624  ;;  %v2845_v11 = vmul.f32 1.442695, %v2838_v6  ;;  %v2841_v12 = vmul.f32 1.442695, %v2836_v9  ;;  %v4855_v6 = vld [vmem:[#allocation10 + $0x148] sm:$0xf0]  ;;  %3119 = vmatpush.bf16.msrb.mxu0 %v4854_v3 }
 0x66a   :  { %v2853_v13 = vsel %vm1084_vm1, %v5625_v10, 0.0  ;;  %3146 = vmatpush.bf16.msrb.mxu2 %v4866_v60  ;;  %v4925_v9 = vld [vmem:[#allocation10 + $0x1d0] sm:$0xf]  ;;  %v4826_v60 = vor.u32 %v5491_v56, %v4823_v59  ;;  %v5507_v3 = vld [vmem:[#allocation10 + $0x184] sm:$0xf] }
 0x66b   :  { %5626 = vpow2.f32 %v2845_v11  ;;  %2854 = vadd.xlane.f32.xlu0 %v2853_v13  ;;  %v5518_v11 = vld [vmem:[#allocation10 + $0x1d4] sm:$0xf0]  ;;  %v4927_v13 = vld [vmem:[#allocation10 + $0x1d8] sm:$0xf0]  ;;  %v4983_v56 = vld [vmem:[#allocation13 + $0x148] sm:$0xf0] }
 0x66c   :  { %5628 = vpow2.f32 %v2841_v12  ;;  %v5517_v12 = vld [vmem:[#allocation10 + $0x1d4] sm:$0xf]  ;;  %v5053_v59 = vld [vmem:[#allocation13 + $0x1d0] sm:$0xf]  ;;  %v5055_v63 = vld [vmem:[#allocation13 + $0x1d8] sm:$0xf0] }
 0x671   :  { %v5627_v14 = vpop.eup %5626 }
 0x672   :  { %v5629_v16 = vpop.eup %5628  ;;  %v2856_v17 = vsel %vm1084_vm1, %v5627_v14, 0.0 }
 0x673   :  { %v2850_v18 = vsel %vm1084_vm1, %v5629_v16, 0.0  ;;  %2857 = vadd.xlane.f32.xlu1 %v2856_v17  ;;  %v4845_v17 = vld [vmem:[#allocation10 + $0x130] sm:$0xf] }
 0x674   :  { %2851 = vadd.xlane.f32.xlu0 %v2850_v18  ;;  %v5498_v18 = vld [vmem:[#allocation10 + $0x134] sm:$0xf0] }
 0x675   :  { %v4846_v19 = vor.u32 %v5498_v18, %v4845_v17  ;;  %v4997_v17 = vld [vmem:[#allocation13 + $0x160] sm:$0xf]  ;;  %v5536_v18 = vld [vmem:[#allocation13 + $0x164] sm:$0xf0] }
 0x676   :  { %v4998_v22 = vor.u32 %v5536_v18, %v4997_v17  ;;  %v5527_v17 = vld [vmem:[#allocation13 + $0x124] sm:$0xf] }
 0x677   :  { %3120 = vmatpush.bf16.msrb.mxu0 %v4846_v19  ;;  %v5535_v19 = vld [vmem:[#allocation13 + $0x164] sm:$0xf] }
 0x67b   :  { %3121 = vmatpush.bf16.msrb.mxu0 %v4838_v31  ;;  %v5534_v31 = vld [vmem:[#allocation13 + $0x154] sm:$0xf0] }
 0x6d2   :  { %v2849_v35 = vpop.xlane.xlu2 %2848 }
 0x6d3   :  { %5630 = vrcp.f32 %v2849_v35  ;;  %v5497_v35 = vld [vmem:[#allocation10 + $0x134] sm:$0xf] }
 0x6d4   :  { %v4850_v37 = vor.u32 %v5497_v35, %v4847_v21  ;;  %v4999_v21 = vld [vmem:[#allocation13 + $0x168] sm:$0xf0] }
 0x6d5   :  { %v5002_v25 = vor.u32 %v5535_v19, %v4999_v21  ;;  %v5037_v21 = vld [vmem:[#allocation13 + $0x1b0] sm:$0xf] }
 0x6d9   :  { %v5631_v40 = vpop.eup %5630 }
 0x6da   :  { %v2863_v41 = vmul.f32 %v5631_v40, %v5623_v0  ;;  %v4934_v0 = vor.u32 %v5520_v62, %v4933_v61  ;;  %v4911_v40 = vld [vmem:[#allocation10 + $0x1b8] sm:$0xf0]  ;;  %v4893_v61 = vld [vmem:[#allocation10 + $0x190] sm:$0xf]  ;;  %v5510_v62 = vld [vmem:[#allocation10 + $0x194] sm:$0xf0] }
 0x6dc   :  { %v2867_v42 = vpack.c.bf16 %v2863_v41, %v2863_v41  ;;  %3131 = vmatpush.bf16.msrb.mxu1 %v4934_v0  ;;  %v4910_v41 = vor.u32 %v5514_v39, %v4909_v34  ;;  %v4894_v0 = vor.u32 %v5510_v62, %v4893_v61  ;;  %v4994_v39 = vor.u32 %v5533_v32, %v4991_v33  ;;  %v5549_v61 = vld [vmem:[#allocation13 + $0x1d4] sm:$0xf]  ;;  %v5029_v33 = vld [vmem:[#allocation13 + $0x1a0] sm:$0xf] }
 0x6de   :  { %v2855_v43 = vpop.xlane.xlu0 %2854  ;;  %4815 = vmatmul.msk.bf16.vlgmr.msra.gmra.mxu0 %vm1084_vm1, %v2867_v42  ;;  %v4914_v42 = vor.u32 %v5513_v38, %v4911_v40 }
 0x6df   :  { %5632 = vrcp.f32 %v2855_v43  ;;  %v4829_v43 = vld [vmem:[#allocation10 + $0x110] sm:$0xf] }
 0x6e5   :  { %v5633_v58 = vpop.eup %5632 }
 0x6e6   :  { %v2865_v44 = vmul.f32 %v5633_v58, %v5625_v10  ;;  %v2858_v45 = vpop.xlane.xlu1 %2857  ;;  %v4858_v10 = vor.u32 %v5499_v5, %v4855_v6  ;;  %v5494_v58 = vld [vmem:[#allocation10 + $0x114] sm:$0xf0]  ;;  %v4886_v5 = vor.u32 %v5508_v2, %v4885_v1  ;;  %v4887_v6 = vld [vmem:[#allocation10 + $0x188] sm:$0xf0]  ;;  %v5529_v2 = vld [vmem:[#allocation13 + $0x134] sm:$0xf] }
 0x6e7   :  { %v2852_v46 = vpop.xlane.xlu0 %2851  ;;  %5634 = vrcp.f32 %v2858_v45  ;;  %v4830_v45 = vor.u32 %v5494_v58, %v4829_v43 }
 0x6e8   :  { %v2869_v47 = vpack.c.bf16 %v2865_v44, %v2865_v44  ;;  %5636 = vrcp.f32 %v2852_v46  ;;  %3147 = vmatpush.bf16.msrb.mxu2 %v4858_v10  ;;  %v5493_v44 = vld [vmem:[#allocation10 + $0x114] sm:$0xf]  ;;  %v4831_v46 = vld [vmem:[#allocation10 + $0x118] sm:$0xf0] }
 0x6e9   :  { %3122 = vmatpush.bf16.msrb.mxu0 %v4830_v45 }
 0x6ea   :  { %4817 = vmatmul.msk.bf16.vlgmr.msra.gmra.mxu2 %vm1084_vm1, %v2869_v47  ;;  %v4834_v47 = vor.u32 %v5493_v44, %v4831_v46  ;;  %v5061_v46 = vld [vmem:[#allocation13 + $0x1e0] sm:$0xf] }
 0x6ec   :  { %3148 = vmatpush.bf16.msrb.mxu2 %v4850_v37  ;;  %v5069_v37 = vld [vmem:[#allocation13 + $0x1f0] sm:$0xf] }
 0x6ed   :  { %v5635_v15 = vpop.eup %5634  ;;  %3123 = vmatpush.bf16.msrb.mxu0 %v4822_v57  ;;  %v5070_v27 = vor.u32 %v5554_v23, %v5069_v37  ;;  %v4986_v57 = vor.u32 %v5531_v4, %v4983_v56  ;;  %v5546_v37 = vld [vmem:[#allocation13 + $0x1b4] sm:$0xf0]  ;;  %v5539_v4 = vld [vmem:[#allocation13 + $0x184] sm:$0xf]  ;;  %v5015_v56 = vld [vmem:[#allocation13 + $0x188] sm:$0xf0] }
 0x6ee   :  { %v5637_v48 = vpop.eup %5636  ;;  %v2866_v49 = vmul.f32 %v5635_v15, %v5627_v14  ;;  %v4926_v14 = vor.u32 %v5518_v11, %v4925_v9  ;;  %v4901_v15 = vld [vmem:[#allocation10 + $0x1a0] sm:$0xf]  ;;  %v4890_v9 = vor.u32 %v5507_v3, %v4887_v6  ;;  %v5005_v11 = vld [vmem:[#allocation13 + $0x170] sm:$0xf]  ;;  %v4975_v3 = vld [vmem:[#allocation13 + $0x138] sm:$0xf0]  ;;  %v5038_v23 = vor.u32 %v5546_v37, %v5037_v21 }
 0x6ef   :  { %v2864_v54 = vmul.f32 %v5637_v48, %v5629_v16  ;;  %v4930_v16 = vor.u32 %v5517_v12, %v4927_v13  ;;  %v5512_v48 = vld [vmem:[#allocation10 + $0x1a4] sm:$0xf0]  ;;  %v5538_v12 = vld [vmem:[#allocation13 + $0x174] sm:$0xf0]  ;;  %v5537_v13 = vld [vmem:[#allocation13 + $0x174] sm:$0xf] }
 0x6f0   :  { %v2870_v50 = vpack.c.bf16 %v2866_v49, %v2866_v49  ;;  %3132 = vmatpush.bf16.msrb.mxu1 %v4926_v14  ;;  %3149 = vmatpush.bf16.msrb.mxu2 %v4842_v36  ;;  %v5511_v49 = vld [vmem:[#allocation10 + $0x1a4] sm:$0xf]  ;;  %v5006_v14 = vor.u32 %v5538_v12, %v5005_v11  ;;  %v5045_v6 = vld [vmem:[#allocation13 + $0x1c0] sm:$0xf]  ;;  %v5547_v11 = vld [vmem:[#allocation13 + $0x1c4] sm:$0xf] }
 0x6f1   :  { %v2868_v52 = vpack.c.bf16 %v2864_v54, %v2864_v54  ;;  %3160 = vmatpush.bf16.msrb.mxu3 %v4930_v16  ;;  %v4902_v54 = vor.u32 %v5512_v48, %v4901_v15  ;;  %v5007_v16 = vld [vmem:[#allocation13 + $0x178] sm:$0xf0]  ;;  %v5551_v15 = vld [vmem:[#allocation13 + $0x1e4] sm:$0xf]  ;;  %v5047_v12 = vld [vmem:[#allocation13 + $0x1c8] sm:$0xf0] }
 0x6f2   :  { %4818 = vmatmul.msk.bf16.vlgmr.msra.gmra.mxu3 %vm1084_vm1, %v2870_v50  ;;  %v4903_v50 = vld [vmem:[#allocation10 + $0x1a8] sm:$0xf0]  ;;  %v5010_v35 = vor.u32 %v5537_v13, %v5007_v16  ;;  %3343 = vmatpush.bf16.msra.mxu0 %v5006_v14  ;;  %v5050_v13 = vor.u32 %v5547_v11, %v5047_v12  ;;  %v4965_v14 = vld [vmem:[#allocation13 + $0x120] sm:$0xf]  ;;  %v5528_v16 = vld [vmem:[#allocation13 + $0x124] sm:$0xf0] }
 0x6f3   :  { %4816 = vmatmul.msk.bf16.vlgmr.msra.gmra.mxu1 %vm1084_vm1, %v2868_v52  ;;  %v4906_v52 = vor.u32 %v5511_v49, %v4903_v50  ;;  %v5063_v49 = vld [vmem:[#allocation13 + $0x1e8] sm:$0xf0]  ;;  %v4981_v50 = vld [vmem:[#allocation13 + $0x140] sm:$0xf]  ;;  %v4966_v18 = vor.u32 %v5528_v16, %v4965_v14  ;;  %v5117_v14 = vld [vmem:[#allocation14 + $0x150] sm:$0xf] }
 0x6f4   :  { %3133 = vmatpush.bf16.msrb.mxu1 %v4918_v20  ;;  %3150 = vmatpush.bf16.msrb.mxu2 %v4834_v47  ;;  %v5071_v20 = vld [vmem:[#allocation13 + $0x1f8] sm:$0xf0]  ;;  %v5552_v47 = vld [vmem:[#allocation13 + $0x1e4] sm:$0xf0]  ;;  %v5566_v16 = vld [vmem:[#allocation14 + $0x154] sm:$0xf0] }
 0x6f5   :  { %3161 = vmatpush.bf16.msrb.mxu3 %v4922_v30  ;;  %v5074_v29 = vor.u32 %v5553_v24, %v5071_v20  ;;  %v4989_v30 = vld [vmem:[#allocation13 + $0x150] sm:$0xf]  ;;  %v5062_v48 = vor.u32 %v5552_v47, %v5061_v46  ;;  %v5039_v24 = vld [vmem:[#allocation13 + $0x1b8] sm:$0xf0]  ;;  %v5542_v47 = vld [vmem:[#allocation13 + $0x194] sm:$0xf0]  ;;  %v5118_v21 = vor.u32 %v5566_v16, %v5117_v14 }
 0x6f6   :  { %3344 = vmatpush.bf16.msra.mxu0 %v4998_v22  ;;  %v4990_v36 = vor.u32 %v5534_v31, %v4989_v30  ;;  %v5545_v22 = vld [vmem:[#allocation13 + $0x1b4] sm:$0xf]  ;;  %v4959_v31 = vld [vmem:[#allocation13 + $0x118] sm:$0xf0]  ;;  %v5021_v46 = vld [vmem:[#allocation13 + $0x190] sm:$0xf] }
 0x6f7   :  { %v5042_v20 = vor.u32 %v5545_v22, %v5039_v24  ;;  %v5560_v14 = vld [vmem:[#allocation14 + $0x124] sm:$0xf0]  ;;  %v5559_v16 = vld [vmem:[#allocation14 + $0x124] sm:$0xf] }
 0x6f8   :  { %3134 = vmatpush.bf16.msrb.mxu1 %v4910_v41  ;;  %3151 = vmatpush.bf16.msrb.mxu2 %v4826_v60  ;;  %v5550_v60 = vld [vmem:[#allocation13 + $0x1d4] sm:$0xf0] }
 0x6f9   :  { %3162 = vmatpush.bf16.msrb.mxu3 %v4914_v42  ;;  %v5054_v62 = vor.u32 %v5550_v60, %v5053_v59  ;;  %v5133_v59 = vld [vmem:[#allocation14 + $0x170] sm:$0xf]  ;;  %v5570_v60 = vld [vmem:[#allocation14 + $0x174] sm:$0xf0] }
 0x6fa   :  { %3345 = vmatpush.bf16.msra.mxu0 %v4990_v36  ;;  %v5543_v36 = vld [vmem:[#allocation13 + $0x1a4] sm:$0xf] }
 0x6fc   :  { %3135 = vmatpush.bf16.msrb.mxu1 %v4902_v54  ;;  %3371 = vmatpush.bf16.msra.mxu2 %v5010_v35  ;;  %v5066_v54 = vor.u32 %v5551_v15, %v5063_v49  ;;  %v4967_v35 = vld [vmem:[#allocation13 + $0x128] sm:$0xf0]  ;;  %v5541_v15 = vld [vmem:[#allocation13 + $0x194] sm:$0xf]  ;;  %v5023_v49 = vld [vmem:[#allocation13 + $0x198] sm:$0xf0] }
 0x6fd   :  { %3163 = vmatpush.bf16.msrb.mxu3 %v4906_v52  ;;  %v5532_v52 = vld [vmem:[#allocation13 + $0x144] sm:$0xf0]  ;;  %v4970_v19 = vor.u32 %v5527_v17, %v4967_v35  ;;  %v6100_v17 = vld [vmem:[#allocation11 + $0x4] sm:$0xf] }
 0x6fe   :  { %v4982_v55 = vor.u32 %v5532_v52, %v4981_v50  ;;  %v5013_v50 = vld [vmem:[#allocation13 + $0x180] sm:$0xf]  ;;  %v5540_v52 = vld [vmem:[#allocation13 + $0x184] sm:$0xf0]  ;;  %v5119_v35 = vld [vmem:[#allocation14 + $0x158] sm:$0xf0] }
 0x6ff   :  { %v2950_v37 = vperm.slane %v6100_v17, 0 }
 0x700   :  { %3136 = vmatpush.bf16.msrb.mxu1 %v4894_v0  ;;  %3372 = vmatpush.bf16.msra.mxu2 %v5002_v25  ;;  %v5058_v0 = vor.u32 %v5549_v61, %v5055_v63  ;;  %v4957_v25 = vld [vmem:[#allocation13 + $0x110] sm:$0xf]  ;;  %v5569_v61 = vld [vmem:[#allocation14 + $0x174] sm:$0xf]  ;;  %v5135_v63 = vld [vmem:[#allocation14 + $0x178] sm:$0xf0] }
 0x701   :  { %3164 = vmatpush.bf16.msrb.mxu3 %v4898_v28  ;;  %3346 = vmatpush.bf16.msra.mxu0 %v4982_v55  ;;  %v5530_v28 = vld [vmem:[#allocation13 + $0x134] sm:$0xf0]  ;;  %v5014_v55 = vor.u32 %v5540_v52, %v5013_v50  ;;  %v2954_v24 = vperm.slane %v2950_v37, 0  ;;  %v5109_v52 = vld [vmem:[#allocation14 + $0x140] sm:$0xf] }
 0x702   :  { %v4974_v1 = vor.u32 %v5530_v28, %v4973_v26  ;;  %v5568_v26 = vld [vmem:[#allocation14 + $0x164] sm:$0xf0]  ;;  %v5138_v28 = vor.u32 %v5569_v61, %v5135_v63  ;;  %v5581_v61 = vld [vmem:[#allocation14 + $0x1d4] sm:$0xf]  ;;  %v5578_v37 = vld [vmem:[#allocation14 + $0x1b4] sm:$0xf0] }
 0x704   :  { %3137 = vmatpush.bf16.msrb.mxu1 %v4886_v5  ;;  %3373 = vmatpush.bf16.msra.mxu2 %v4994_v39  ;;  %v4978_v5 = vor.u32 %v5529_v2, %v4975_v3  ;;  %v5127_v2 = vld [vmem:[#allocation14 + $0x168] sm:$0xf0]  ;;  %v5197_v3 = vld [vmem:[#allocation14 + $0x1f0] sm:$0xf] }
 0x705   :  { %3165 = vmatpush.bf16.msrb.mxu3 %v4890_v9  ;;  %v5548_v9 = vld [vmem:[#allocation13 + $0x1c4] sm:$0xf0]  ;;  %3347 = vmatpush.bf16.msra.mxu0 %v4974_v1  ;;  %v5567_v1 = vld [vmem:[#allocation14 + $0x164] sm:$0xf] }
 0x706   :  { %v5130_v11 = vor.u32 %v5567_v1, %v5127_v2  ;;  %v5103_v2 = vld [vmem:[#allocation14 + $0x138] sm:$0xf0] }
 0x708   :  { %3357 = vmatpush.bf16.msra.mxu1 %v5070_v27  ;;  %3374 = vmatpush.bf16.msra.mxu2 %v4986_v57  ;;  %v5526_v27 = vld [vmem:[#allocation13 + $0x114] sm:$0xf0]  ;;  %v5018_v57 = vor.u32 %v5539_v4, %v5015_v56  ;;  %v5564_v4 = vld [vmem:[#allocation14 + $0x144] sm:$0xf0]  ;;  %v5111_v56 = vld [vmem:[#allocation14 + $0x148] sm:$0xf0] }
 0x709   :  { %3385 = vmatpush.bf16.msra.mxu3 %v5074_v29  ;;  %3348 = vmatpush.bf16.msra.mxu0 %v4966_v18  ;;  %v5525_v29 = vld [vmem:[#allocation13 + $0x114] sm:$0xf]  ;;  %v4958_v30 = vor.u32 %v5526_v27, %v4957_v25  ;;  %v2951_v25 = vperm.slane %v6100_v17, 2 }
 0x70a   :  { %v4962_v32 = vor.u32 %v5525_v29, %v4959_v31  ;;  %v5565_v18 = vld [vmem:[#allocation14 + $0x154] sm:$0xf] }
 0x70b   :  { %v5122_v22 = vor.u32 %v5565_v18, %v5119_v35  ;;  %v5095_v35 = vld [vmem:[#allocation14 + $0x128] sm:$0xf0] }
 0x70c   :  { %3358 = vmatpush.bf16.msra.mxu1 %v5062_v48  ;;  %3375 = vmatpush.bf16.msra.mxu2 %v4978_v5  ;;  %v5022_v48 = vor.u32 %v5542_v47, %v5021_v46 }
 0x70d   :  { %3386 = vmatpush.bf16.msra.mxu3 %v5066_v54  ;;  %3349 = vmatpush.bf16.msra.mxu0 %v4958_v30  ;;  %v5026_v54 = vor.u32 %v5541_v15, %v5023_v49  ;;  %v5584_v15 = vld [vmem:[#allocation14 + $0x1e4] sm:$0xf0] }
 0x710   :  { %3359 = vmatpush.bf16.msra.mxu1 %v5054_v62  ;;  %3376 = vmatpush.bf16.msra.mxu2 %v4970_v19  ;;  %v5134_v62 = vor.u32 %v5570_v60, %v5133_v59 }
 0x711   :  { %3387 = vmatpush.bf16.msra.mxu3 %v5058_v0  ;;  %v5125_v0 = vld [vmem:[#allocation14 + $0x160] sm:$0xf] }
 0x712   :  { %v5126_v5 = vor.u32 %v5568_v26, %v5125_v0  ;;  %v5101_v0 = vld [vmem:[#allocation14 + $0x130] sm:$0xf]  ;;  %v5562_v26 = vld [vmem:[#allocation14 + $0x134] sm:$0xf0] }
 0x713   :  { %v5102_v1 = vor.u32 %v5562_v26, %v5101_v0 }
 0x714   :  { %3377 = vmatpush.bf16.msra.mxu2 %v4962_v32  ;;  %v2955_v32 = vperm.slane %v2951_v25, 0  ;;  %v5085_v25 = vld [vmem:[#allocation14 + $0x110] sm:$0xf] }
 0x715   :  { %3388 = vmatpush.bf16.msra.mxu3 %v5050_v13 }
 0x719   :  { %3389 = vmatpush.bf16.msra.mxu3 %v5042_v20 }
 0x75b   :  { %v2886_v10 = vpop.f32.mrf.mxu0 }
 0x763   :  { %v2888_v34 = vpop.f32.mrf.mxu0 }
 0x764   :  { %v5544_v34 = vld [vmem:[#allocation13 + $0x1a4] sm:$0xf0] }
 0x765   :  { %v5030_v39 = vor.u32 %v5544_v34, %v5029_v33 }
 0x76d   :  { %v2924_v38 = vpop.f32.mrf.mxu2 }
 0x770   :  { %v2905_v40 = vpop.f32.mrf.mxu1 }
 0x771   :  { %v2947_v41 = vpack.c.bf16 %v2905_v40, %v2886_v10  ;;  %v5046_v10 = vor.u32 %v5548_v9, %v5045_v6  ;;  %v5586_v6 = vld [vmem:[#allocation14 + $0x1f4] sm:$0xf0]  ;;  %v5585_v9 = vld [vmem:[#allocation14 + $0x1f4] sm:$0xf] }
 0x772   :  { %v5198_v12 = vor.u32 %v5586_v6, %v5197_v3  ;;  %v5580_v6 = vld [vmem:[#allocation14 + $0x1c4] sm:$0xf0] }
 0x773   :  { %3124 = vmatmul.bf16.vlgmr.msrb.gmra.mxu0 %v2947_v41  ;;  %3152 = vmatmul.bf16.vlgmr.msrb.gmra.mxu2 %v2947_v41  ;;  %v4949_v41 = vld [vmem:[#allocation13 + $0x100] sm:$0xf] }
 0x774   :  { %3360 = vmatpush.bf16.msra.mxu1 %v5046_v10  ;;  %v5199_v10 = vld [vmem:[#allocation14 + $0x1f8] sm:$0xf0] }
 0x775   :  { %v2926_v42 = vpop.f32.mrf.mxu2  ;;  %v2943_v43 = vpop.f32.mrf.mxu3  ;;  %v5202_v13 = vor.u32 %v5585_v9, %v5199_v10  ;;  %v5579_v10 = vld [vmem:[#allocation14 + $0x1c4] sm:$0xf] }
 0x776   :  { %v2948_v58 = vpack.c.bf16 %v2943_v43, %v2924_v38  ;;  %v5031_v38 = vld [vmem:[#allocation13 + $0x1a8] sm:$0xf0]  ;;  %v5524_v42 = vld [vmem:[#allocation13 + $0x104] sm:$0xf0]  ;;  %v5523_v43 = vld [vmem:[#allocation13 + $0x104] sm:$0xf] }
 0x777   :  { %v5034_v40 = vor.u32 %v5543_v36, %v5031_v38 }
 0x778   :  { %v2907_v44 = vpop.f32.mrf.mxu1  ;;  %3138 = vmatmul.bf16.vlgmr.msrb.gmra.mxu1 %v2948_v58  ;;  %3166 = vmatmul.bf16.vlgmr.msrb.gmra.mxu3 %v2948_v58  ;;  %v4950_v58 = vor.u32 %v5524_v42, %v4949_v41 }
 0x779   :  { %3361 = vmatpush.bf16.msra.mxu1 %v5038_v23  ;;  %v4951_v44 = vld [vmem:[#allocation13 + $0x108] sm:$0xf0]  ;;  %3390 = vmatpush.bf16.msra.mxu3 %v5034_v40 }
 0x77a   :  { %3350 = vmatpush.bf16.msra.mxu0 %v4950_v58 }
 0x77d   :  { %v2945_v45 = vpop.f32.mrf.mxu3  ;;  %3362 = vmatpush.bf16.msra.mxu1 %v5030_v39  ;;  %3391 = vmatpush.bf16.msra.mxu3 %v5026_v54  ;;  %v5191_v54 = vld [vmem:[#allocation14 + $0x1e8] sm:$0xf0] }
 0x77e   :  { %v4954_v45 = vor.u32 %v5523_v43, %v4951_v44  ;;  %3571 = vmatpush.bf16.msrb.mxu0 %v5134_v62  ;;  %v5183_v62 = vld [vmem:[#allocation14 + $0x1d8] sm:$0xf0] }
 0x77f   :  { %v5186_v63 = vor.u32 %v5581_v61, %v5183_v62 }
 0x780   :  { %3378 = vmatpush.bf16.msra.mxu2 %v4954_v45 }
 0x781   :  { %3363 = vmatpush.bf16.msra.mxu1 %v5022_v48  ;;  %3392 = vmatpush.bf16.msra.mxu3 %v5018_v57  ;;  %v5583_v48 = vld [vmem:[#allocation14 + $0x1e4] sm:$0xf]  ;;  %v5181_v57 = vld [vmem:[#allocation14 + $0x1d0] sm:$0xf] }
 0x782   :  { %3572 = vmatpush.bf16.msrb.mxu0 %v5126_v5  ;;  %v5194_v50 = vor.u32 %v5583_v48, %v5191_v54  ;;  %v5173_v5 = vld [vmem:[#allocation14 + $0x1c0] sm:$0xf]  ;;  %v5574_v48 = vld [vmem:[#allocation14 + $0x194] sm:$0xf0] }
 0x783   :  { %v5174_v9 = vor.u32 %v5580_v6, %v5173_v5 }
 0x784   :  { %3599 = vmatpush.bf16.msrb.mxu2 %v5138_v28  ;;  %v5561_v28 = vld [vmem:[#allocation14 + $0x134] sm:$0xf] }
 0x785   :  { %3364 = vmatpush.bf16.msra.mxu1 %v5014_v55  ;;  %3613 = vmatpush.bf16.msrb.mxu3 %v5202_v13  ;;  %v5563_v55 = vld [vmem:[#allocation14 + $0x144] sm:$0xf]  ;;  %v5106_v3 = vor.u32 %v5561_v28, %v5103_v2  ;;  %v5093_v13 = vld [vmem:[#allocation14 + $0x120] sm:$0xf] }
 0x786   :  { %3573 = vmatpush.bf16.msrb.mxu0 %v5118_v21  ;;  %v5114_v59 = vor.u32 %v5563_v55, %v5111_v56  ;;  %v5094_v18 = vor.u32 %v5560_v14, %v5093_v13  ;;  %v5165_v21 = vld [vmem:[#allocation14 + $0x1b0] sm:$0xf]  ;;  %v5572_v55 = vld [vmem:[#allocation14 + $0x184] sm:$0xf0] }
 0x788   :  { %3600 = vmatpush.bf16.msrb.mxu2 %v5130_v11  ;;  %v5175_v11 = vld [vmem:[#allocation14 + $0x1c8] sm:$0xf0] }
 0x789   :  { %3585 = vmatpush.bf16.msrb.mxu1 %v5198_v12  ;;  %3614 = vmatpush.bf16.msrb.mxu3 %v5194_v50  ;;  %v5178_v12 = vor.u32 %v5579_v10, %v5175_v11  ;;  %v5151_v50 = vld [vmem:[#allocation14 + $0x198] sm:$0xf0] }
 0x78c   :  { %3601 = vmatpush.bf16.msrb.mxu2 %v5122_v22  ;;  %v5577_v22 = vld [vmem:[#allocation14 + $0x1b4] sm:$0xf] }
 0x78d   :  { %3615 = vmatpush.bf16.msrb.mxu3 %v5186_v63 }
 0x790   :  { %3602 = vmatpush.bf16.msrb.mxu2 %v5114_v59 }
 0x791   :  { %3616 = vmatpush.bf16.msrb.mxu3 %v5178_v12 }
 0x794   :  { %3603 = vmatpush.bf16.msrb.mxu2 %v5106_v3 }
 0x7f0   :  { %v3125_v19 = vpop.f32.mrf.mxu0 }
 0x7f1   :  { %v3126_v29 = vadd.f32 %v3125_v19, %v2954_v24  ;;  %v5098_v19 = vor.u32 %v5559_v16, %v5095_v35 }
 0x7f3   :  { %3604 = vmatpush.bf16.msrb.mxu2 %v5098_v19 }
 0x7f5   :  { %v3139_v23 = vpop.f32.mrf.mxu1 }
 0x7f6   :  { %v3153_v20 = vpop.f32.mrf.mxu2  ;;  %v3140_v31 = vadd.f32 %v3139_v23, %v3126_v29  ;;  %v5166_v23 = vor.u32 %v5578_v37, %v5165_v21  ;;  %v5557_v29 = vld [vmem:[#allocation14 + $0x114] sm:$0xf] }
 0x7f7   :  { %v3154_v40 = vadd.f32 %v3153_v20, %v2955_v32 }
 0x7f8   :  { %v3127_v27 = vpop.f32.mrf.mxu0  ;;  %v6105_v38 = vadd.f32 %v3140_v31, %v6045_v51  ;;  %v5087_v31 = vld [vmem:[#allocation14 + $0x118] sm:$0xf0] }
 0x7f9   :  { %v3128_v33 = vadd.f32 %v3127_v27, %v2954_v24  ;;  %v5167_v24 = vld [vmem:[#allocation14 + $0x1b8] sm:$0xf0]  ;;  %v5558_v27 = vld [vmem:[#allocation14 + $0x114] sm:$0xf0] }
 0x7fa   :  { %v5170_v20 = vor.u32 %v5577_v22, %v5167_v24  ;;  %v3405_v22 = vperm.slane %v6100_v17, 1 }
 0x7fb   :  { %v3167_v30 = vpop.f32.mrf.mxu3 }
 0x7fc   :  { %v3168_v42 = vadd.f32 %v3167_v30, %v3154_v40  ;;  %v5086_v30 = vor.u32 %v5558_v27, %v5085_v25  ;;  %3617 = vmatpush.bf16.msrb.mxu3 %v5170_v20  ;;  %v5159_v40 = vld [vmem:[#allocation14 + $0x1a8] sm:$0xf0]  ;;  %v3409_v24 = vperm.slane %v3405_v22, 1  ;;  %v3406_v20 = vperm.slane %v6100_v17, 3 }
 0x7fd   :  { %v3141_v34 = vpop.f32.mrf.mxu1 }
 0x7fe   :  { %v3142_v36 = vadd.f32 %v3141_v34, %v3128_v33  ;;  %v3155_v39 = vpop.f32.mrf.mxu2  ;;  %v6113_v46 = vadd.f32 %v3168_v42, %v6057_v7  ;;  %v5110_v7 = vor.u32 %v5564_v4, %v5109_v52  ;;  %v5157_v33 = vld [vmem:[#allocation14 + $0x1a0] sm:$0xf]  ;;  %v5576_v34 = vld [vmem:[#allocation14 + $0x1a4] sm:$0xf0] }
 0x7ff   :  { %v3156_v58 = vadd.f32 %v3155_v39, %v2955_v32  ;;  %v5090_v32 = vor.u32 %v5557_v29, %v5087_v31  ;;  %v5158_v39 = vor.u32 %v5576_v34, %v5157_v33  ;;  %v5141_v4 = vld [vmem:[#allocation14 + $0x180] sm:$0xf]  ;;  %v3410_v31 = vperm.slane %v3406_v20, 1 }
 0x800   :  { %v6108_v41 = vadd.f32 %v3142_v36, %v6048_v53  ;;  %v5189_v53 = vld [vmem:[#allocation14 + $0x1e0] sm:$0xf]  ;;  %3574 = vmatpush.bf16.msrb.mxu0 %v5110_v7  ;;  %v5575_v36 = vld [vmem:[#allocation14 + $0x1a4] sm:$0xf]  ;;  %v5142_v56 = vor.u32 %v5572_v55, %v5141_v4 }
 0x801   :  { %v5190_v49 = vor.u32 %v5584_v15, %v5189_v53  ;;  %3605 = vmatpush.bf16.msrb.mxu2 %v5090_v32  ;;  %v5162_v42 = vor.u32 %v5575_v36, %v5159_v40  ;;  %v5149_v15 = vld [vmem:[#allocation14 + $0x190] sm:$0xf]  ;;  %v5571_v7 = vld [vmem:[#allocation14 + $0x184] sm:$0xf] }
 0x802   :  { %v3176_v43 = vpack.c.bf16 %v6108_v41, %v6105_v38  ;;  %v5150_v54 = vor.u32 %v5574_v48, %v5149_v15 }
 0x803   :  { %v3169_v44 = vpop.f32.mrf.mxu3  ;;  %3586 = vmatpush.bf16.msrb.mxu1 %v5190_v49  ;;  %3618 = vmatpush.bf16.msrb.mxu3 %v5162_v42  ;;  %v5573_v49 = vld [vmem:[#allocation14 + $0x194] sm:$0xf] }
 0x804   :  { %v3170_v45 = vadd.f32 %v3169_v44, %v3156_v58  ;;  %3351 = vmatmul.bf16.vlgmr.msra.gmra.mxu0 %v3176_v43  ;;  %3379 = vmatmul.bf16.vlgmr.msra.gmra.mxu2 %v3176_v43  ;;  %v5077_v43 = vld [vmem:[#allocation14 + $0x100] sm:$0xf]  ;;  %v5556_v58 = vld [vmem:[#allocation14 + $0x104] sm:$0xf0]  ;;  %v5555_v44 = vld [vmem:[#allocation14 + $0x104] sm:$0xf]  ;;  %v5154_v52 = vor.u32 %v5573_v49, %v5151_v50 }
 0x805   :  { %3575 = vmatpush.bf16.msrb.mxu0 %v5102_v1 }
 0x806   :  { %v6116_v47 = vadd.f32 %v3170_v45, %v6060_v8  ;;  %v5582_v8 = vld [vmem:[#allocation14 + $0x1d4] sm:$0xf0]  ;;  %v5078_v45 = vor.u32 %v5556_v58, %v5077_v43 }
 0x807   :  { %v5182_v60 = vor.u32 %v5582_v8, %v5181_v57  ;;  %3619 = vmatpush.bf16.msrb.mxu3 %v5154_v52  ;;  %v5143_v57 = vld [vmem:[#allocation14 + $0x188] sm:$0xf0] }
 0x808   :  { %v3177_v51 = vpack.c.bf16 %v6116_v47, %v6113_v46  ;;  %v5146_v8 = vor.u32 %v5571_v7, %v5143_v57 }
 0x809   :  { %3587 = vmatpush.bf16.msrb.mxu1 %v5182_v60  ;;  %3576 = vmatpush.bf16.msrb.mxu0 %v5094_v18  ;;  %v4430_v60 = vld [vmem:[%s6142_s7 + $0x2] sm:$0x3]  ;;  %s5889_s7 = smov [#allocation16]  }
 0x80a   :  { %3365 = vmatmul.bf16.vlgmr.msra.gmra.mxu1 %v3177_v51  ;;  %3393 = vmatmul.bf16.vlgmr.msra.gmra.mxu3 %v3177_v51  ;;  %v5079_v51 = vld [vmem:[#allocation14 + $0x108] sm:$0xf0]  ;;  %v3179_v63 = vperm.slane %v4430_v60, 0  ;;  %v3180_v2 = vperm.slane %v4430_v60, 1  ;;  %s3639_s12 = sshll.u32 %s5889_s7, 4  ;;  %s3640_s12 = int_to_ptr.vmem [resolvable:$true] %s3639_s12 }
 0x80b   :  { %v5082_v53 = vor.u32 %v5555_v44, %v5079_v51  ;;  %3620 = vmatpush.bf16.msrb.mxu3 %v5146_v8 }
 0x80d   :  { %3588 = vmatpush.bf16.msrb.mxu1 %v5174_v9  ;;  %3577 = vmatpush.bf16.msrb.mxu0 %v5086_v30 }
 0x80e   :  { %3606 = vmatpush.bf16.msrb.mxu2 %v5082_v53 }
 0x811   :  { %3589 = vmatpush.bf16.msrb.mxu1 %v5166_v23  ;;  %3578 = vmatpush.bf16.msrb.mxu0 %v5078_v45 }
 0x815   :  { %3590 = vmatpush.bf16.msrb.mxu1 %v5158_v39 }
 0x819   :  { %3591 = vmatpush.bf16.msrb.mxu1 %v5150_v54 }
 0x81d   :  { %3592 = vmatpush.bf16.msrb.mxu1 %v5142_v56 }
 0x881   :  { %v3352_v59 = vpop.f32.mrf.mxu0 }
 0x882   :  { %v3353_v26 = vadd.f32 %v3352_v59, %v3179_v63 }
 0x887   :  { %v3366_v61 = vpop.f32.mrf.mxu1  ;;  %v3380_v62 = vpop.f32.mrf.mxu2 }
 0x888   :  { %v3367_v1 = vadd.f32 %v3366_v61, %v3353_v26  ;;  %v3381_v11 = vadd.f32 %v3380_v62, %v3180_v2 }
 0x889   :  { %v3354_v0 = vpop.f32.mrf.mxu0 }
 0x88a   :  { %v3355_v3 = vadd.f32 %v3354_v0, %v3179_v63  ;;  %v3399_v10 = vmax.f32 %v3367_v1, 0.0 }
 0x88d   :  { %v3394_v28 = vpop.f32.mrf.mxu3 }
 0x88e   :  { %v3395_v13 = vadd.f32 %v3394_v28, %v3381_v11 }
 0x88f   :  { %v3368_v5 = vpop.f32.mrf.mxu1  ;;  %v3382_v9 = vpop.f32.mrf.mxu2 }
 0x890   :  { %v3369_v6 = vadd.f32 %v3368_v5, %v3355_v3  ;;  %v3383_v16 = vadd.f32 %v3382_v9, %v3180_v2  ;;  %v3400_v19 = vmax.f32 %v3395_v13, 0.0 }
 0x892   :  { %v3401_v12 = vmax.f32 %v3369_v6, 0.0 }
 0x894   :  { %v3403_v14 = vpack.c.bf16 %v3401_v12, %v3399_v10 }
 0x895   :  { %v3396_v18 = vpop.f32.mrf.mxu3 }
 0x896   :  { %v3397_v35 = vadd.f32 %v3396_v18, %v3383_v16  ;;  %3579 = vmatmul.bf16.vlgmr.msrb.gmra.mxu0 %v3403_v14  ;;  %3607 = vmatmul.bf16.vlgmr.msrb.gmra.mxu2 %v3403_v14 }
 0x898   :  { %v3402_v21 = vmax.f32 %v3397_v35, 0.0 }
 0x89a   :  { %v3404_v37 = vpack.c.bf16 %v3402_v21, %v3400_v19 }
 0x89c   :  { %3593 = vmatmul.bf16.vlgmr.msrb.gmra.mxu1 %v3404_v37  ;;  %3621 = vmatmul.bf16.vlgmr.msrb.gmra.mxu3 %v3404_v37 }
 0x913   :  { %v3580_v23 = vpop.f32.mrf.mxu0 }
 0x914   :  { %v3581_v25 = vadd.f32 %v3580_v23, %v3409_v24 }
 0x919   :  { %v3594_v27 = vpop.f32.mrf.mxu1  ;;  %v3608_v29 = vpop.f32.mrf.mxu2 }
 0x91a   :  { %v3595_v30 = vadd.f32 %v3594_v27, %v3581_v25  ;;  %v3609_v34 = vadd.f32 %v3608_v29, %v3410_v31 }
 0x91b   :  { %v3582_v33 = vpop.f32.mrf.mxu0 }
 0x91c   :  { %v3627_v32 = vadd.f32 %v3595_v30, %v6105_v38  ;;  %v3583_v39 = vadd.f32 %v3582_v33, %v3409_v24 }
 0x91e   :  { %3631 = vst [vmem:[#allocation16] sm:$0xff] %v3627_v32 }
 0x91f   :  { %v3622_v36 = vpop.f32.mrf.mxu3 }
 0x920   :  { %v3623_v40 = vadd.f32 %v3622_v36, %v3609_v34 }
 0x921   :  { %v3596_v42 = vpop.f32.mrf.mxu1  ;;  %v3610_v44 = vpop.f32.mrf.mxu2 }
 0x922   :  { %v3628_v43 = vadd.f32 %v3623_v40, %v6113_v46  ;;  %v3597_v58 = vadd.f32 %v3596_v42, %v3583_v39  ;;  %v3611_v45 = vadd.f32 %v3610_v44, %v3410_v31 }
 0x924   :  { %3632 = vst [vmem:[#allocation16 + $0x8] sm:$0xff] %v3628_v43  ;;  %v3629_v17 = vadd.f32 %v3597_v58, %v6108_v41 }
 0x926   :  { %3633 = vst [vmem:[#allocation16 + $0x10] sm:$0xff] %v3629_v17 }
 0x927   :  { %v3624_v51 = vpop.f32.mrf.mxu3 }
 0x928   :  { %v3625_v38 = vadd.f32 %v3624_v51, %v3611_v45 }
 0x92a   :  { %v3630_v53 = vadd.f32 %v3625_v38, %v6116_v47 }
 0x92c   :  { %3634 = vst [vmem:[#allocation16 + $0x18] sm:$0xff] %v3630_v53 }
 0x92d   :  { %3647 = dma.vmem_to_hbm [thread:$0]  %s3640_s12, 512, %s3642_s0, [#allocation4], %s5879_s10, %s5879_s10, %s5880_s11  }
 0x92e   :  { %5869 = dma.done.wait [#allocation4], 512  }
 0x92f   :  { %5870 = vsyncadd [#allocation4], 4294966784 }
 0x930   :  { %3652 = vsyncpa [#allocation3], 1 }
 0x931   :  { %3653 = vsyncpa [#allocation6], 1 }
 0x932   :  { %3654 = vsyncpa [#allocation9], 1 }
 0x933   :  { %3655 = vsyncpa [#allocation12], 1 }
 0x934   :  { %3656 = vsyncpa [#allocation15], 1 }
 0x935   :  { %3657 = vsyncpa [#allocation4], 1 }

</bundles_post_ra>
